<compile_context>
chip_gen: v7x
topology: tpu7x:2x2x1
jax: 0.10.0
libtpu: 0.0.40
codegen_flags: <defaults>
</compile_context>

<pallas_src>
import functools

import jax
import jax.numpy as jnp
from jax import lax
from jax.experimental import pallas as pl
from jax.experimental.pallas import tpu as pltpu

NEG_INF = float("-inf")


def _topk_softmax(logits, k, num_experts):
    """Exact top-k mask + softmax (f32). Ties broken by lowest expert index,
    so exactly k experts are kept per token (matches torch.topk + scatter)."""
    col = lax.broadcasted_iota(jnp.int32, logits.shape, 1)
    work = logits
    keep = jnp.zeros(logits.shape, jnp.bool_)
    for _ in range(k):
        cur = jnp.max(work, axis=-1, keepdims=True)
        is_max = work >= cur
        first = jnp.min(jnp.where(is_max, col, num_experts),
                        axis=-1, keepdims=True)
        sel = col == first
        keep = jnp.logical_or(keep, sel)
        work = jnp.where(sel, NEG_INF, work)
    masked = jnp.where(keep, logits, NEG_INF)
    m = jnp.max(masked, axis=-1, keepdims=True)
    e = jnp.exp(masked - m)                       # exp(-inf) == 0 exactly
    return e / jnp.sum(e, axis=-1, keepdims=True)


def moe_expert_kernel(x_ref, wg_ref, bg_ref, w1_ref, b1_ref, w2_ref, b2_ref,
                      wu1_ref, bu1_ref, wu2_ref, bu2_ref,
                      o_ref, acc_ref, gv_ref, *, k, num_experts):
    """One (token-tile, expert) grid step; expert weights streamed per step."""
    e_idx = pl.program_id(1)
    x = x_ref[...]                                            # (tm, D)

    @pl.when(e_idx == 0)
    def _init():
        # Gating: logits = x @ Wg + bg, then exact top-k softmax (f32).
        logits = jnp.dot(x, wg_ref[...], preferred_element_type=jnp.float32)
        logits = logits + bg_ref[...].astype(jnp.float32)
        gv_ref[...] = _topk_softmax(logits, k, num_experts)
        acc_ref[...] = jnp.zeros_like(acc_ref)

    # This step's expert FFN (only this expert's W1/W2 is VMEM-resident).
    h = jnp.dot(x, w1_ref[0], preferred_element_type=jnp.float32)
    h = jnp.maximum(h + b1_ref[0].astype(jnp.float32), 0.0)   # (tm, H)
    oe = jnp.dot(h.astype(w2_ref.dtype), w2_ref[0],
                 preferred_element_type=jnp.float32)
    oe = oe + b2_ref[0].astype(jnp.float32)                   # (tm, D)

    # Gate for this expert via one-hot reduce (no dynamic lane slice).
    col = lax.broadcasted_iota(jnp.int32, (1, num_experts), 1)
    gate = jnp.sum(gv_ref[...] * (col == e_idx).astype(jnp.float32),
                   axis=-1, keepdims=True)                    # (tm, 1)
    acc_ref[...] += gate * oe

    @pl.when(e_idx == num_experts - 1)
    def _finalize():
        # Universal expert scaled by omega = 1 - max gate, then write output.
        hu = jnp.dot(x, wu1_ref[...], preferred_element_type=jnp.float32)
        hu = jnp.maximum(hu + bu1_ref[...].astype(jnp.float32), 0.0)
        uo = jnp.dot(hu.astype(wu2_ref.dtype), wu2_ref[...],
                     preferred_element_type=jnp.float32)
        uo = uo + bu2_ref[...].astype(jnp.float32)
        omega = 1.0 - jnp.max(gv_ref[...], axis=-1, keepdims=True)
        o_ref[...] = (acc_ref[...] + omega * uo).astype(o_ref.dtype)


def moe_shared_kernel(x_ref, wg_ref, bg_ref, w1_ref, b1_ref, w2_ref, b2_ref,
                      o_ref, *, k, num_experts):
    """Fast path: every expert (and the universal expert) shares one FFN, so
    out = (sum_e gate_e + (1 - max gate)) * FFN(x): one matmul pair total."""
    x = x_ref[...]
    logits = jnp.dot(x, wg_ref[...], preferred_element_type=jnp.float32)
    logits = logits + bg_ref[...].astype(jnp.float32)
    gv = _topk_softmax(logits, k, num_experts)
    scale = (jnp.sum(gv, axis=-1, keepdims=True)
             + (1.0 - jnp.max(gv, axis=-1, keepdims=True)))   # (tm, 1)

    h = jnp.dot(x, w1_ref[...], preferred_element_type=jnp.float32)
    h = jnp.maximum(h + b1_ref[...].astype(jnp.float32), 0.0)
    o = jnp.dot(h.astype(w2_ref.dtype), w2_ref[...],
                preferred_element_type=jnp.float32)
    o = o + b2_ref[...].astype(jnp.float32)
    o_ref[...] = (scale * o).astype(o_ref.dtype)


def moe_pallas(x, params, *, k=2, tm=128, compute_dtype=None,
               shared_expert_weights=False,
               vmem_limit_bytes=64 * 1024 * 1024):
    """MoE forward.  tm: token tile (128 fills the v5e MXU; use 256 on
    v6e/v7x).  compute_dtype=jnp.bfloat16 runs the matmuls on the bf16 MXU.
    shared_expert_weights=True exploits the module's shared nn.Sequential."""
    wg, bg, w1, b1, w2, b2, wu1, bu1, wu2, bu2 = params
    B, N, D = x.shape
    T = B * N
    E = wg.shape[1]
    H = w1.shape[2]
    if T % tm:
        raise ValueError(f"T={T} must be divisible by tm={tm}")
    out_dtype = x.dtype

    xt = x.reshape(T, D)
    if compute_dtype is not None:
        xt = xt.astype(compute_dtype)
        wg = wg.astype(compute_dtype)
        w1 = w1.astype(compute_dtype)
        w2 = w2.astype(compute_dtype)
        wu1 = wu1.astype(compute_dtype)
        wu2 = wu2.astype(compute_dtype)
        # biases / softmax / ReLU / accumulation stay in f32.

    cparams = pltpu.CompilerParams(
        dimension_semantics=("parallel",) if shared_expert_weights
        else ("parallel", "arbitrary"),
        vmem_limit_bytes=vmem_limit_bytes,
    )

    if shared_expert_weights:
        kern = functools.partial(moe_shared_kernel, k=k, num_experts=E)
        out = pl.pallas_call(
            kern,
            out_shape=jax.ShapeDtypeStruct((T, D), out_dtype),
            grid_spec=pltpu.PrefetchScalarGridSpec(
                num_scalar_prefetch=0,
                grid=(T // tm,),
                in_specs=[
                    pl.BlockSpec((tm, D), lambda i: (i, 0)),   # x tokens
                    pl.BlockSpec((D, E), lambda i: (0, 0)),    # Wg
                    pl.BlockSpec((1, E), lambda i: (0, 0)),    # bg
                    pl.BlockSpec((D, H), lambda i: (0, 0)),    # shared W1
                    pl.BlockSpec((1, H), lambda i: (0, 0)),    # shared b1
                    pl.BlockSpec((H, D), lambda i: (0, 0)),    # shared W2
                    pl.BlockSpec((1, D), lambda i: (0, 0)),    # shared b2
                ],
                out_specs=pl.BlockSpec((tm, D), lambda i: (i, 0)),
            ),
            compiler_params=cparams,
        )(xt, wg, bg, wu1, bu1, wu2, bu2)
        return out.reshape(B, N, D)

    # General path: stream one expert's weights per inner grid step.
    b1r = b1.reshape(E, 1, H)
    b2r = b2.reshape(E, 1, D)
    kern = functools.partial(moe_expert_kernel, k=k, num_experts=E)
    # NOTE: the constant-index specs (Wg, bg, Wu*, bu*) could additionally be
    # single-buffered (pipeline_mode=pl.Buffered(1)) to halve their resident
    # VMEM; left at the default here.  A further optimization would use
    # scalar-prefetched top-k expert ids so only k (not E) experts are visited.
    out = pl.pallas_call(
        kern,
        out_shape=jax.ShapeDtypeStruct((T, D), out_dtype),
        grid_spec=pltpu.PrefetchScalarGridSpec(
            num_scalar_prefetch=0,
            grid=(T // tm, E),                                  # experts last
            in_specs=[
                pl.BlockSpec((tm, D), lambda i, e: (i, 0)),     # x tokens
                pl.BlockSpec((D, E), lambda i, e: (0, 0)),      # Wg
                pl.BlockSpec((1, E), lambda i, e: (0, 0)),      # bg
                pl.BlockSpec((1, D, H), lambda i, e: (e, 0, 0)),  # W1[e]
                pl.BlockSpec((1, 1, H), lambda i, e: (e, 0, 0)),  # b1[e]
                pl.BlockSpec((1, H, D), lambda i, e: (e, 0, 0)),  # W2[e]
                pl.BlockSpec((1, 1, D), lambda i, e: (e, 0, 0)),  # b2[e]
                pl.BlockSpec((D, H), lambda i, e: (0, 0)),      # Wu1
                pl.BlockSpec((1, H), lambda i, e: (0, 0)),      # bu1
                pl.BlockSpec((H, D), lambda i, e: (0, 0)),      # Wu2
                pl.BlockSpec((1, D), lambda i, e: (0, 0)),      # bu2
            ],
            out_specs=pl.BlockSpec((tm, D), lambda i, e: (i, 0)),
            scratch_shapes=[
                pltpu.VMEM((tm, D), jnp.float32),               # accumulator
                pltpu.VMEM((tm, E), jnp.float32),               # gating values
            ],
        ),
        compiler_params=cparams,
    )(xt, wg, bg, w1, b1r, w2, b2r, wu1, bu1, wu2, bu2)
    return out.reshape(B, N, D)


def moe_reference(x, params, *, k=2):
    """Plain-JAX reference mirroring the PyTorch forward."""
    wg, bg, w1, b1, w2, b2, wu1, bu1, wu2, bu2 = params
    B, N, D = x.shape
    xt = x.reshape(-1, D)
    T = xt.shape[0]
    logits = xt @ wg + bg[0]
    vals, idx = jax.lax.top_k(logits, k)
    mask = jnp.full_like(logits, -jnp.inf)
    mask = mask.at[jnp.arange(T)[:, None], idx].set(vals)
    gv = jax.nn.softmax(mask, axis=-1)

    def expert(xx, W1, bb1, W2, bb2):
        return jnp.maximum(xx @ W1 + bb1, 0.0) @ W2 + bb2

    eo = jnp.stack([expert(xt, w1[e], b1[e], w2[e], b2[e])
                    for e in range(wg.shape[1])], axis=1)       # (T, E, D)
    omega = 1.0 - jnp.max(gv, axis=1, keepdims=True)
    uo = omega * expert(xt, wu1, bu1[0], wu2, bu2[0])
    out = jnp.sum(gv[..., None] * eo, axis=1) + uo
    return out.reshape(B, N, D)


def init_params(key, num_experts, input_dim, hidden, dtype=jnp.float32):
    """Deterministic init; all experts (and the universal expert) share
    weights, matching the PyTorch module which reuses one nn.Sequential."""
    k1, k2, k3, k4, k5, k6 = jax.random.split(key, 6)
    s1 = 1.0 / jnp.sqrt(input_dim)
    s2 = 1.0 / jnp.sqrt(hidden)
    W1 = jax.random.uniform(k1, (input_dim, hidden), dtype, -s1, s1)
    b1 = jax.random.uniform(k2, (hidden,), dtype, -s1, s1)
    W2 = jax.random.uniform(k3, (hidden, input_dim), dtype, -s2, s2)
    b2 = jax.random.uniform(k4, (input_dim,), dtype, -s2, s2)
    Wg = jax.random.uniform(k5, (input_dim, num_experts), dtype, -s1, s1)
    bg = jax.random.uniform(k6, (num_experts,), dtype, -s1, s1)

    w1_stack = jnp.asarray(jnp.broadcast_to(W1, (num_experts, input_dim, hidden)))
    b1_stack = jnp.asarray(jnp.broadcast_to(b1, (num_experts, hidden)))
    w2_stack = jnp.asarray(jnp.broadcast_to(W2, (num_experts, hidden, input_dim)))
    b2_stack = jnp.asarray(jnp.broadcast_to(b2, (num_experts, input_dim)))
    return (Wg, bg.reshape(1, -1),
            w1_stack, b1_stack, w2_stack, b2_stack,
            W1, b1.reshape(1, -1), W2, b2.reshape(1, -1))


if __name__ == "__main__":
    # Small but lane/sublane-aligned demo sizes (D, H multiples of 128).
    B, N, D, H, E, K = 2, 128, 128, 256, 4, 2
    key = jax.random.PRNGKey(0)
    kx, kp = jax.random.split(key)
    x = jax.random.normal(kx, (B, N, D), jnp.float32)
    params = init_params(kp, E, D, H)

    ref = moe_reference(x, params, k=K)

    # General streamed-expert kernel (f32).
    out = jax.block_until_ready(moe_pallas(x, params, k=K, tm=128))
    assert out.shape == (B, N, D)
    assert jnp.allclose(out, ref, atol=1e-4, rtol=1e-4), (
        float(jnp.max(jnp.abs(out - ref))))

    # Shared-weight fast path (exploits the module's single nn.Sequential).
    out_fast = jax.block_until_ready(
        moe_pallas(x, params, k=K, tm=128, shared_expert_weights=True))
    assert jnp.allclose(out_fast, ref, atol=1e-4, rtol=1e-4), (
        float(jnp.max(jnp.abs(out_fast - ref))))

    # bf16-MXU path: exercise it and sanity-check (looser numerics by design).
    out_bf16 = jax.block_until_ready(
        moe_pallas(x, params, k=K, tm=128, compute_dtype=jnp.bfloat16))
    assert out_bf16.shape == (B, N, D)
    assert bool(jnp.all(jnp.isfinite(out_bf16)))

    print("KERNEL_OK")
</pallas_src>

<mosaic_0001>
module attributes {stable_mosaic.version = 11 : i64} {
  func.func @moe_expert_kernel(%arg0: i32, %arg1: i32, %arg2: memref<128x128xf32, #tpu.memory_space<vmem>>, %arg3: memref<128x4xf32, #tpu.memory_space<vmem>>, %arg4: memref<1x4xf32, #tpu.memory_space<vmem>>, %arg5: memref<1x128x256xf32, #tpu.memory_space<vmem>>, %arg6: memref<1x1x256xf32, #tpu.memory_space<vmem>>, %arg7: memref<1x256x128xf32, #tpu.memory_space<vmem>>, %arg8: memref<1x1x128xf32, #tpu.memory_space<vmem>>, %arg9: memref<128x256xf32, #tpu.memory_space<vmem>>, %arg10: memref<1x256xf32, #tpu.memory_space<vmem>>, %arg11: memref<256x128xf32, #tpu.memory_space<vmem>>, %arg12: memref<1x128xf32, #tpu.memory_space<vmem>>, %arg13: memref<128x128xf32, #tpu.memory_space<vmem>>, %arg14: memref<128x128xf32, #tpu.memory_space<vmem>>, %arg15: memref<128x4xf32, #tpu.memory_space<vmem>>) attributes {dimension_semantics = [#tpu.dimension_semantics<parallel>, #tpu.dimension_semantics<arbitrary>], iteration_bounds = array<i64: 2, 4>, scalar_prefetch = 0 : i64, scratch_operands = 2 : i64, tpu.core_type = #tpu.core_type<tc>, window_params = [{transform_indices = @transform_0, window_bounds = array<i64: 128, 128>}, {pipeline_mode = #tpu.pipeline_mode<synchronous>, transform_indices = @transform_1, window_bounds = array<i64: 128, 4>}, {pipeline_mode = #tpu.pipeline_mode<synchronous>, transform_indices = @transform_2, window_bounds = array<i64: 1, 4>}, {transform_indices = @transform_3, window_bounds = array<i64: 1, 128, 256>}, {transform_indices = @transform_4, window_bounds = array<i64: 1, 1, 256>}, {transform_indices = @transform_5, window_bounds = array<i64: 1, 256, 128>}, {transform_indices = @transform_6, window_bounds = array<i64: 1, 1, 128>}, {pipeline_mode = #tpu.pipeline_mode<synchronous>, transform_indices = @transform_7, window_bounds = array<i64: 128, 256>}, {pipeline_mode = #tpu.pipeline_mode<synchronous>, transform_indices = @transform_8, window_bounds = array<i64: 1, 256>}, {pipeline_mode = #tpu.pipeline_mode<synchronous>, transform_indices = @transform_9, window_bounds = array<i64: 256, 128>}, {pipeline_mode = #tpu.pipeline_mode<synchronous>, transform_indices = @transform_10, window_bounds = array<i64: 1, 128>}, {transform_indices = @transform_11, window_bounds = array<i64: 128, 128>}]} {
    %c0 = arith.constant 0 : index
    %c0_0 = arith.constant 0 : index
    %0 = vector.load %arg2[%c0, %c0_0] : memref<128x128xf32, #tpu.memory_space<vmem>>, vector<128x128xf32>
    %c0_i32 = arith.constant 0 : i32
    %1 = arith.cmpi eq, %arg1, %c0_i32 : i32
    %2 = arith.extui %1 : i1 to i32
    %c0_i32_1 = arith.constant 0 : i32
    %3 = arith.cmpi ne, %2, %c0_i32_1 : i32
    scf.if %3 {
      %c0_24 = arith.constant 0 : index
      %c0_25 = arith.constant 0 : index
      %38 = vector.load %arg3[%c0_24, %c0_25] : memref<128x4xf32, #tpu.memory_space<vmem>>, vector<128x4xf32>
      %cst_26 = arith.constant dense<0.000000e+00> : vector<128x4xf32>
      %39 = tpu.matmul %0, %38, %cst_26 {dimension_numbers = #tpu.dot_dimension_numbers<[1], [0], [0], [1], [0, 0, 1, 1], [], []>} : vector<128x128xf32>, vector<128x4xf32>, vector<128x4xf32> -> vector<128x4xf32>
      %c0_27 = arith.constant 0 : index
      %c0_28 = arith.constant 0 : index
      %40 = vector.load %arg4[%c0_27, %c0_28] : memref<1x4xf32, #tpu.memory_space<vmem>>, vector<1x4xf32>
      %41 = vector.broadcast %40 : vector<1x4xf32> to vector<128x4xf32>
      %42 = arith.addf %39, %41 : vector<128x4xf32>
      %43 = tpu.iota {dimensions = array<i32: 1>} : vector<128x4xi32>
      %false = arith.constant false
      %44 = vector.broadcast %false : i1 to vector<128x4xi1>
      %cst_29 = arith.constant dense<0xFF800000> : vector<128xf32>
      %45 = vector.multi_reduction <maximumf>, %42, %cst_29 [1] : vector<128x4xf32> to vector<128xf32>
      %46 = vector.shape_cast %45 : vector<128xf32> to vector<128x1xf32>
      %47 = vector.broadcast %46 : vector<128x1xf32> to vector<128x4xf32>
      %48 = arith.cmpf oge, %42, %47 : vector<128x4xf32>
      %c4_i32 = arith.constant 4 : i32
      %49 = vector.broadcast %c4_i32 : i32 to vector<128x4xi32>
      %50 = arith.select %48, %43, %49 : vector<128x4xi1>, vector<128x4xi32>
      %cst_30 = arith.constant dense<2147483647> : vector<128xi32>
      %51 = vector.multi_reduction <minsi>, %50, %cst_30 [1] : vector<128x4xi32> to vector<128xi32>
      %52 = vector.shape_cast %51 : vector<128xi32> to vector<128x1xi32>
      %53 = vector.broadcast %52 : vector<128x1xi32> to vector<128x4xi32>
      %54 = arith.cmpi eq, %43, %53 : vector<128x4xi32>
      %55 = arith.ori %44, %54 : vector<128x4xi1>
      %cst_31 = arith.constant 0xFF800000 : f32
      %56 = vector.broadcast %cst_31 : f32 to vector<128x4xf32>
      %57 = arith.select %54, %56, %42 : vector<128x4xi1>, vector<128x4xf32>
      %cst_32 = arith.constant dense<0xFF800000> : vector<128xf32>
      %58 = vector.multi_reduction <maximumf>, %57, %cst_32 [1] : vector<128x4xf32> to vector<128xf32>
      %59 = vector.shape_cast %58 : vector<128xf32> to vector<128x1xf32>
      %60 = vector.broadcast %59 : vector<128x1xf32> to vector<128x4xf32>
      %61 = arith.cmpf oge, %57, %60 : vector<128x4xf32>
      %c4_i32_33 = arith.constant 4 : i32
      %62 = vector.broadcast %c4_i32_33 : i32 to vector<128x4xi32>
      %63 = arith.select %61, %43, %62 : vector<128x4xi1>, vector<128x4xi32>
      %cst_34 = arith.constant dense<2147483647> : vector<128xi32>
      %64 = vector.multi_reduction <minsi>, %63, %cst_34 [1] : vector<128x4xi32> to vector<128xi32>
      %65 = vector.shape_cast %64 : vector<128xi32> to vector<128x1xi32>
      %66 = vector.broadcast %65 : vector<128x1xi32> to vector<128x4xi32>
      %67 = arith.cmpi eq, %43, %66 : vector<128x4xi32>
      %68 = arith.ori %55, %67 : vector<128x4xi1>
      %cst_35 = arith.constant 0xFF800000 : f32
      %69 = vector.broadcast %cst_35 : f32 to vector<128x4xf32>
      %70 = arith.select %68, %42, %69 : vector<128x4xi1>, vector<128x4xf32>
      %cst_36 = arith.constant dense<0xFF800000> : vector<128xf32>
      %71 = vector.multi_reduction <maximumf>, %70, %cst_36 [1] : vector<128x4xf32> to vector<128xf32>
      %72 = vector.shape_cast %71 : vector<128xf32> to vector<128x1xf32>
      %73 = vector.broadcast %72 : vector<128x1xf32> to vector<128x4xf32>
      %74 = arith.subf %70, %73 : vector<128x4xf32>
      %75 = math.exp %74 : vector<128x4xf32>
      %cst_37 = arith.constant dense<0.000000e+00> : vector<128xf32>
      %76 = vector.multi_reduction <add>, %75, %cst_37 [1] : vector<128x4xf32> to vector<128xf32>
      %77 = vector.shape_cast %76 : vector<128xf32> to vector<128x1xf32>
      %78 = vector.broadcast %77 : vector<128x1xf32> to vector<128x4xf32>
      %79 = arith.divf %75, %78 : vector<128x4xf32>
      %c0_38 = arith.constant 0 : index
      %c0_39 = arith.constant 0 : index
      %80 = vector.load %arg15[%c0_38, %c0_39] : memref<128x4xf32, #tpu.memory_space<vmem>>, vector<128x4xf32>
      tpu.vector_store %arg15[%c0_38, %c0_39], %79 {strides = array<i32>} : memref<128x4xf32, #tpu.memory_space<vmem>>, vector<128x4xf32>,
      %cst_40 = arith.constant 0.000000e+00 : f32
      %81 = vector.broadcast %cst_40 : f32 to vector<128x128xf32>
      %c0_41 = arith.constant 0 : index
      %c0_42 = arith.constant 0 : index
      %82 = vector.load %arg14[%c0_41, %c0_42] : memref<128x128xf32, #tpu.memory_space<vmem>>, vector<128x128xf32>
      tpu.vector_store %arg14[%c0_41, %c0_42], %81 {strides = array<i32>} : memref<128x128xf32, #tpu.memory_space<vmem>>, vector<128x128xf32>,
    } else {
    }
    %c0_2 = arith.constant 0 : index
    %c0_3 = arith.constant 0 : index
    %c0_4 = arith.constant 0 : index
    %4 = vector.load %arg5[%c0_2, %c0_3, %c0_4] : memref<1x128x256xf32, #tpu.memory_space<vmem>>, vector<1x128x256xf32>
    %5 = vector.shape_cast %4 : vector<1x128x256xf32> to vector<128x256xf32>
    %cst = arith.constant dense<0.000000e+00> : vector<128x256xf32>
    %6 = tpu.matmul %0, %5, %cst {dimension_numbers = #tpu.dot_dimension_numbers<[1], [0], [0], [1], [0, 0, 1, 1], [], []>} : vector<128x128xf32>, vector<128x256xf32>, vector<128x256xf32> -> vector<128x256xf32>
    %c0_5 = arith.constant 0 : index
    %c0_6 = arith.constant 0 : index
    %c0_7 = arith.constant 0 : index
    %7 = vector.load %arg6[%c0_5, %c0_6, %c0_7] : memref<1x1x256xf32, #tpu.memory_space<vmem>>, vector<1x1x256xf32>
    %8 = vector.shape_cast %7 : vector<1x1x256xf32> to vector<1x256xf32>
    %9 = vector.broadcast %8 : vector<1x256xf32> to vector<128x256xf32>
    %10 = arith.addf %6, %9 : vector<128x256xf32>
    %cst_8 = arith.constant 0.000000e+00 : f32
    %11 = vector.broadcast %cst_8 : f32 to vector<128x256xf32>
    %12 = arith.maximumf %10, %11 : vector<128x256xf32>
    %c0_9 = arith.constant 0 : index
    %c0_10 = arith.constant 0 : index
    %c0_11 = arith.constant 0 : index
    %13 = vector.load %arg7[%c0_9, %c0_10, %c0_11] : memref<1x256x128xf32, #tpu.memory_space<vmem>>, vector<1x256x128xf32>
    %14 = vector.shape_cast %13 : vector<1x256x128xf32> to vector<256x128xf32>
    %cst_12 = arith.constant dense<0.000000e+00> : vector<128x128xf32>
    %15 = tpu.matmul %12, %14, %cst_12 {dimension_numbers = #tpu.dot_dimension_numbers<[1], [0], [0], [1], [0, 0, 1, 1], [], []>} : vector<128x256xf32>, vector<256x128xf32>, vector<128x128xf32> -> vector<128x128xf32>
    %c0_13 = arith.constant 0 : index
    %c0_14 = arith.constant 0 : index
    %c0_15 = arith.constant 0 : index
    %16 = vector.load %arg8[%c0_13, %c0_14, %c0_15] : memref<1x1x128xf32, #tpu.memory_space<vmem>>, vector<1x1x128xf32>
    %17 = vector.shape_cast %16 : vector<1x1x128xf32> to vector<1x128xf32>
    %18 = vector.broadcast %17 : vector<1x128xf32> to vector<128x128xf32>
    %19 = arith.addf %15, %18 : vector<128x128xf32>
    %20 = tpu.iota {dimensions = array<i32: 1>} : vector<1x4xi32>
    %c0_16 = arith.constant 0 : index
    %c0_17 = arith.constant 0 : index
    %21 = vector.load %arg15[%c0_16, %c0_17] : memref<128x4xf32, #tpu.memory_space<vmem>>, vector<128x4xf32>
    %22 = vector.broadcast %arg1 : i32 to vector<1x4xi32>
    %23 = arith.cmpi eq, %20, %22 : vector<1x4xi32>
    %24 = arith.extui %23 : vector<1x4xi1> to vector<1x4xi32>
    %25 = arith.sitofp %24 : vector<1x4xi32> to vector<1x4xf32>
    %26 = vector.broadcast %25 : vector<1x4xf32> to vector<128x4xf32>
    %27 = arith.mulf %21, %26 : vector<128x4xf32>
    %cst_18 = arith.constant dense<0.000000e+00> : vector<128xf32>
    %28 = vector.multi_reduction <add>, %27, %cst_18 [1] : vector<128x4xf32> to vector<128xf32>
    %29 = vector.shape_cast %28 : vector<128xf32> to vector<128x1xf32>
    %c0_19 = arith.constant 0 : index
    %c0_20 = arith.constant 0 : index
    %30 = vector.load %arg14[%c0_19, %c0_20] : memref<128x128xf32, #tpu.memory_space<vmem>>, vector<128x128xf32>
    %31 = vector.broadcast %29 : vector<128x1xf32> to vector<128x128xf32>
    %32 = arith.mulf %31, %19 : vector<128x128xf32>
    %33 = arith.addf %30, %32 : vector<128x128xf32>
    %c0_21 = arith.constant 0 : index
    %c0_22 = arith.constant 0 : index
    %34 = vector.load %arg14[%c0_21, %c0_22] : memref<128x128xf32, #tpu.memory_space<vmem>>, vector<128x128xf32>
    tpu.vector_store %arg14[%c0_21, %c0_22], %33 {strides = array<i32>} : memref<128x128xf32, #tpu.memory_space<vmem>>, vector<128x128xf32>,
    %c3_i32 = arith.constant 3 : i32
    %35 = arith.cmpi eq, %arg1, %c3_i32 : i32
    %36 = arith.extui %35 : i1 to i32
    %c0_i32_23 = arith.constant 0 : i32
    %37 = arith.cmpi ne, %36, %c0_i32_23 : i32
    scf.if %37 {
      %c0_24 = arith.constant 0 : index
      %c0_25 = arith.constant 0 : index
      %38 = vector.load %arg9[%c0_24, %c0_25] : memref<128x256xf32, #tpu.memory_space<vmem>>, vector<128x256xf32>
      %cst_26 = arith.constant dense<0.000000e+00> : vector<128x256xf32>
      %39 = tpu.matmul %0, %38, %cst_26 {dimension_numbers = #tpu.dot_dimension_numbers<[1], [0], [0], [1], [0, 0, 1, 1], [], []>} : vector<128x128xf32>, vector<128x256xf32>, vector<128x256xf32> -> vector<128x256xf32>
      %c0_27 = arith.constant 0 : index
      %c0_28 = arith.constant 0 : index
      %40 = vector.load %arg10[%c0_27, %c0_28] : memref<1x256xf32, #tpu.memory_space<vmem>>, vector<1x256xf32>
      %41 = vector.broadcast %40 : vector<1x256xf32> to vector<128x256xf32>
      %42 = arith.addf %39, %41 : vector<128x256xf32>
      %cst_29 = arith.constant 0.000000e+00 : f32
      %43 = vector.broadcast %cst_29 : f32 to vector<128x256xf32>
      %44 = arith.maximumf %42, %43 : vector<128x256xf32>
      %c0_30 = arith.constant 0 : index
      %c0_31 = arith.constant 0 : index
      %45 = vector.load %arg11[%c0_30, %c0_31] : memref<256x128xf32, #tpu.memory_space<vmem>>, vector<256x128xf32>
      %cst_32 = arith.constant dense<0.000000e+00> : vector<128x128xf32>
      %46 = tpu.matmul %44, %45, %cst_32 {dimension_numbers = #tpu.dot_dimension_numbers<[1], [0], [0], [1], [0, 0, 1, 1], [], []>} : vector<128x256xf32>, vector<256x128xf32>, vector<128x128xf32> -> vector<128x128xf32>
      %c0_33 = arith.constant 0 : index
      %c0_34 = arith.constant 0 : index
      %47 = vector.load %arg12[%c0_33, %c0_34] : memref<1x128xf32, #tpu.memory_space<vmem>>, vector<1x128xf32>
      %48 = vector.broadcast %47 : vector<1x128xf32> to vector<128x128xf32>
      %49 = arith.addf %46, %48 : vector<128x128xf32>
      %c0_35 = arith.constant 0 : index
      %c0_36 = arith.constant 0 : index
      %50 = vector.load %arg15[%c0_35, %c0_36] : memref<128x4xf32, #tpu.memory_space<vmem>>, vector<128x4xf32>
      %cst_37 = arith.constant dense<0xFF800000> : vector<128xf32>
      %51 = vector.multi_reduction <maximumf>, %50, %cst_37 [1] : vector<128x4xf32> to vector<128xf32>
      %52 = vector.shape_cast %51 : vector<128xf32> to vector<128x1xf32>
      %cst_38 = arith.constant 1.000000e+00 : f32
      %53 = vector.broadcast %cst_38 : f32 to vector<128x1xf32>
      %54 = arith.subf %53, %52 : vector<128x1xf32>
      %c0_39 = arith.constant 0 : index
      %c0_40 = arith.constant 0 : index
      %55 = vector.load %arg14[%c0_39, %c0_40] : memref<128x128xf32, #tpu.memory_space<vmem>>, vector<128x128xf32>
      %56 = vector.broadcast %54 : vector<128x1xf32> to vector<128x128xf32>
      %57 = arith.mulf %56, %49 : vector<128x128xf32>
      %58 = arith.addf %55, %57 : vector<128x128xf32>
      %c0_41 = arith.constant 0 : index
      %c0_42 = arith.constant 0 : index
      %59 = vector.load %arg13[%c0_41, %c0_42] : memref<128x128xf32, #tpu.memory_space<vmem>>, vector<128x128xf32>
      tpu.vector_store %arg13[%c0_41, %c0_42], %58 {strides = array<i32>} : memref<128x128xf32, #tpu.memory_space<vmem>>, vector<128x128xf32>,
    } else {
    }
    return
  }
  func.func @transform_0(%arg0: i32, %arg1: i32) -> (i32, i32) {
    %c0_i32 = arith.constant 0 : i32
    %c0_i32_0 = arith.constant 0 : i32
    return %arg0, %c0_i32 : i32, i32
  }
  func.func @transform_1(%arg0: i32, %arg1: i32) -> (i32, i32) {
    %c0_i32 = arith.constant 0 : i32
    %c0_i32_0 = arith.constant 0 : i32
    %c0_i32_1 = arith.constant 0 : i32
    return %c0_i32, %c0_i32_0 : i32, i32
  }
  func.func @transform_2(%arg0: i32, %arg1: i32) -> (i32, i32) {
    %c0_i32 = arith.constant 0 : i32
    %c0_i32_0 = arith.constant 0 : i32
    %c0_i32_1 = arith.constant 0 : i32
    return %c0_i32, %c0_i32_0 : i32, i32
  }
  func.func @transform_3(%arg0: i32, %arg1: i32) -> (i32, i32, i32) {
    %c0_i32 = arith.constant 0 : i32
    %c0_i32_0 = arith.constant 0 : i32
    %c0_i32_1 = arith.constant 0 : i32
    return %arg1, %c0_i32, %c0_i32_0 : i32, i32, i32
  }
  func.func @transform_4(%arg0: i32, %arg1: i32) -> (i32, i32, i32) {
    %c0_i32 = arith.constant 0 : i32
    %c0_i32_0 = arith.constant 0 : i32
    %c0_i32_1 = arith.constant 0 : i32
    return %arg1, %c0_i32, %c0_i32_0 : i32, i32, i32
  }
  func.func @transform_5(%arg0: i32, %arg1: i32) -> (i32, i32, i32) {
    %c0_i32 = arith.constant 0 : i32
    %c0_i32_0 = arith.constant 0 : i32
    %c0_i32_1 = arith.constant 0 : i32
    return %arg1, %c0_i32, %c0_i32_0 : i32, i32, i32
  }
  func.func @transform_6(%arg0: i32, %arg1: i32) -> (i32, i32, i32) {
    %c0_i32 = arith.constant 0 : i32
    %c0_i32_0 = arith.constant 0 : i32
    %c0_i32_1 = arith.constant 0 : i32
    return %arg1, %c0_i32, %c0_i32_0 : i32, i32, i32
  }
  func.func @transform_7(%arg0: i32, %arg1: i32) -> (i32, i32) {
    %c0_i32 = arith.constant 0 : i32
    %c0_i32_0 = arith.constant 0 : i32
    %c0_i32_1 = arith.constant 0 : i32
    return %c0_i32, %c0_i32_0 : i32, i32
  }
  func.func @transform_8(%arg0: i32, %arg1: i32) -> (i32, i32) {
    %c0_i32 = arith.constant 0 : i32
    %c0_i32_0 = arith.constant 0 : i32
    %c0_i32_1 = arith.constant 0 : i32
    return %c0_i32, %c0_i32_0 : i32, i32
  }
  func.func @transform_9(%arg0: i32, %arg1: i32) -> (i32, i32) {
    %c0_i32 = arith.constant 0 : i32
    %c0_i32_0 = arith.constant 0 : i32
    %c0_i32_1 = arith.constant 0 : i32
    return %c0_i32, %c0_i32_0 : i32, i32
  }
  func.func @transform_10(%arg0: i32, %arg1: i32) -> (i32, i32) {
    %c0_i32 = arith.constant 0 : i32
    %c0_i32_0 = arith.constant 0 : i32
    %c0_i32_1 = arith.constant 0 : i32
    return %c0_i32, %c0_i32_0 : i32, i32
  }
  func.func @transform_11(%arg0: i32, %arg1: i32) -> (i32, i32) {
    %c0_i32 = arith.constant 0 : i32
    %c0_i32_0 = arith.constant 0 : i32
    return %arg0, %c0_i32 : i32, i32
  }
}

</mosaic_0001>

<bundles_post_ra>
// kernel: tpu_custom_call.1
= control target key start
LH: loop header
LB: loop body
LE: loop exit
PB: predicated region body
PF: predicated region fallthrough
CT: control target
= control target key end

     0   :  { %s6371_s0 = inlined_call_operand.hbm [shape: f32[256,128], index: 0, kind: input, shape index: {}]   ;;  %s6372_s1 = inlined_call_operand.hbm [shape: f32[128,4], index: 1, kind: input, shape index: {}]   ;;  %s6373_s2 = inlined_call_operand.hbm [shape: f32[1,4], index: 2, kind: input, shape index: {}]   ;;  %s6374_s3 = inlined_call_operand.hbm [shape: f32[4,128,256], index: 3, kind: input, shape index: {}]   ;;  %s6375_s4 = inlined_call_operand.hbm [shape: f32[4,1,256], index: 4, kind: input, shape index: {}]   ;;  %s6376_s5 = inlined_call_operand.hbm [shape: f32[4,256,128], index: 5, kind: input, shape index: {}]   ;;  %s6377_s6 = inlined_call_operand.hbm [shape: f32[4,1,128], index: 6, kind: input, shape index: {}]   ;;  %s6378_s7 = inlined_call_operand.hbm [shape: f32[128,256], index: 7, kind: input, shape index: {}]   ;;  %s6379_s8 = inlined_call_operand.hbm [shape: f32[1,256], index: 8, kind: input, shape index: {}]   ;;  %s6380_s9 = inlined_call_operand.hbm [shape: f32[256,128], index: 9, kind: input, shape index: {}]   ;;  %s6381_s10 = inlined_call_operand.hbm [shape: f32[1,128], index: 10, kind: input, shape index: {}]   ;;  %s6382_s11 = inlined_call_operand.hbm [shape: f32[256,128], index: 11, kind: output, shape index: {}]  }
   0x1   :  { %6457 = sst [smem:[#allocation70_spill]] %s6371_s0 }
   0x2   :  { %6458 = sst [smem:[#allocation71_spill]] %s6372_s1 }
   0x3   :  { %6459 = sst [smem:[#allocation72_spill]] %s6373_s2 }
   0x4   :  { %6460 = sst [smem:[#allocation73_spill]] %s6374_s3 }
   0x5   :  { %6461 = sst [smem:[#allocation74_spill]] %s6375_s4 }
   0x6   :  { %6462 = sst [smem:[#allocation75_spill]] %s6376_s5 }
   0x7   :  { %6463 = sst [smem:[#allocation76_spill]] %s6377_s6 }
   0x8   :  { %6464 = sst [smem:[#allocation77_spill]] %s6378_s7 }
   0x9   :  { %6465 = sst [smem:[#allocation78_spill]] %s6379_s8 }
   0xa   :  { %6466 = sst [smem:[#allocation79_spill]] %s6380_s9 }
   0xb   :  { %6467 = sst [smem:[#allocation80_spill]] %s6381_s10 }
   0xc   :  { %6468 = sst [smem:[#allocation81_spill]] %s6382_s11 }
   0xd   :  { %16 = vsyncpa [#allocation5], 0 }
   0xe   :  { %18 = vsyncpa [#allocation5 + $0x1], 0 }
   0xf   :  { %19 = vsyncpa [#allocation8], 0 }
  0x10   :  { %20 = vsyncpa [#allocation11], 0 }
  0x11   :  { %22 = vsyncpa [#allocation11 + $0x1], 0 }
  0x12   :  { %23 = vsyncpa [#allocation14], 0 }
  0x13   :  { %25 = vsyncpa [#allocation14 + $0x1], 0 }
  0x14   :  { %26 = vsyncpa [#allocation17], 0 }
  0x15   :  { %27 = vsyncpa [#allocation20], 0 }
  0x16   :  { %28 = vsyncpa [#allocation6], 0 }
  0x17   :  { %30 = vsyncpa [#allocation6 + $0x1], 0  ;;  %s4418_s17 = smov 0   ;;  %s4420_s18 = smov 0  }
  0x18   :  { %s4422_s19 = smov 0   ;;  %s4424_s20 = smov 0  }
  0x19   :  { %s4426_s21 = smov 0   ;;  %s4428_s22 = smov 0  }
  0x1a   :  { %s4430_s23 = smov 0   ;;  %s4432_s24 = smov 0  }
  0x1b   :  { %s4434_s25 = smov 0   ;;  %s4436_s26 = smov 0  }
  0x1c   :  { %s4438_s27 = smov 0  }
  0x1d LB: > { %6469 = sst [smem:[#allocation30_spill]] %s4299_s18  ;;  %s4474_s28 = sadd.s32 4294967295, %s4335_s27   ;;  %s4335_s27 = sphi %s4438_s27, %s36_s27   ;;  %s4331_s26 = sphi %s4436_s26, %s6634_s26   ;;  %s4327_s25 = sphi %s4434_s25, %s6630_s25   ;;  %s4323_s24 = sphi %s4432_s24, %s6633_s24   ;;  %s4319_s23 = sphi %s4430_s23, %s6629_s23   ;;  %s4315_s22 = sphi %s4428_s22, %s6632_s22   ;;  %s4311_s21 = sphi %s4426_s21, %s6631_s21   ;;  %s4307_s20 = sphi %s4424_s20, %s6628_s20   ;;  %s4303_s19 = sphi %s4422_s19, %s6627_s19   ;;  %s4299_s18 = sphi %s4420_s18, %s6626_s18   ;;  %s4295_s17 = sphi %s4418_s17, %s6625_s17  }
  0x1e   : > { %6470 = sst [smem:[#allocation31_spill]] %s4303_s19  ;;  %p3146_p0 = scmp.ge.s32.totalorder %s4335_s27, 1 }
  0x1f   : > { %6471 = sst [smem:[#allocation32_spill]] %s4307_s20  ;;  %p6387_p1 = scmp.eq.s32.totalorder %s4474_s28, 0 }
  0x20   : > { %6472 = sst [smem:[#allocation33_spill]] %s4311_s21  ;;  %p335_p2 = scmp.lt.s32.totalorder %s4335_s27, 9 }
  0x21   : > { %6473 = sst [smem:[#allocation34_spill]] %s4319_s23  ;;  %s4337_s30 = smov [#allocation7]  }
  0x22   : > { %6474 = sst [smem:[#allocation35_spill]] %s4323_s24  ;;  %p4479_p3 = pnand %p3146_p0, %p335_p2 }
  0x23   : > { %6475 = sst [smem:[#allocation36_spill]] %s4327_s25  ;;  %s347_s12 = sshll.u32 %s4337_s30, 4  ;;  %s348_s12 = int_to_ptr.vmem [resolvable:$true] %s347_s12 }
  0x24   : > { %6476 = sst [smem:[#allocation37_spill]] %s4474_s28  ;;  %p3655_p4 = pneg %p4479_p3 }
  0x25   : > { %s6477_s29 = scalar_select %p4479_p3, 1, 0 }
  0x26   : > { %p4487_p5 = pnand %p3655_p4, %p6387_p1  ;;  %s4338_s14 = smov [#allocation16]  }
  0x27   : > { %6478 = sst [smem:[#allocation38_spill]] %s6477_s29  ;;  %s371_s15 = sshll.u32 %s4338_s14, 4  ;;  %s4491_s15 = int_to_ptr.vmem [resolvable:$true] %s371_s15 }
  0x28   : > { %s6479_s13 = scalar_select %p4487_p5, 1, 0 }
  0x29   : > { %s6480_s1 = sld [smem:[#allocation71_spill]]  ;;  %p4501_p7 = pneg %p4487_p5 }
  0x2b   : > { %s6481_s30 = scalar_select %p4501_p7, 1, 0 }
  0x2f   : > { %s3875_s24 = scalar_lea.hbm %s6480_s1, 2048 }
  0x30   : > { %p3876_p6 = scmp.ne.s32.totalorder %s6480_s1, %s3875_s24  ;;  %p3882_p10 = scmp.lt.u32.totalorder %s3875_s24, %s6480_s1 }
  0x32   : > { %p3878_p8 = pnand %p4501_p7, %p3876_p6 }
  0x34   : > { %p3879_p9 = pneg %p3878_p8 }
  0x36   : > { %p3884_p11 = pnand %p3882_p10, %p3879_p9 }
  0x38   : > { %3887 = shalt.err (!%p3884_p11)
}
  0x39   : > { %s3888_s11 = scalar_lea.vmem %s348_s12, 2048  ;;  %p3896_p2 = scmp.lt.s32.totalorder %s348_s12, %s348_s12 }
  0x3a   : > { %p3889_p12 = scmp.ne.s32.totalorder %s348_s12, %s3888_s11  ;;  %p3897_p4 = scmp.lt.s32.totalorder %s3888_s11, %s3888_s11 }
  0x3c   : > { %p3891_p13 = pnand %p3889_p12, %p4501_p7  ;;  %p3898_p1 = por %p3897_p4, %p3896_p2 }
  0x3e   : > { %p3892_p0 = pneg %p3891_p13 }
  0x40   : > { %p3899_p3 = pnand %p3898_p1, %p3892_p0 }
  0x42   : > { %3902 = shalt.err (!%p3899_p3)
}
  0x43   : > { %s6392_s6 = smov 128   ;;  %s6394_s23 = smov 8  }
  0x44   : > { %3658 = dma.hbm_to_vmem [thread:$0]  (!%p4487_p5), %s6480_s1, 2048, %s348_s12, [#allocation8], %s6392_s6, %s6392_s6, %s6394_s23  }
  0x45   : > { %s6482_s7 = sld [smem:[#allocation77_spill]] }
  0x4b   : > { %s3903_s4 = scalar_lea.hbm %s6482_s7, 4096 }
  0x4c   : > { %p3904_p1 = scmp.ne.s32.totalorder %s6482_s7, %s3903_s4  ;;  %p3910_p8 = scmp.lt.u32.totalorder %s3903_s4, %s6482_s7 }
  0x4e   : > { %p3906_p3 = pnand %p3904_p1, %p4501_p7 }
  0x50   : > { %p3907_p6 = pneg %p3906_p3 }
  0x52   : > { %p3912_p9 = pnand %p3910_p8, %p3907_p6 }
  0x54   : > { %3915 = shalt.err (!%p3912_p9)
}
  0x55   : > { %s3916_s12 = scalar_lea.vmem %s4491_s15, 4096  ;;  %p3924_p13 = scmp.lt.s32.totalorder %s4491_s15, %s4491_s15 }
  0x56   : > { %p3917_p10 = scmp.ne.s32.totalorder %s4491_s15, %s3916_s12  ;;  %p3925_p0 = scmp.lt.s32.totalorder %s3916_s12, %s3916_s12 }
  0x58   : > { %p3919_p11 = pnand %p3917_p10, %p4501_p7  ;;  %p3926_p2 = por %p3925_p0, %p3924_p13 }
  0x5a   : > { %p3920_p12 = pneg %p3919_p11 }
  0x5c   : > { %p3927_p4 = pnand %p3926_p2, %p3920_p12 }
  0x5e   : > { %3930 = shalt.err (!%p3927_p4)
}
  0x5f   : > { %s6396_s0 = smov 256   ;;  %s6397_s4 = smov 16  }
  0x60   : > { %3664 = dma.hbm_to_vmem [thread:$0]  (!%p4487_p5), %s6482_s7, 4096, %s4491_s15, [#allocation17], %s6396_s0, %s6396_s0, %s6397_s4  }
  0x61   : > { %s4343_s24 = smov [#allocation19]   ;;  %s6483_s9 = sld [smem:[#allocation79_spill]] }
  0x62   : > { %s395_s29 = sshll.u32 %s4343_s24, 4  ;;  %s396_s29 = int_to_ptr.vmem [resolvable:$true] %s395_s29 }
  0x67   : > { %s3931_s11 = scalar_lea.hbm %s6483_s9, 4096 }
  0x68   : > { %p3932_p1 = scmp.ne.s32.totalorder %s6483_s9, %s3931_s11  ;;  %p3938_p8 = scmp.lt.u32.totalorder %s3931_s11, %s6483_s9 }
  0x6a   : > { %p3934_p3 = pnand %p3932_p1, %p4501_p7 }
  0x6c   : > { %p3935_p6 = pneg %p3934_p3 }
  0x6e   : > { %p3940_p9 = pnand %p3938_p8, %p3935_p6 }
  0x70   : > { %3943 = shalt.err (!%p3940_p9)
}
  0x71   : > { %s3944_s15 = scalar_lea.vmem %s396_s29, 4096  ;;  %p3952_p13 = scmp.lt.s32.totalorder %s396_s29, %s396_s29 }
  0x72   : > { %p3945_p10 = scmp.ne.s32.totalorder %s396_s29, %s3944_s15  ;;  %p3953_p0 = scmp.lt.s32.totalorder %s3944_s15, %s3944_s15 }
  0x74   : > { %p3947_p11 = pnand %p3945_p10, %p4501_p7  ;;  %p3954_p2 = por %p3953_p0, %p3952_p13 }
  0x76   : > { %p3948_p12 = pneg %p3947_p11 }
  0x78   : > { %p3955_p4 = pnand %p3954_p2, %p3948_p12 }
  0x7a   : > { %3958 = shalt.err (!%p3955_p4)
}
  0x7b   : > { %s6484_s6 = smov 8   ;;  %s6485_s20 = smov 128  }
  0x7c   : > { %3670 = dma.hbm_to_vmem [thread:$0]  (!%p4487_p5), %s6483_s9, 4096, %s396_s29, [#allocation20], %s6485_s20, %s6485_s20, %s6484_s6  }
  0x7d   : > { %s45_s21 = sadd.s32 1, %s4327_s25  ;;  %p6402_p3 = scmp.eq.s32.totalorder %s4335_s27, 0 }
  0x7e   : > { %p4568_p1 = scmp.ge.s32.totalorder %s45_s21, 4  ;;  %s123_s16 = sadd.s32 1, %s4303_s19 }
  0x7f   : > { %p130_p6 = scmp.ne.s32.totalorder %s4303_s19, %s4299_s18  ;;  %p136_p9 = scmp.ne.s32.totalorder %s4299_s18, %s4295_s17 }
  0x80   : > { %s6486_s24 = scalar_select %p4568_p1, 1, 0 }
  0x81   : > { %s6636_s21 = smov (%p4568_p1, %s45_s21), 0  ;;  %p4582_p8 = por %p130_p6, %p6402_p3 }
  0x82   : > { %6487 = sst [smem:[#allocation39_spill]] %s6636_s21  ;;  %s120_s29 = ssub.s32 %s4327_s25, %s6636_s21 }
  0x83   : > { %p6401_p10 = scmp.lt.s32.totalorder %s4335_s27, 8  ;;  %p121_p11 = scmp.eq.s32.totalorder %s120_s29, 0 }
  0x84   : > { %p6489_p12 = scmp.eq.s32.totalorder %s4474_s28, 0  ;;  %s4599_s15 = sand.u32 1, %s4303_s19  }
  0x85   : > { %s4602_s1 = scalar_select %p121_p11, %s4303_s19, %s123_s16  }
  0x86   : > { %p4593_p13 = por %p136_p9, %p6489_p12  ;;  %s6400_s23 = sshll.u32 %s4599_s15, 8 }
  0x87   : > { %6492 = sst [smem:[#allocation41_spill]] %s4602_s1  ;;  %s3191_s0 = sshll.u32 %s4327_s25, 12 }
  0x88   : > { %s6490_s11 = scalar_select %p4593_p13, 1, 0 }
  0x89   : > { %s6493_s3 = sld [smem:[#allocation73_spill]]  ;;  %s445_s29 = scalar_lea.vmem [#allocation10], %s6400_s23 }
  0x8a   : > { %6491 = sst [smem:[#allocation40_spill]] %s6490_s11  ;;  %s452_s12 = sshll.u32 %s445_s29, 4  ;;  %s4613_s12 = int_to_ptr.vmem [resolvable:$true] %s452_s12 }
  0x8b   : > { %p4619_p0 = pnand %p6401_p10, %p4582_p8  ;;  %s6495_s5 = sld [smem:[#allocation75_spill]] }
  0x8c   : > { %s6496_s17 = sand.u32 1, %s4335_s27  }
  0x8d   : > { %s6494_s16 = scalar_select %p4619_p0, 1, 0 }
  0x8e   : > { %s4630_s1 = scalar_lea.sflag [#allocation11], %s6496_s17  ;;  %p4636_p4 = pneg %p4619_p0 }
  0x8f   : > { %s4609_s7 = scalar_lea.hbm %s6493_s3, %s3191_s0  ;;  %s3964_s9 = scalar_lea.hbm %s6493_s3, 16384 }
  0x90   : > { %s3959_s19 = scalar_lea.hbm %s4609_s7, 4096  ;;  %p3965_p9 = scmp.lt.u32.totalorder %s4609_s7, %s6493_s3 }
  0x91   : > { %s4626_s4 = scalar_lea.hbm %s6495_s5, %s3191_s0  ;;  %p3960_p2 = scmp.ne.s32.totalorder %s4609_s7, %s3959_s19 }
  0x92   : > { %s6497_s29 = scalar_select %p4636_p4, 1, 0 }
  0x93   : > { %p3962_p6 = pnand %p4636_p4, %p3960_p2  ;;  %p3966_p11 = scmp.lt.u32.totalorder %s3964_s9, %s3959_s19 }
  0x94   : > { %p3968_p10 = scmp.lt.u32.totalorder %s3959_s19, %s4609_s7 }
  0x95   : > { %p3963_p8 = pneg %p3962_p6  ;;  %p3967_p12 = por %p3966_p11, %p3965_p9 }
  0x97   : > { %p3969_p3 = por %p3968_p10, %p3967_p12 }
  0x99   : > { %p3970_p13 = pnand %p3969_p3, %p3963_p8 }
  0x9b   : > { %3973 = shalt.err (!%p3970_p13)
}
  0x9c   : > { %s3974_s17 = scalar_lea.vmem %s4613_s12, 4096  ;;  %s4344_s23 = smov [#allocation10]  }
  0x9d   : > { %p3975_p2 = scmp.ne.s32.totalorder %s4613_s12, %s3974_s17  ;;  %s3979_s14 = sshll.u32 %s4344_s23, 4  ;;  %s3980_s14 = int_to_ptr.vmem [resolvable:$false] %s3979_s14 }
  0x9e   : > { %s3981_s0 = scalar_lea.vmem %s3980_s14, 8192  ;;  %p3982_p5 = scmp.lt.s32.totalorder %s4613_s12, %s3980_s14 }
  0x9f   : > { %p3977_p6 = pnand %p3975_p2, %p4636_p4  ;;  %p3983_p7 = scmp.lt.s32.totalorder %s3981_s0, %s3974_s17 }
  0xa1   : > { %p3978_p1 = pneg %p3977_p6  ;;  %p3984_p9 = por %p3983_p7, %p3982_p5 }
  0xa3   : > { %p3985_p11 = pnand %p3984_p9, %p3978_p1 }
  0xa5   : > { %3988 = shalt.err (!%p3985_p11)
}
  0xa6   : > { %s6498_s19 = smov 16   ;;  %s6499_s9 = smov 256  }
  0xa7   : > { %3680 = dma.hbm_to_vmem [thread:$0]  (!%p4619_p0), %s4609_s7, 4096, %s4613_s12, %s4630_s1, %s6499_s9, %s6499_s9, %s6498_s19  }
  0xa8   : > { %s6500_s21 = sshll.u32 %s4599_s15, 8  ;;  %s4345_s14 = smov [#allocation9]  }
  0xa9   : > { %s485_s17 = scalar_lea.vmem [#allocation13], %s6500_s21  ;;  %s4667_s0 = sshll.u32 %s4345_s14, 4  ;;  %s362_s0 = int_to_ptr.vmem [resolvable:$true] %s4667_s0 }
  0xaa   : > { %s492_s23 = sshll.u32 %s485_s17, 4  ;;  %s6501_s3 = sand.u32 1, %s4335_s27   ;;  %s4665_s23 = int_to_ptr.vmem [resolvable:$true] %s492_s23 }
  0xab   : > { %s4671_s11 = scalar_lea.sflag [#allocation14], %s6501_s3  ;;  %s3989_s18 = scalar_lea.hbm %s4626_s4, 4096 }
  0xac   : > { %p3990_p5 = scmp.ne.s32.totalorder %s4626_s4, %s3989_s18  ;;  %s3994_s7 = scalar_lea.hbm %s6495_s5, 16384 }
  0xad   : > { %p3995_p3 = scmp.lt.u32.totalorder %s4626_s4, %s6495_s5  ;;  %p3996_p10 = scmp.lt.u32.totalorder %s3994_s7, %s3989_s18 }
  0xae   : > { %p3992_p7 = pnand %p3990_p5, %p4636_p4  ;;  %p3998_p8 = scmp.lt.u32.totalorder %s3989_s18, %s4626_s4 }
  0xaf   : > { %p3997_p13 = por %p3996_p10, %p3995_p3 }
  0xb0   : > { %p3993_p1 = pneg %p3992_p7 }
  0xb1   : > { %p3999_p12 = por %p3998_p8, %p3997_p13 }
  0xb3   : > { %p4000_p2 = pnand %p3999_p12, %p3993_p1 }
  0xb5   : > { %4003 = shalt.err (!%p4000_p2)
}
  0xb6   : > { %s4004_s3 = scalar_lea.vmem %s4665_s23, 4096  ;;  %s4346_s25 = smov [#allocation13]  }
  0xb7   : > { %p4005_p6 = scmp.ne.s32.totalorder %s4665_s23, %s4004_s3  ;;  %s4009_s28 = sshll.u32 %s4346_s25, 4  ;;  %s4010_s28 = int_to_ptr.vmem [resolvable:$false] %s4009_s28 }
  0xb8   : > { %s4011_s9 = scalar_lea.vmem %s4010_s28, 8192  ;;  %p4012_p5 = scmp.lt.s32.totalorder %s4665_s23, %s4010_s28 }
  0xb9   : > { %p4007_p9 = pnand %p4005_p6, %p4636_p4  ;;  %p4013_p7 = scmp.lt.s32.totalorder %s4011_s9, %s4004_s3 }
  0xbb   : > { %p4008_p11 = pneg %p4007_p9  ;;  %p4014_p3 = por %p4013_p7, %p4012_p5 }
  0xbd   : > { %p4015_p10 = pnand %p4014_p3, %p4008_p11 }
  0xbf   : > { %4018 = shalt.err (!%p4015_p10)
}
  0xc0   : > { %3686 = dma.hbm_to_vmem [thread:$0]  (!%p4619_p0), %s4626_s4, 4096, %s4665_s23, %s4671_s11, %s6485_s20, %s6485_s20, %s6484_s6  }
  0xc1   : > { %s6502_s2 = sld [smem:[#allocation72_spill]]  ;;  %p6503_p13 = scmp.ne.s32.totalorder %s6481_s30, 0 }
  0xc7   : > { %s4019_s17 = scalar_lea.hbm %s6502_s2, 16 }
  0xc8   : > { %p4020_p1 = scmp.ne.s32.totalorder %s6502_s2, %s4019_s17  ;;  %p4026_p2 = scmp.lt.u32.totalorder %s4019_s17, %s6502_s2 }
  0xca   : > { %p4022_p8 = pnand %p4020_p1, %p6503_p13 }
  0xcc   : > { %p4023_p12 = pneg %p4022_p8 }
  0xce   : > { %p4028_p6 = pnand %p4026_p2, %p4023_p12 }
  0xd0   : > { %4031 = shalt.err (!%p4028_p6)
}
  0xd1   : > { %s4032_s3 = scalar_lea.vmem %s362_s0, 16  ;;  %s4039_s4 = scalar_lea.vmem %s362_s0, 32 }
  0xd2   : > { %p4033_p9 = scmp.ne.s32.totalorder %s362_s0, %s4032_s3  ;;  %p4040_p7 = scmp.lt.s32.totalorder %s362_s0, %s362_s0 }
  0xd3   : > { %p4041_p3 = scmp.lt.s32.totalorder %s4039_s4, %s4032_s3 }
  0xd4   : > { %p4035_p11 = pnand %p4033_p9, %p6503_p13 }
  0xd5   : > { %p4042_p10 = por %p4041_p3, %p4040_p7 }
  0xd6   : > { %p4036_p5 = pneg %p4035_p11 }
  0xd8   : > { %p4043_p0 = pnand %p4042_p10, %p4036_p5 }
  0xda   : > { %4046 = shalt.err (!%p4043_p0)
}
  0xdb   : > { %p6504_p1 = scmp.ne.s32.totalorder %s6479_s13, 0  ;;  %s4347_s28 = smov [#allocation18]  }
  0xdc   : > { %s385_s9 = sshll.u32 %s4347_s28, 4  ;;  %s4348_s18 = smov [#allocation21]   ;;  %s386_s9 = int_to_ptr.vmem [resolvable:$true] %s385_s9 }
  0xdd   : > { %3661 = dma.hbm_to_vmem [thread:$0]  (!%p6504_p1), %s6502_s2, 16, %s362_s0, [#allocation8]  }
  0xde   : > { %s409_s21 = sshll.u32 %s4348_s18, 4  ;;  %s6505_s8 = sld [smem:[#allocation78_spill]]  ;;  %s410_s21 = int_to_ptr.vmem [resolvable:$true] %s409_s21 }
  0xe4   : > { %s4047_s7 = scalar_lea.hbm %s6505_s8, 32 }
  0xe5   : > { %p4048_p0 = scmp.ne.s32.totalorder %s6505_s8, %s4047_s7  ;;  %p4054_p2 = scmp.lt.u32.totalorder %s4047_s7, %s6505_s8 }
  0xe7   : > { %p4050_p8 = pnand %p4048_p0, %p6503_p13 }
  0xe9   : > { %p4051_p12 = pneg %p4050_p8 }
  0xeb   : > { %p4056_p6 = pnand %p4054_p2, %p4051_p12 }
  0xed   : > { %4059 = shalt.err (!%p4056_p6)
}
  0xee   : > { %s4060_s0 = scalar_lea.vmem %s386_s9, 32  ;;  %p4068_p7 = scmp.lt.s32.totalorder %s386_s9, %s386_s9 }
  0xef   : > { %p4061_p9 = scmp.ne.s32.totalorder %s386_s9, %s4060_s0  ;;  %p4069_p3 = scmp.lt.s32.totalorder %s4060_s0, %s4060_s0 }
  0xf1   : > { %p4063_p11 = pnand %p4061_p9, %p6503_p13  ;;  %p4070_p10 = por %p4069_p3, %p4068_p7 }
  0xf3   : > { %p4064_p5 = pneg %p4063_p11 }
  0xf5   : > { %p4071_p4 = pnand %p4070_p10, %p4064_p5 }
  0xf7   : > { %4074 = shalt.err (!%p4071_p4)
}
  0xf8   : > { %3667 = dma.hbm_to_vmem [thread:$0]  (!%p6504_p1), %s6505_s8, 32, %s386_s9, [#allocation17]  }
  0xf9   : > { %s6506_s10 = sld [smem:[#allocation80_spill]] }
  0xff   : > { %s4075_s17 = scalar_lea.hbm %s6506_s10, 16 }
 0x100   : > { %p4076_p0 = scmp.ne.s32.totalorder %s6506_s10, %s4075_s17  ;;  %p4082_p4 = scmp.lt.u32.totalorder %s4075_s17, %s6506_s10 }
 0x102   : > { %p4078_p8 = pnand %p4076_p0, %p6503_p13 }
 0x104   : > { %p4079_p12 = pneg %p4078_p8 }
 0x106   : > { %p4084_p2 = pnand %p4082_p4, %p4079_p12 }
 0x108   : > { %4087 = shalt.err (!%p4084_p2)
}
 0x109   : > { %s4088_s3 = scalar_lea.vmem %s410_s21, 16  ;;  %s4095_s9 = scalar_lea.vmem %s410_s21, 32 }
 0x10a   : > { %p4089_p6 = scmp.ne.s32.totalorder %s410_s21, %s4088_s3  ;;  %p4096_p5 = scmp.lt.s32.totalorder %s410_s21, %s410_s21 }
 0x10b   : > { %p4097_p7 = scmp.lt.s32.totalorder %s4095_s9, %s4088_s3 }
 0x10c   : > { %p4091_p9 = pnand %p4089_p6, %p6503_p13 }
 0x10d   : > { %p4098_p3 = por %p4097_p7, %p4096_p5 }
 0x10e   : > { %p4092_p11 = pneg %p4091_p9 }
 0x110   : > { %p4099_p10 = pnand %p4098_p3, %p4092_p11 }
 0x112   : > { %4102 = shalt.err (!%p4099_p10)
}
 0x113   : > { %s6507_s23 = sld [smem:[#allocation33_spill]]  ;;  %s6508_s30 = sld [smem:[#allocation32_spill]] }
 0x114   : > { %s6509_s25 = sld [smem:[#allocation37_spill]]  ;;  %s3145_s28 = sadd.s32 4294967294, %s4335_s27  }
 0x115   : > { %3673 = dma.hbm_to_vmem [thread:$0]  (!%p6504_p1), %s6506_s10, 16, %s410_s21, [#allocation20]  }
 0x116   : > { %s48_s13 = sadd.s32 1, %s4331_s26  ;;  %s55_s18 = sadd.s32 1, %s4315_s22 }
 0x117   : > { %p6510_p13 = scmp.ne.s32.totalorder %s6486_s24, 0  ;;  %p6511_p2 = scmp.eq.s32.totalorder %s4335_s27, 0 }
 0x118   : > { %s6515_s24 = sld [smem:[#allocation36_spill]]  ;;  %p328_p5 = scmp.eq.s32.totalorder %s3145_s28, 7 }
 0x119   : > { %s6638_s13 = smov (!%p6510_p13, %s48_s13), %s4331_s26  ;;  %p62_p0 = scmp.ne.s32.totalorder %s4315_s22, %s6507_s23 }
 0x11a   : > { %p68_p8 = scmp.ne.s32.totalorder %s6507_s23, %s6508_s30  ;;  %p50_p12 = scmp.ge.s32.totalorder %s6638_s13, 2 }
 0x11b   : > { %p322_p4 = scmp.eq.s32.totalorder %s6509_s25, 7  ;;  %p4766_p6 = por %p6511_p2, %p62_p0 }
 0x11c   : > { %p6513_p9 = scmp.eq.s32.totalorder %s6509_s25, 0  ;;  %s6640_s13 = smov (%p50_p12, %s6638_s13), 0 }
 0x11d   : > { %p4778_p11 = por %p322_p4, %p62_p0  ;;  %s52_s7 = ssub.s32 %s4331_s26, %s6640_s13 }
 0x11e   : > { %p4772_p1 = por %p6513_p9, %p68_p8  ;;  %s420_s12 = sand.u32 1, %s4315_s22  }
 0x11f   : > { %s6516_s14 = scalar_select %p4778_p11, 1, 0 }
 0x120   : > { %s6514_s21 = scalar_select %p4772_p1, 1, 0 }
 0x121   : > { %p53_p7 = scmp.eq.s32.totalorder %s52_s7, 0  ;;  %p4785_p3 = por %p328_p5, %p68_p8 }
 0x122   : > { %s3154_s3 = sshll.u32 %s420_s12, 7  ;;  %s3190_s4 = sshll.u32 %s4331_s26, 11 }
 0x123   : > { %s6517_s19 = scalar_select %p4785_p3, 1, 0 }
 0x124   : > { %s4790_s9 = scalar_select %p53_p7, %s4315_s22, %s55_s18  }
 0x125   : > { %s6518_s30 = sld [smem:[#allocation70_spill]]  ;;  %s424_s28 = scalar_lea.vmem [#allocation4], %s3154_s3 }
 0x126   : > { %s431_s2 = sshll.u32 %s424_s28, 4  ;;  %p6519_p10 = scmp.lt.s32.totalorder %s4335_s27, 8  ;;  %s4798_s2 = int_to_ptr.vmem [resolvable:$true] %s431_s2 }
 0x127   : > { %s3160_s18 = sshll.u32 %s4599_s15, 1  ;;  %s3192_s0 = sshll.u32 %s6515_s24, 5 }
 0x128   : > { %p4804_p13 = pnand %p6519_p10, %p4766_p6 }
 0x12a   : > { %p4105_p8 = pneg %p4804_p13 }
 0x12b   : > { %s4796_s25 = scalar_lea.hbm %s6518_s30, %s3190_s4  ;;  %s4810_s4 = scalar_lea.sflag [#allocation5], %s420_s12 }
 0x12c   : > { %s4103_s23 = scalar_lea.hbm %s4796_s25, 2048  ;;  %s4108_s28 = scalar_lea.hbm %s6518_s30, 4096 }
 0x12d   : > { %p4104_p0 = scmp.ne.s32.totalorder %s4796_s25, %s4103_s23  ;;  %p4109_p2 = scmp.lt.u32.totalorder %s4796_s25, %s6518_s30 }
 0x12e   : > { %p4110_p6 = scmp.lt.u32.totalorder %s4108_s28, %s4103_s23  ;;  %p4112_p5 = scmp.lt.u32.totalorder %s4103_s23, %s4796_s25 }
 0x12f   : > { %p4106_p12 = pnand %p4105_p8, %p4104_p0 }
 0x130   : > { %p4111_p9 = por %p4110_p6, %p4109_p2 }
 0x131   : > { %p4107_p4 = pneg %p4106_p12 }
 0x132   : > { %p4113_p7 = por %p4112_p5, %p4111_p9 }
 0x134   : > { %p4114_p10 = pnand %p4113_p7, %p4107_p4 }
 0x136   : > { %4117 = shalt.err (!%p4114_p10)
}
 0x137   : > { %s4118_s12 = scalar_lea.vmem %s4798_s2, 2048  ;;  %s4349_s17 = smov [#allocation4]  }
 0x138   : > { %p4119_p0 = scmp.ne.s32.totalorder %s4798_s2, %s4118_s12  ;;  %s4123_s3 = sshll.u32 %s4349_s17, 4  ;;  %s4124_s3 = int_to_ptr.vmem [resolvable:$false] %s4123_s3 }
 0x139   : > { %s4125_s5 = scalar_lea.vmem %s4124_s3, 4096  ;;  %p4126_p11 = scmp.lt.s32.totalorder %s4798_s2, %s4124_s3 }
 0x13a   : > { %p4121_p12 = pnand %p4119_p0, %p4105_p8  ;;  %p4127_p2 = scmp.lt.s32.totalorder %s4125_s5, %s4118_s12 }
 0x13c   : > { %p4122_p3 = pneg %p4121_p12  ;;  %p4128_p6 = por %p4127_p2, %p4126_p11 }
 0x13e   : > { %p4129_p9 = pnand %p4128_p6, %p4122_p3 }
 0x140   : > { %4132 = shalt.err (!%p4129_p9)
}
 0x141   : > { %3677 = dma.hbm_to_vmem [thread:$0]  (!%p4804_p13), %s4796_s25, 2048, %s4798_s2, %s4810_s4, %s6485_s20, %s6485_s20, %s6484_s6  }
 0x142   : > { %s6521_s28 = sld [smem:[#allocation74_spill]]  ;;  %s466_s7 = scalar_lea.vmem [#allocation12], %s3160_s18 }
 0x143   : > { %s474_s17 = sshll.u32 %s466_s7, 4  ;;  %p6522_p3 = scmp.ne.s32.totalorder %s6497_s29, 0  ;;  %s475_s17 = int_to_ptr.vmem [resolvable:$true] %s474_s17 }
 0x148   : > { %s4846_s12 = scalar_lea.hbm %s6521_s28, %s3192_s0  ;;  %s4138_s20 = scalar_lea.hbm %s6521_s28, 128 }
 0x149   : > { %s4133_s3 = scalar_lea.hbm %s4846_s12, 32  ;;  %p4139_p13 = scmp.lt.u32.totalorder %s4846_s12, %s6521_s28 }
 0x14a   : > { %p4134_p11 = scmp.ne.s32.totalorder %s4846_s12, %s4133_s3  ;;  %p4140_p5 = scmp.lt.u32.totalorder %s4138_s20, %s4133_s3 }
 0x14b   : > { %p4142_p10 = scmp.lt.u32.totalorder %s4133_s3, %s4846_s12 }
 0x14c   : > { %p4136_p8 = pnand %p4134_p11, %p6522_p3  ;;  %p4141_p7 = por %p4140_p5, %p4139_p13 }
 0x14e   : > { %p4137_p4 = pneg %p4136_p8  ;;  %p4143_p0 = por %p4142_p10, %p4141_p7 }
 0x150   : > { %p4144_p12 = pnand %p4143_p0, %p4137_p4 }
 0x152   : > { %4147 = shalt.err (!%p4144_p12)
}
 0x153   : > { %s4148_s18 = scalar_lea.vmem %s475_s17, 32  ;;  %s4350_s4 = smov [#allocation12]  }
 0x154   : > { %p4149_p2 = scmp.ne.s32.totalorder %s475_s17, %s4148_s18  ;;  %s4153_s5 = sshll.u32 %s4350_s4, 4  ;;  %s4154_s5 = int_to_ptr.vmem [resolvable:$false] %s4153_s5 }
 0x155   : > { %s4155_s8 = scalar_lea.vmem %s4154_s5, 64  ;;  %p4156_p11 = scmp.lt.s32.totalorder %s475_s17, %s4154_s5 }
 0x156   : > { %p4151_p6 = pnand %p4149_p2, %p6522_p3  ;;  %p4157_p8 = scmp.lt.s32.totalorder %s4155_s8, %s4148_s18 }
 0x158   : > { %p4152_p9 = pneg %p4151_p6  ;;  %p4158_p1 = por %p4157_p8, %p4156_p11 }
 0x15a   : > { %p4159_p5 = pnand %p4158_p1, %p4152_p9 }
 0x15c   : > { %4162 = shalt.err (!%p4159_p5)
}
 0x15d   : > { %p6523_p13 = scmp.ne.s32.totalorder %s6494_s16, 0  ;;  %s3166_s23 = sshll.u32 %s6515_s24, 4 }
 0x15e   : > { %s505_s7 = scalar_lea.vmem [#allocation15], %s4599_s15  ;;  %s6524_s20 = sld [smem:[#allocation76_spill]] }
 0x15f   : > { %3683 = dma.hbm_to_vmem [thread:$0]  (!%p6523_p13), %s4846_s12, 32, %s475_s17, %s4630_s1  }
 0x160   : > { %s512_s3 = sshll.u32 %s505_s7, 4  ;;  %s513_s3 = int_to_ptr.vmem [resolvable:$true] %s512_s3 }
 0x164   : > { %s6525_s0 = smov %s6524_s20  ;;  %s510_s25 = scalar_lea.hbm %s6524_s20, %s3166_s23 }
 0x165   : > { %s4163_s18 = scalar_lea.hbm %s510_s25, 16  ;;  %s4168_s8 = scalar_lea.hbm %s6525_s0, 64 }
 0x166   : > { %p4164_p4 = scmp.ne.s32.totalorder %s510_s25, %s4163_s18  ;;  %p4169_p10 = scmp.lt.u32.totalorder %s510_s25, %s6525_s0 }
 0x167   : > { %p4170_p0 = scmp.lt.u32.totalorder %s4168_s8, %s4163_s18  ;;  %p4172_p2 = scmp.lt.u32.totalorder %s4163_s18, %s510_s25 }
 0x168   : > { %p4166_p1 = pnand %p4164_p4, %p6522_p3 }
 0x169   : > { %p4171_p12 = por %p4170_p0, %p4169_p10 }
 0x16a   : > { %p4167_p7 = pneg %p4166_p1 }
 0x16b   : > { %p4173_p6 = por %p4172_p2, %p4171_p12 }
 0x16d   : > { %p4174_p9 = pnand %p4173_p6, %p4167_p7 }
 0x16f   : > { %4177 = shalt.err (!%p4174_p9)
}
 0x170   : > { %s4178_s15 = scalar_lea.vmem %s513_s3, 16  ;;  %s4351_s1 = smov [#allocation15]  }
 0x171   : > { %p4179_p11 = scmp.ne.s32.totalorder %s513_s3, %s4178_s15  ;;  %s4183_s24 = sshll.u32 %s4351_s1, 4  ;;  %s4184_s24 = int_to_ptr.vmem [resolvable:$false] %s4183_s24 }
 0x172   : > { %s4185_s12 = scalar_lea.vmem %s4184_s24, 32  ;;  %p4186_p4 = scmp.lt.s32.totalorder %s513_s3, %s4184_s24 }
 0x173   : > { %p4181_p8 = pnand %p4179_p11, %p6522_p3  ;;  %p4187_p1 = scmp.lt.s32.totalorder %s4185_s12, %s4178_s15 }
 0x175   : > { %p4182_p5 = pneg %p4181_p8  ;;  %p4188_p13 = por %p4187_p1, %p4186_p4 }
 0x177   : > { %p4189_p0 = pnand %p4188_p13, %p4182_p5 }
 0x179   : > { %4192 = shalt.err (!%p4189_p0)
}
 0x17a   : > { %p6526_p10 = scmp.ne.s32.totalorder %s6494_s16, 0  ;;  %s6527_s10 = sld [smem:[#allocation38_spill]] }
 0x17c   : > { %3689 = dma.hbm_to_vmem [thread:$0]  (!%p6526_p10), %s510_s25, 16, %s513_s3, %s4671_s11  }
 0x180   : > { %p6528_p7 = scmp.ne.s32.totalorder %s6527_s10, 0 }
 0x182   : > { %521 = sbr.rel (%p6528_p7) target bundleno = 3015 (0xbc7), region = 64 }
 0x189   : > { %s6529_s28 = sld [smem:[#allocation33_spill]]  ;;  %p6530_p3 = scmp.ne.s32.totalorder %s6514_s21, 0 }
 0x18f   : > { %s4889_s29 = sand.u32 1, %s6529_s28  }
 0x190   : > { %s3168_s17 = sshll.u32 %s4889_s29, 7  ;;  %s524_s23 = scalar_lea.sflag [#allocation5], %s4889_s29 }
 0x191   : > { %s4895_s7 = scalar_lea.vmem [#allocation4], %s3168_s17 }
 0x192   : > { %4266 = dma.done.wait (%p6530_p3), %s524_s23, 2048  }
 0x193   : > { %4268 = vsyncadd (%p6530_p3), %s524_s23, 4294965248  ;;  %s6531_s11 = sld [smem:[#allocation37_spill]] }
 0x199   : > { %p6532_p13 = scmp.eq.s32.totalorder %s6531_s11, 0 }
 0x19b   : > { %4270 = dma.done.wait (%p6532_p13), [#allocation8], 2064   ;;  %p6533_p12 = pmov %p6532_p13 }
 0x19c   : > { %s6534_s16 = sld [smem:[#allocation30_spill]]  ;;  %s6535_s3 = sld [smem:[#allocation40_spill]] }
 0x19d   : > { %4272 = vsyncadd (%p6533_p12), [#allocation8], 4294965232  ;;  %s540_s2 = sand.u32 1, %s6531_s11  }
 0x19e   : > { %s541_s25 = scalar_lea.sflag [#allocation11], %s540_s2 }
 0x1a2   : > { %s4907_s6 = sand.u32 1, %s6534_s16   ;;  %p6536_p2 = scmp.ne.s32.totalorder %s6535_s3, 0 }
 0x1a3   : > { %s3171_s20 = sshll.u32 %s4907_s6, 8 }
 0x1a4   : > { %s4910_s18 = scalar_lea.vmem [#allocation10], %s3171_s20 }
 0x1a5   : > { %4274 = dma.done.wait (%p6536_p2), %s541_s25, 4128  }
 0x1a6   : > { %4276 = vsyncadd (%p6536_p2), %s541_s25, 4294963168  ;;  %s3172_s21 = sshll.u32 %s4907_s6, 1  ;;  %s559_s5 = scalar_lea.sflag [#allocation14], %s540_s2 }
 0x1a7   : > { %s4917_s4 = scalar_lea.vmem [#allocation12], %s3172_s21  ;;  %s4919_s8 = scalar_lea.vmem [#allocation13], %s3171_s20 }
 0x1a8   : > { %4278 = dma.done.wait (%p6536_p2), %s559_s5, 4112  }
 0x1a9   : > { %4280 = vsyncadd (%p6536_p2), %s559_s5, 4294963184  ;;  %s570_s15 = scalar_lea.vmem [#allocation15], %s4907_s6  ;;  %p6537_p6 = pmov %p6533_p12 }
 0x1ab   : > { %4282 = dma.done.wait (%p6537_p6), [#allocation17], 4128   ;;  %p6538_p9 = pmov %p6537_p6 }
 0x1ac   : > { %p6539_p11 = pmov %p6537_p6 }
 0x1ad   : > { %4284 = vsyncadd (%p6538_p9), [#allocation17], 4294963168 }
 0x1ae   : > { %4286 = dma.done.wait (%p6539_p11), [#allocation20], 4112   ;;  %p6540_p8 = pmov %p6537_p6 }
 0x1af   : > { %v4935_v0 = vld [vmem:[%s4895_s7] sm:$0xff]  ;;  %v4938_v1 = vld [vmem:[%s4895_s7 + $0x8] sm:$0xff]  ;;  %v4941_v2 = vld [vmem:[%s4895_s7 + $0x10] sm:$0xff]  ;;  %s4984_s1 = scalar_lea.vmem [#allocation22], %s3168_s17  ;;  %s6557_s24 = sld [smem:[#allocation34_spill]] }
 0x1b0   : > { %4288 = vsyncadd (%p6540_p8), [#allocation20], 4294963184  ;;  %6541 = vst [vmem:[#allocation42_spill] sm:$0xff] %v4935_v0  ;;  %v4944_v3 = vld [vmem:[%s4895_s7 + $0x18] sm:$0xff]  ;;  %v4947_v4 = vld [vmem:[%s4895_s7 + $0x20] sm:$0xff] }
 0x1b1   : > { %6542 = vst [vmem:[#allocation43_spill] sm:$0xff] %v4938_v1  ;;  %6543 = vst [vmem:[#allocation44_spill] sm:$0xff] %v4941_v2  ;;  %v4950_v5 = vld [vmem:[%s4895_s7 + $0x28] sm:$0xff]  ;;  %v4953_v6 = vld [vmem:[%s4895_s7 + $0x30] sm:$0xff] }
 0x1b2   : > { %6544 = vst [vmem:[#allocation45_spill] sm:$0xff] %v4944_v3  ;;  %6545 = vst [vmem:[#allocation46_spill] sm:$0xff] %v4947_v4  ;;  %v4956_v7 = vld [vmem:[%s4895_s7 + $0x38] sm:$0xff]  ;;  %v4959_v8 = vld [vmem:[%s4895_s7 + $0x40] sm:$0xff] }
 0x1b3   : > { %6546 = vst [vmem:[#allocation47_spill] sm:$0xff] %v4950_v5  ;;  %6547 = vst [vmem:[#allocation48_spill] sm:$0xff] %v4953_v6  ;;  %v4962_v9 = vld [vmem:[%s4895_s7 + $0x48] sm:$0xff]  ;;  %v4965_v10 = vld [vmem:[%s4895_s7 + $0x50] sm:$0xff] }
 0x1b4   : > { %6548 = vst [vmem:[#allocation49_spill] sm:$0xff] %v4956_v7  ;;  %6549 = vst [vmem:[#allocation50_spill] sm:$0xff] %v4959_v8  ;;  %v4968_v11 = vld [vmem:[%s4895_s7 + $0x58] sm:$0xff]  ;;  %v4971_v12 = vld [vmem:[%s4895_s7 + $0x60] sm:$0xff] }
 0x1b5   : > { %6550 = vst [vmem:[#allocation51_spill] sm:$0xff] %v4962_v9  ;;  %6551 = vst [vmem:[#allocation52_spill] sm:$0xff] %v4965_v10  ;;  %v4974_v13 = vld [vmem:[%s4895_s7 + $0x68] sm:$0xff]  ;;  %v4977_v14 = vld [vmem:[%s4895_s7 + $0x70] sm:$0xff]  ;;  %p3179_p5 = scmp.ne.s32.totalorder %s6557_s24, 0 }
 0x1b6   : > { %6552 = vst [vmem:[#allocation53_spill] sm:$0xff] %v4968_v11  ;;  %6553 = vst [vmem:[#allocation54_spill] sm:$0xff] %v4971_v12  ;;  %v4980_v15 = vld [vmem:[%s4895_s7 + $0x78] sm:$0xff] }
 0x1b7   : > { %6554 = vst [vmem:[#allocation55_spill] sm:$0xff] %v4974_v13  ;;  %6555 = vst [vmem:[#allocation56_spill] sm:$0xff] %v4977_v14  ;;  %665 = sbr.rel (%p3179_p5) target bundleno = 1929 (0x789), region = 112 }
 0x1b8   : > { %6556 = vst [vmem:[#allocation57_spill] sm:$0xff] %v4980_v15 }
 0x1be   : > { %v666_v16 = vld [vmem:[#allocation7] sm:$0xff]  ;;  %v667_v17 = vld [vmem:[#allocation7 + $0x8] sm:$0xff]  ;;  %v668_v18 = vld [vmem:[#allocation7 + $0x10] sm:$0xff]  ;;  %3419 = vmatprep.mubr.f32.mxu0 %v4935_v0  ;;  %3431 = vmatprep.mubr.f32.mxu1 %v4959_v8  ;;  %vm836_vm0 = vcmask 31744  }
 0x1bf   : > { %v3443_v19 = vpack.c.bf16 %v667_v17, %v666_v16  ;;  %v669_v20 = vld [vmem:[#allocation7 + $0x18] sm:$0xff]  ;;  %v670_v22 = vld [vmem:[#allocation7 + $0x20] sm:$0xff]  ;;  %v671_v23 = vld [vmem:[#allocation7 + $0x28] sm:$0xff] }
 0x1c0   : > { %v3447_v21 = vpack.c.bf16 %v669_v20, %v668_v18  ;;  %v3451_v24 = vpack.c.bf16 %v671_v23, %v670_v22  ;;  %v672_v25 = vld [vmem:[#allocation7 + $0x30] sm:$0xff]  ;;  %v673_v26 = vld [vmem:[#allocation7 + $0x38] sm:$0xff]  ;;  %v674_v28 = vld [vmem:[#allocation7 + $0x40] sm:$0xff] }
 0x1c1   : > { %3444 = vmatprep.subr.bf16.mxu0 %v3443_v19  ;;  %3603 = vmatprep.subr.bf16.mxu1 %v3443_v19  ;;  %v3455_v27 = vpack.c.bf16 %v673_v26, %v672_v25  ;;  %v675_v29 = vld [vmem:[#allocation7 + $0x48] sm:$0xff]  ;;  %v676_v31 = vld [vmem:[#allocation7 + $0x50] sm:$0xff]  ;;  %v677_v32 = vld [vmem:[#allocation7 + $0x58] sm:$0xff] }
 0x1c2   : > { %3446 = vmatpush3.bf16.msra.mxu0 %v3443_v19  ;;  %3611 = vmatpush3.bf16.msra.mxu1 %v3443_v19  ;;  %v3459_v30 = vpack.c.bf16 %v675_v29, %v674_v28  ;;  %v3463_v33 = vpack.c.bf16 %v677_v32, %v676_v31  ;;  %v678_v34 = vld [vmem:[#allocation7 + $0x60] sm:$0xff]  ;;  %v679_v35 = vld [vmem:[#allocation7 + $0x68] sm:$0xff]  ;;  %v680_v37 = vld [vmem:[#allocation7 + $0x70] sm:$0xff] }
 0x1c3   : > { %3448 = vmatprep.subr.bf16.mxu0 %v3447_v21  ;;  %3604 = vmatprep.subr.bf16.mxu1 %v3447_v21  ;;  %v3467_v36 = vpack.c.bf16 %v679_v35, %v678_v34  ;;  %v681_v38 = vld [vmem:[#allocation7 + $0x78] sm:$0xff]  ;;  %v3180_v40 = vld [vmem:[#allocation9] ss:$0 sm:$0xff] }
 0x1c4   : > { %v3471_v39 = vpack.c.bf16 %v681_v38, %v680_v37 }
 0x1c6   : > { %3450 = vmatpush3.bf16.msra.mxu0 %v3447_v21  ;;  %3612 = vmatpush3.bf16.msra.mxu1 %v3447_v21 }
 0x1c7   : > { %3452 = vmatprep.subr.bf16.mxu0 %v3451_v24  ;;  %3605 = vmatprep.subr.bf16.mxu1 %v3451_v24 }
 0x1ca   : > { %3454 = vmatpush3.bf16.msra.mxu0 %v3451_v24  ;;  %3613 = vmatpush3.bf16.msra.mxu1 %v3451_v24 }
 0x1cb   : > { %3456 = vmatprep.subr.bf16.mxu0 %v3455_v27  ;;  %3606 = vmatprep.subr.bf16.mxu1 %v3455_v27 }
 0x1ce   : > { %3458 = vmatpush3.bf16.msra.mxu0 %v3455_v27  ;;  %3614 = vmatpush3.bf16.msra.mxu1 %v3455_v27 }
 0x1cf   : > { %3460 = vmatprep.subr.bf16.mxu0 %v3459_v30  ;;  %3607 = vmatprep.subr.bf16.mxu1 %v3459_v30 }
 0x1d2   : > { %3462 = vmatpush3.bf16.msra.mxu0 %v3459_v30  ;;  %3615 = vmatpush3.bf16.msra.mxu1 %v3459_v30 }
 0x1d3   : > { %3464 = vmatprep.subr.bf16.mxu0 %v3463_v33  ;;  %3608 = vmatprep.subr.bf16.mxu1 %v3463_v33 }
 0x1d6   : > { %3466 = vmatpush3.bf16.msra.mxu0 %v3463_v33  ;;  %3616 = vmatpush3.bf16.msra.mxu1 %v3463_v33 }
 0x1d7   : > { %3468 = vmatprep.subr.bf16.mxu0 %v3467_v36  ;;  %3609 = vmatprep.subr.bf16.mxu1 %v3467_v36 }
 0x1da   : > { %3470 = vmatpush3.bf16.msra.mxu0 %v3467_v36  ;;  %3617 = vmatpush3.bf16.msra.mxu1 %v3467_v36 }
 0x1db   : > { %3472 = vmatprep.subr.bf16.mxu0 %v3471_v39  ;;  %3610 = vmatprep.subr.bf16.mxu1 %v3471_v39 }
 0x1de   : > { %3474 = vmatpush3.bf16.msra.mxu0 %v3471_v39  ;;  %3618 = vmatpush3.bf16.msra.mxu1 %v3471_v39 }
 0x1e1   : > { %3420 = vmatmul.mubr.f32.vlgmr.msra.gmra.mrb[0].mxu0 %v4938_v1  ;;  %3432 = vmatmul.mubr.f32.vlgmr.msra.gmra.mrb[0].mxu1 %v4962_v9 }
 0x1e2   : > { %3422 = vmatprep.mubr.f32.mxu0 %v4941_v2  ;;  %3434 = vmatprep.mubr.f32.mxu1 %v4965_v10 }
 0x1e5   : > { %3423 = vmatmul.mubr.f32.gmra.mrb[2].mxu0 %v4944_v3  ;;  %3435 = vmatmul.mubr.f32.gmra.mrb[2].mxu1 %v4968_v11 }
 0x1e6   : > { %3425 = vmatprep.mubr.f32.mxu0 %v4947_v4  ;;  %3437 = vmatprep.mubr.f32.mxu1 %v4971_v12 }
 0x1e9   : > { %3426 = vmatmul.mubr.f32.gmra.mrb[4].mxu0 %v4950_v5  ;;  %3438 = vmatmul.mubr.f32.gmra.mrb[4].mxu1 %v4974_v13 }
 0x1ea   : > { %3428 = vmatprep.mubr.f32.mxu0 %v4953_v6  ;;  %3440 = vmatprep.mubr.f32.mxu1 %v4977_v14 }
 0x1ed   : > { %3429 = vmatmul.mubr.f32.gmra.mrb[6].mxu0 %v4956_v7  ;;  %3441 = vmatmul.mubr.f32.gmra.mrb[6].mxu1 %v4980_v15 }
 0x2b4   : > { %v3421_v41 = vpop.f32.mrb[0].mxu0  ;;  %v3433_v42 = vpop.f32.mrb[0].mxu1 }
 0x2b5   : > { %v5003_v43 = vadd.f32 %v3421_v41, %v3180_v40  ;;  %v5005_v44 = vadd.f32 %v3433_v42, %v3180_v40  ;;  %v755_v45 = vpop.f32.mrb[1].mxu0  ;;  %v795_v46 = vpop.f32.mrb[1].mxu1  ;;  %v834_v42 = vlaneseq }
 0x2b6   : > { %v5007_v47 = vadd.f32 %v3180_v40, %v755_v45  ;;  %v5017_v56 = vadd.f32 %v3180_v40, %v795_v46 }
 0x2b7   : > { %v864_v48 = vsel %vm836_vm0, %v5005_v44, -inf  ;;  %v840_v49 = vsel %vm836_vm0, %v5003_v43, -inf  ;;  %v5067_v45 = vand.u32 127, %v834_v42 }
 0x2b8   : > { %865 = vmax.xlane.f32.xlu1 %v864_v48  ;;  %841 = vmax.xlane.f32.xlu0 %v840_v49  ;;  %v3424_v50 = vpop.f32.mrb[2].mxu0  ;;  %v3436_v51 = vpop.f32.mrb[2].mxu1  ;;  %v837_v58 = vsel %vm836_vm0, %v5007_v47, -inf  ;;  %v861_v18 = vsel %vm836_vm0, %v5017_v56, -inf }
 0x2b9   : > { %v5013_v52 = vadd.f32 %v3424_v50, %v3180_v40  ;;  %v765_v53 = vpop.f32.mrb[3].mxu0  ;;  %v5015_v54 = vadd.f32 %v3436_v51, %v3180_v40  ;;  %v805_v55 = vpop.f32.mrb[3].mxu1 }
 0x2ba   : > { %v5025_v16 = vadd.f32 %v3180_v40, %v765_v53  ;;  %v5027_v17 = vadd.f32 %v3180_v40, %v805_v55 }
 0x2bb   : > { %v846_v57 = vsel %vm836_vm0, %v5013_v52, -inf  ;;  %v870_v61 = vsel %vm836_vm0, %v5015_v54, -inf }
 0x2bc   : > { %847 = vmax.xlane.f32.xlu1 %v846_v57  ;;  %838 = vmax.xlane.f32.xlu0 %v837_v58  ;;  %v3427_v59 = vpop.f32.mrb[4].mxu0  ;;  %v3439_v60 = vpop.f32.mrb[4].mxu1  ;;  %v843_v25 = vsel %vm836_vm0, %v5025_v16, -inf  ;;  %v867_v26 = vsel %vm836_vm0, %v5027_v17, -inf }
 0x2bd   : > { %v775_v62 = vpop.f32.mrb[5].mxu0  ;;  %v815_v63 = vpop.f32.mrb[5].mxu1  ;;  %v5031_v21 = vadd.f32 %v3427_v59, %v3180_v40  ;;  %v5039_v27 = vadd.f32 %v3439_v60, %v3180_v40 }
 0x2be   : > { %v5033_v22 = vadd.f32 %v3180_v40, %v775_v62  ;;  %v5041_v28 = vadd.f32 %v3180_v40, %v815_v63 }
 0x2bf   : > { %v852_v29 = vsel %vm836_vm0, %v5031_v21, -inf  ;;  %v876_v33 = vsel %vm836_vm0, %v5039_v27, -inf }
 0x2c0   : > { %871 = vmax.xlane.f32.xlu1 %v870_v61  ;;  %862 = vmax.xlane.f32.xlu0 %v861_v18  ;;  %v3430_v19 = vpop.f32.mrb[6].mxu0  ;;  %v3442_v20 = vpop.f32.mrb[6].mxu1  ;;  %6558 = vst [vmem:[#allocation58_spill] sm:$0xff] %v5033_v22  ;;  %6559 = vst [vmem:[#allocation59_spill] sm:$0xff] %v5041_v28  ;;  %v849_v30 = vsel %vm836_vm0, %v5033_v22, -inf  ;;  %v873_v34 = vsel %vm836_vm0, %v5041_v28, -inf }
 0x2c1   : > { %v785_v23 = vpop.f32.mrb[7].mxu0  ;;  %v825_v24 = vpop.f32.mrb[7].mxu1  ;;  %v5047_v31 = vadd.f32 %v3430_v19, %v3180_v40  ;;  %v5055_v35 = vadd.f32 %v3442_v20, %v3180_v40 }
 0x2c2   : > { %v5049_v32 = vadd.f32 %v3180_v40, %v785_v23  ;;  %v5057_v36 = vadd.f32 %v3180_v40, %v825_v24 }
 0x2c3   : > { %6560 = vst [vmem:[#allocation60_spill] sm:$0xff] %v5047_v31  ;;  %6562 = vst [vmem:[#allocation62_spill] sm:$0xff] %v5055_v35  ;;  %v858_v37 = vsel %vm836_vm0, %v5047_v31, -inf  ;;  %v882_v39 = vsel %vm836_vm0, %v5055_v35, -inf }
 0x2c4   : > { %844 = vmax.xlane.f32.xlu1 %v843_v25  ;;  %868 = vmax.xlane.f32.xlu0 %v867_v26  ;;  %6561 = vst [vmem:[#allocation61_spill] sm:$0xff] %v5049_v32  ;;  %6563 = vst [vmem:[#allocation63_spill] sm:$0xff] %v5057_v36  ;;  %v855_v38 = vsel %vm836_vm0, %v5049_v32, -inf  ;;  %v879_v41 = vsel %vm836_vm0, %v5057_v36, -inf }
 0x2c8   : > { %853 = vmax.xlane.f32.xlu1 %v852_v29  ;;  %850 = vmax.xlane.f32.xlu0 %v849_v30 }
 0x2cc   : > { %877 = vmax.xlane.f32.xlu1 %v876_v33  ;;  %874 = vmax.xlane.f32.xlu0 %v873_v34 }
 0x2d0   : > { %859 = vmax.xlane.f32.xlu1 %v858_v37  ;;  %856 = vmax.xlane.f32.xlu0 %v855_v38 }
 0x2d4   : > { %883 = vmax.xlane.f32.xlu1 %v882_v39  ;;  %880 = vmax.xlane.f32.xlu0 %v879_v41 }
 0x345   : > { %v866_v40 = vpop.xlane.xlu1 %865  ;;  %v842_v46 = vpop.xlane.xlu0 %841 }
 0x346   : > { %vm894_vm1 = vcmp.ge.f32.partialorder %v5005_v44, %v866_v40  ;;  %vm886_vm2 = vcmp.ge.f32.partialorder %v5003_v43, %v842_v46 }
 0x347   : > { %v910_v48 = vsel %vm894_vm1, %v5067_v45, 4  ;;  %v902_v49 = vsel %vm886_vm2, %v5067_v45, 4 }
 0x348   : > { %v5074_v50 = vsel %vm836_vm0, %v902_v49, 2147483647  ;;  %v5077_v51 = vsel %vm836_vm0, %v910_v48, 2147483647 }
 0x349   : > { %v848_v53 = vpop.xlane.xlu1 %847  ;;  %v839_v55 = vpop.xlane.xlu0 %838  ;;  %v934_v57 = vshra.s32 %v5074_v50, 16  ;;  %v1054_v61 = vshra.s32 %v5077_v51, 16 }
 0x34a   : > { %vm888_vm3 = vcmp.ge.f32.partialorder %v5013_v52, %v848_v53  ;;  %vm885_vm4 = vcmp.ge.f32.partialorder %v5007_v47, %v839_v55 }
 0x34b   : > { %v904_v58 = vsel %vm888_vm3, %v5067_v45, 4  ;;  %v901_v59 = vsel %vm885_vm4, %v5067_v45, 4  ;;  %v5084_v60 = vcvt.s32.f32 %v934_v57  ;;  %v5100_v26 = vcvt.s32.f32 %v1054_v61 }
 0x34c   : > { %v5088_v62 = vsel %vm836_vm0, %v901_v59, 2147483647  ;;  %v5091_v63 = vsel %vm836_vm0, %v904_v58, 2147483647 }
 0x34d   : > { %v872_v18 = vpop.xlane.xlu1 %871  ;;  %937 = vmin.xlane.f32.xlu1 %v5084_v60  ;;  %v863_v19 = vpop.xlane.xlu0 %862  ;;  %v919_v20 = vshra.s32 %v5088_v62, 16  ;;  %v964_v23 = vshra.s32 %v5091_v63, 16 }
 0x34e   : > { %vm896_vm5 = vcmp.ge.f32.partialorder %v5015_v54, %v872_v18  ;;  %vm893_vm6 = vcmp.ge.f32.partialorder %v5017_v56, %v863_v19 }
 0x34f   : > { %v912_v24 = vsel %vm896_vm5, %v5067_v45, 4  ;;  %v909_v25 = vsel %vm893_vm6, %v5067_v45, 4  ;;  %v5102_v29 = vcvt.s32.f32 %v919_v20  ;;  %v5115_v39 = vcvt.s32.f32 %v964_v23 }
 0x350   : > { %v5105_v30 = vsel %vm836_vm0, %v909_v25, 2147483647  ;;  %v5108_v33 = vsel %vm836_vm0, %v912_v24, 2147483647 }
 0x351   : > { %1057 = vmin.xlane.f32.xlu1 %v5100_v26  ;;  %v845_v34 = vpop.xlane.xlu1 %844  ;;  %922 = vmin.xlane.f32.xlu0 %v5102_v29  ;;  %v869_v37 = vpop.xlane.xlu0 %868  ;;  %v1039_v38 = vshra.s32 %v5105_v30, 16  ;;  %v1084_v46 = vshra.s32 %v5108_v33, 16  ;;  %v1038_v4 = vand.u32 65535, %v5105_v30 }
 0x352   : > { %vm887_vm7 = vcmp.ge.f32.partialorder %v5025_v16, %v845_v34  ;;  %vm895_vm8 = vcmp.ge.f32.partialorder %v5027_v17, %v869_v37 }
 0x353   : > { %v903_v41 = vsel %vm887_vm7, %v5067_v45, 4  ;;  %v911_v42 = vsel %vm895_vm8, %v5067_v45, 4  ;;  %v5119_v40 = vcvt.s32.f32 %v1039_v38  ;;  %v5136_v18 = vcvt.s32.f32 %v1084_v46 }
 0x354   : > { %v5123_v48 = vsel %vm836_vm0, %v903_v41, 2147483647  ;;  %v5126_v49 = vsel %vm836_vm0, %v911_v42, 2147483647 }
 0x355   : > { %967 = vmin.xlane.f32.xlu1 %v5115_v39  ;;  %v854_v53 = vpop.xlane.xlu1 %853  ;;  %1042 = vmin.xlane.f32.xlu0 %v5119_v40  ;;  %v851_v55 = vpop.xlane.xlu0 %850  ;;  %v949_v57 = vshra.s32 %v5123_v48, 16  ;;  %v1069_v58 = vshra.s32 %v5126_v49, 16  ;;  %v948_v30 = vand.u32 65535, %v5123_v48  ;;  %v1068_v48 = vand.u32 65535, %v5126_v49 }
 0x356   : > { %vm890_vm9 = vcmp.ge.f32.partialorder %v5031_v21, %v854_v53  ;;  %vm889_vm10 = vcmp.ge.f32.partialorder %v5033_v22, %v851_v55 }
 0x357   : > { %v906_v59 = vsel %vm890_vm9, %v5067_v45, 4  ;;  %v905_v61 = vsel %vm889_vm10, %v5067_v45, 4  ;;  %v5138_v19 = vcvt.s32.f32 %v949_v57  ;;  %v5151_v37 = vcvt.s32.f32 %v1069_v58 }
 0x358   : > { %v5141_v20 = vsel %vm836_vm0, %v906_v59, 2147483647  ;;  %v5144_v23 = vsel %vm836_vm0, %v905_v61, 2147483647 }
 0x359   : > { %1087 = vmin.xlane.f32.xlu1 %v5136_v18  ;;  %v878_v24 = vpop.xlane.xlu1 %877  ;;  %952 = vmin.xlane.f32.xlu0 %v5138_v19  ;;  %v875_v25 = vpop.xlane.xlu0 %874  ;;  %v994_v34 = vshra.s32 %v5141_v20, 16  ;;  %v979_v46 = vshra.s32 %v5144_v23, 16  ;;  %v978_v49 = vand.u32 65535, %v5144_v23 }
 0x35a   : > { %vm898_vm11 = vcmp.ge.f32.partialorder %v5039_v27, %v878_v24  ;;  %vm897_vm12 = vcmp.ge.f32.partialorder %v5041_v28, %v875_v25 }
 0x35b   : > { %v914_v38 = vsel %vm898_vm11, %v5067_v45, 4  ;;  %v913_v41 = vsel %vm897_vm12, %v5067_v45, 4  ;;  %v5155_v42 = vcvt.s32.f32 %v994_v34 }
 0x35c   : > { %v5159_v53 = vsel %vm836_vm0, %v914_v38, 2147483647  ;;  %v5162_v55 = vsel %vm836_vm0, %v913_v41, 2147483647  ;;  %v5174_v38 = vcvt.s32.f32 %v979_v46 }
 0x35d   : > { %997 = vmin.xlane.f32.xlu1 %v5155_v42  ;;  %v860_v57 = vpop.xlane.xlu1 %859  ;;  %1072 = vmin.xlane.f32.xlu0 %v5151_v37  ;;  %v857_v58 = vpop.xlane.xlu0 %856  ;;  %v1114_v59 = vshra.s32 %v5159_v53, 16  ;;  %v1099_v61 = vshra.s32 %v5162_v55, 16  ;;  %v1098_v23 = vand.u32 65535, %v5162_v55 }
 0x35e   : > { %vm892_vm13 = vcmp.ge.f32.partialorder %v5047_v31, %v860_v57  ;;  %vm891_vm14 = vcmp.ge.f32.partialorder %v5049_v32, %v857_v58 }
 0x35f   : > { %v908_v24 = vsel %vm892_vm13, %v5067_v45, 4  ;;  %v907_v25 = vsel %vm891_vm14, %v5067_v45, 4  ;;  %v5172_v34 = vcvt.s32.f32 %v1114_v59  ;;  %v5187_v46 = vcvt.s32.f32 %v1099_v61 }
 0x360   : > { %v5177_v41 = vsel %vm836_vm0, %v908_v24, 2147483647  ;;  %v5180_v15 = vsel %vm836_vm0, %v907_v25, 2147483647 }
 0x361   : > { %1117 = vmin.xlane.f32.xlu1 %v5172_v34  ;;  %v884_v57 = vpop.xlane.xlu1 %883  ;;  %982 = vmin.xlane.f32.xlu0 %v5174_v38  ;;  %v881_v58 = vpop.xlane.xlu0 %880  ;;  %v1024_v14 = vshra.s32 %v5177_v41, 16  ;;  %v1009_v13 = vshra.s32 %v5180_v15, 16  ;;  %v1008_v55 = vand.u32 65535, %v5180_v15 }
 0x362   : > { %vm900_vm15 = vcmp.ge.f32.partialorder %v5055_v35, %v884_v57  ;;  %vm899_vm1 = vcmp.ge.f32.partialorder %v5057_v36, %v881_v58 }
 0x363   : > { %v916_v59 = vsel %vm900_vm15, %v5067_v45, 4  ;;  %v915_v24 = vsel %vm899_vm1, %v5067_v45, 4  ;;  %v5191_v25 = vcvt.s32.f32 %v1024_v14  ;;  %v5205_v58 = vcvt.s32.f32 %v1009_v13 }
 0x364   : > { %v5195_v12 = vsel %vm836_vm0, %v916_v59, 2147483647  ;;  %v5198_v11 = vsel %vm836_vm0, %v915_v24, 2147483647  ;;  %v933_v24 = vand.u32 65535, %v5074_v50  ;;  %v918_v13 = vand.u32 65535, %v5088_v62 }
 0x365   : > { %1027 = vmin.xlane.f32.xlu1 %v5191_v25  ;;  %1102 = vmin.xlane.f32.xlu0 %v5187_v46  ;;  %v1144_v61 = vshra.s32 %v5195_v12, 16  ;;  %v1129_v14 = vshra.s32 %v5198_v11, 16  ;;  %v963_v50 = vand.u32 65535, %v5091_v63  ;;  %v1083_v63 = vand.u32 65535, %v5108_v33 }
 0x366   : > { %v935_v9 = vcvt.s32.f32 %v933_v24  ;;  %v920_v5 = vcvt.s32.f32 %v918_v13  ;;  %v1040_v24 = vcvt.s32.f32 %v1038_v4  ;;  %v950_v4 = vcvt.s32.f32 %v948_v30 }
 0x367   : > { %v5203_v57 = vcvt.s32.f32 %v1144_v61  ;;  %v5210_v59 = vcvt.s32.f32 %v1129_v14  ;;  %v1053_v61 = vand.u32 65535, %v5077_v51  ;;  %v965_v62 = vcvt.s32.f32 %v963_v50 }
 0x368   : > { %v993_v33 = vand.u32 65535, %v5141_v20  ;;  %v1113_v20 = vand.u32 65535, %v5159_v53  ;;  %v980_v30 = vcvt.s32.f32 %v978_v49  ;;  %v1023_v53 = vand.u32 65535, %v5177_v41 }
 0x369   : > { %1147 = vmin.xlane.f32.xlu1 %v5203_v57  ;;  %1012 = vmin.xlane.f32.xlu0 %v5205_v58  ;;  %v1055_v6 = vcvt.s32.f32 %v1053_v61  ;;  %v1085_v61 = vcvt.s32.f32 %v1083_v63  ;;  %v1143_v41 = vand.u32 65535, %v5195_v12  ;;  %v1128_v12 = vand.u32 65535, %v5198_v11 }
 0x36a   : > { %v1115_v63 = vcvt.s32.f32 %v1113_v20 }
 0x36d   : > { %1132 = vmin.xlane.f32.xlu0 %v5210_v59 }
 0x3da   : > { %v5214_v10 = vpop.xlane.xlu1 %937 }
 0x3db   : > { %vm939_vm2 = vcmp.eq.f32.partialorder %v5084_v60, %v5214_v10  ;;  %v944_v11 = vcvt.f32.s32 %v5214_v10 }
 0x3dc   : > { %v940_v8 = vsel %vm939_vm2, %v935_v9, inf }
 0x3dd   : > { %941 = vmin.xlane.f32.xlu1 %v940_v8  ;;  %v945_v49 = vshll.u32 %v944_v11, 16 }
 0x3de   : > { %v5220_v7 = vpop.xlane.xlu1 %1057  ;;  %v5222_v14 = vpop.xlane.xlu0 %922 }
 0x3df   : > { %vm1059_vm3 = vcmp.eq.f32.partialorder %v5100_v26, %v5220_v7  ;;  %vm924_vm4 = vcmp.eq.f32.partialorder %v5102_v29, %v5222_v14  ;;  %v1064_v20 = vcvt.f32.s32 %v5220_v7 }
 0x3e0   : > { %v1060_v51 = vsel %vm1059_vm3, %v1055_v6, inf  ;;  %v925_v60 = vsel %vm924_vm4, %v920_v5, inf }
 0x3e1   : > { %1061 = vmin.xlane.f32.xlu1 %v1060_v51  ;;  %926 = vmin.xlane.f32.xlu0 %v925_v60  ;;  %v995_v51 = vcvt.s32.f32 %v993_v33  ;;  %v1070_v60 = vcvt.s32.f32 %v1068_v48 }
 0x3e2   : > { %v5230_v8 = vpop.xlane.xlu1 %967  ;;  %v5232_v9 = vpop.xlane.xlu0 %1042 }
 0x3e3   : > { %vm969_vm5 = vcmp.eq.f32.partialorder %v5115_v39, %v5230_v8  ;;  %vm1044_vm6 = vcmp.eq.f32.partialorder %v5119_v40, %v5232_v9 }
 0x3e4   : > { %v970_v6 = vsel %vm969_vm5, %v965_v62, inf  ;;  %v1045_v5 = vsel %vm1044_vm6, %v1040_v24, inf }
 0x3e5   : > { %971 = vmin.xlane.f32.xlu1 %v970_v6  ;;  %1046 = vmin.xlane.f32.xlu0 %v1045_v5 }
 0x3e6   : > { %v5240_v26 = vpop.xlane.xlu1 %1087  ;;  %v5242_v29 = vpop.xlane.xlu0 %952 }
 0x3e7   : > { %vm1089_vm7 = vcmp.eq.f32.partialorder %v5136_v18, %v5240_v26  ;;  %vm954_vm8 = vcmp.eq.f32.partialorder %v5138_v19, %v5242_v29 }
 0x3e8   : > { %v1090_v39 = vsel %vm1089_vm7, %v1085_v61, inf  ;;  %v955_v40 = vsel %vm954_vm8, %v950_v4, inf  ;;  %v1025_v61 = vcvt.s32.f32 %v1023_v53  ;;  %v1100_v4 = vcvt.s32.f32 %v1098_v23 }
 0x3e9   : > { %1091 = vmin.xlane.f32.xlu1 %v1090_v39  ;;  %956 = vmin.xlane.f32.xlu0 %v955_v40  ;;  %v1145_v39 = vcvt.s32.f32 %v1143_v41  ;;  %v1010_v40 = vcvt.s32.f32 %v1008_v55  ;;  %v1049_v53 = vcvt.f32.s32 %v5232_v9  ;;  %v1094_v41 = vcvt.f32.s32 %v5240_v26 }
 0x3ea   : > { %v5250_v13 = vpop.xlane.xlu1 %997  ;;  %v5252_v50 = vpop.xlane.xlu0 %1072  ;;  %v959_v55 = vcvt.f32.s32 %v5242_v29 }
 0x3eb   : > { %vm999_vm9 = vcmp.eq.f32.partialorder %v5155_v42, %v5250_v13  ;;  %vm1074_vm10 = vcmp.eq.f32.partialorder %v5151_v37, %v5252_v50 }
 0x3ec   : > { %v1000_v18 = vsel %vm999_vm9, %v995_v51, inf  ;;  %v1075_v19 = vsel %vm1074_vm10, %v1070_v60, inf  ;;  %v1130_v51 = vcvt.s32.f32 %v1128_v12  ;;  %v960_v11 = vshll.u32 %v959_v55, 16 }
 0x3ed   : > { %1001 = vmin.xlane.f32.xlu1 %v1000_v18  ;;  %1076 = vmin.xlane.f32.xlu0 %v1075_v19 }
 0x3ee   : > { %v5260_v62 = vpop.xlane.xlu1 %1117  ;;  %v5262_v24 = vpop.xlane.xlu0 %982 }
 0x3ef   : > { %vm1119_vm11 = vcmp.eq.f32.partialorder %v5172_v34, %v5260_v62  ;;  %vm984_vm12 = vcmp.eq.f32.partialorder %v5174_v38, %v5262_v24 }
 0x3f0   : > { %v1120_v37 = vsel %vm1119_vm11, %v1115_v63, inf  ;;  %v985_v42 = vsel %vm984_vm12, %v980_v30, inf  ;;  %v1065_v63 = vshll.u32 %v1064_v20, 16  ;;  %v974_v30 = vcvt.f32.s32 %v5230_v8 }
 0x3f1   : > { %1121 = vmin.xlane.f32.xlu1 %v1120_v37  ;;  %986 = vmin.xlane.f32.xlu0 %v985_v42  ;;  %v1004_v20 = vcvt.f32.s32 %v5250_v13 }
 0x3f2   : > { %v5270_v6 = vpop.xlane.xlu1 %1027  ;;  %v5272_v5 = vpop.xlane.xlu0 %1102  ;;  %v975_v9 = vshll.u32 %v974_v30, 16 }
 0x3f3   : > { %vm1029_vm13 = vcmp.eq.f32.partialorder %v5191_v25, %v5270_v6  ;;  %vm1104_vm14 = vcmp.eq.f32.partialorder %v5187_v46, %v5272_v5 }
 0x3f4   : > { %v1030_v34 = vsel %vm1029_vm13, %v1025_v61, inf  ;;  %v1105_v38 = vsel %vm1104_vm14, %v1100_v4, inf  ;;  %v1050_v4 = vshll.u32 %v1049_v53, 16 }
 0x3f5   : > { %1031 = vmin.xlane.f32.xlu1 %v1030_v34  ;;  %1106 = vmin.xlane.f32.xlu0 %v1105_v38 }
 0x3f6   : > { %v5280_v33 = vpop.xlane.xlu1 %1147  ;;  %v5282_v48 = vpop.xlane.xlu0 %1012 }
 0x3f7   : > { %vm1149_vm15 = vcmp.eq.f32.partialorder %v5203_v57, %v5280_v33  ;;  %vm1014_vm1 = vcmp.eq.f32.partialorder %v5205_v58, %v5282_v48  ;;  %v929_v58 = vcvt.f32.s32 %v5222_v14 }
 0x3f8   : > { %v1150_v15 = vsel %vm1149_vm15, %v1145_v39, inf  ;;  %v1015_v46 = vsel %vm1014_vm1, %v1010_v40, inf }
 0x3f9   : > { %1151 = vmin.xlane.f32.xlu1 %v1150_v15  ;;  %1016 = vmin.xlane.f32.xlu0 %v1015_v46  ;;  %v930_v37 = vshll.u32 %v929_v58, 16 }
 0x3fa   : > { %v5289_v25 = vpop.xlane.xlu0 %1132 }
 0x3fb   : > { %vm1134_vm2 = vcmp.eq.f32.partialorder %v5210_v59, %v5289_v25 }
 0x3fc   : > { %v1135_v60 = vsel %vm1134_vm2, %v1130_v51, inf }
 0x3fd   : > { %1136 = vmin.xlane.f32.xlu0 %v1135_v60  ;;  %v1095_v60 = vshll.u32 %v1094_v41, 16 }
 0x46a   : > { %v942_v57 = vpop.xlane.xlu1 %941 }
 0x46b   : > { %v943_v18 = vcvt.f32.s32 %v942_v57  ;;  %v1079_v57 = vcvt.f32.s32 %v5252_v50 }
 0x46d   : > { %v5296_v19 = vadd.s32 %v945_v49, %v943_v18 }
 0x46e   : > { %v1062_v23 = vpop.xlane.xlu1 %1061  ;;  %v927_v59 = vpop.xlane.xlu0 %926 }
 0x46f   : > { %v1063_v42 = vcvt.f32.s32 %v1062_v23  ;;  %v928_v61 = vcvt.f32.s32 %v927_v59  ;;  %vm1158_vm3 = vcmp.eq.s32.totalorder %v5067_v45, %v5296_v19 }
 0x470   : > { %v5306_v7 = vsel %vm1158_vm3, -inf, %v5003_v43 }
 0x471   : > { %v5308_v10 = vadd.s32 %v1065_v63, %v1063_v42  ;;  %v5310_v14 = vadd.s32 %v930_v37, %v928_v61  ;;  %v1192_v8 = vsel %vm836_vm0, %v5306_v7, -inf  ;;  %v1005_v37 = vshll.u32 %v1004_v20, 16 }
 0x472   : > { %1193 = vmax.xlane.f32.xlu1 %v1192_v8  ;;  %v972_v34 = vpop.xlane.xlu1 %971  ;;  %v1047_v38 = vpop.xlane.xlu0 %1046  ;;  %v1080_v42 = vshll.u32 %v1079_v57, 16  ;;  %v1124_v61 = vcvt.f32.s32 %v5260_v62  ;;  %v989_v8 = vcvt.f32.s32 %v5262_v24 }
 0x473   : > { %v973_v39 = vcvt.f32.s32 %v972_v34  ;;  %v1048_v40 = vcvt.f32.s32 %v1047_v38  ;;  %vm1166_vm4 = vcmp.eq.s32.totalorder %v5067_v45, %v5308_v10  ;;  %vm1157_vm5 = vcmp.eq.s32.totalorder %v5067_v45, %v5310_v14 }
 0x474   : > { %v5324_v12 = vsel %vm1166_vm4, -inf, %v5005_v44  ;;  %v5330_v26 = vsel %vm1157_vm5, -inf, %v5007_v47 }
 0x475   : > { %v5332_v29 = vadd.s32 %v975_v9, %v973_v39  ;;  %v5334_v15 = vadd.s32 %v1050_v4, %v1048_v40  ;;  %v1216_v46 = vsel %vm836_vm0, %v5324_v12, -inf  ;;  %v1189_v51 = vsel %vm836_vm0, %v5330_v26, -inf }
 0x476   : > { %1217 = vmax.xlane.f32.xlu1 %v1216_v46  ;;  %v1092_v49 = vpop.xlane.xlu1 %1091  ;;  %1190 = vmax.xlane.f32.xlu0 %v1189_v51  ;;  %v957_v58 = vpop.xlane.xlu0 %956  ;;  %v1125_v46 = vshll.u32 %v1124_v61, 16  ;;  %v990_v51 = vshll.u32 %v989_v8, 16  ;;  %v1154_v61 = vcvt.f32.s32 %v5280_v33  ;;  %v1019_v8 = vcvt.f32.s32 %v5282_v48 }
 0x477   : > { %v1093_v18 = vcvt.f32.s32 %v1092_v49  ;;  %v958_v63 = vcvt.f32.s32 %v957_v58  ;;  %vm1160_vm6 = vcmp.eq.s32.totalorder %v5067_v45, %v5332_v29  ;;  %vm1165_vm7 = vcmp.eq.s32.totalorder %v5067_v45, %v5334_v15 }
 0x478   : > { %v5350_v30 = vsel %vm1160_vm6, -inf, %v5013_v52  ;;  %v5356_v13 = vsel %vm1165_vm7, -inf, %v5017_v56 }
 0x479   : > { %v5358_v50 = vadd.s32 %v1095_v60, %v1093_v18  ;;  %v5360_v53 = vadd.s32 %v960_v11, %v958_v63  ;;  %v1198_v23 = vsel %vm836_vm0, %v5350_v30, -inf  ;;  %v1213_v59 = vsel %vm836_vm0, %v5356_v13, -inf }
 0x47a   : > { %1199 = vmax.xlane.f32.xlu1 %v1198_v23  ;;  %v1002_v9 = vpop.xlane.xlu1 %1001  ;;  %1214 = vmax.xlane.f32.xlu0 %v1213_v59  ;;  %v1077_v4 = vpop.xlane.xlu0 %1076  ;;  %v1034_v60 = vcvt.f32.s32 %v5270_v6  ;;  %v1109_v11 = vcvt.f32.s32 %v5272_v5 }
 0x47b   : > { %v1003_v41 = vcvt.f32.s32 %v1002_v9  ;;  %v1078_v55 = vcvt.f32.s32 %v1077_v4  ;;  %vm1168_vm8 = vcmp.eq.s32.totalorder %v5067_v45, %v5358_v50  ;;  %vm1159_vm9 = vcmp.eq.s32.totalorder %v5067_v45, %v5360_v53 }
 0x47c   : > { %v5376_v34 = vsel %vm1168_vm8, -inf, %v5015_v54  ;;  %v5382_v62 = vsel %vm1159_vm9, -inf, %v5025_v16 }
 0x47d   : > { %v5384_v24 = vadd.s32 %v1005_v37, %v1003_v41  ;;  %v5386_v38 = vadd.s32 %v1080_v42, %v1078_v55  ;;  %v1222_v39 = vsel %vm836_vm0, %v5376_v34, -inf  ;;  %v1195_v40 = vsel %vm836_vm0, %v5382_v62, -inf }
 0x47e   : > { %1223 = vmax.xlane.f32.xlu1 %v1222_v39  ;;  %v1122_v20 = vpop.xlane.xlu1 %1121  ;;  %1196 = vmax.xlane.f32.xlu0 %v1195_v40  ;;  %v987_v57 = vpop.xlane.xlu0 %986  ;;  %v1035_v37 = vshll.u32 %v1034_v60, 16  ;;  %v1110_v42 = vshll.u32 %v1109_v11, 16  ;;  %v1155_v60 = vshll.u32 %v1154_v61, 16  ;;  %v1020_v11 = vshll.u32 %v1019_v8, 16 }
 0x47f   : > { %v1123_v49 = vcvt.f32.s32 %v1122_v20  ;;  %v988_v58 = vcvt.f32.s32 %v987_v57  ;;  %vm1162_vm10 = vcmp.eq.s32.totalorder %v5067_v45, %v5384_v24  ;;  %vm1167_vm11 = vcmp.eq.s32.totalorder %v5067_v45, %v5386_v38 }
 0x480   : > { %v5402_v18 = vsel %vm1162_vm10, -inf, %v5031_v21  ;;  %v5408_v6 = vsel %vm1167_vm11, -inf, %v5027_v17  ;;  %v1139_v20 = vcvt.f32.s32 %v5289_v25 }
 0x481   : > { %v5410_v5 = vadd.s32 %v1125_v46, %v1123_v49  ;;  %v5412_v63 = vadd.s32 %v990_v51, %v988_v58  ;;  %v1204_v23 = vsel %vm836_vm0, %v5402_v18, -inf  ;;  %v1219_v59 = vsel %vm836_vm0, %v5408_v6, -inf }
 0x482   : > { %1205 = vmax.xlane.f32.xlu1 %v1204_v23  ;;  %v1032_v9 = vpop.xlane.xlu1 %1031  ;;  %1220 = vmax.xlane.f32.xlu0 %v1219_v59  ;;  %v1107_v4 = vpop.xlane.xlu0 %1106 }
 0x483   : > { %6564 = vst [vmem:[#allocation64_spill] sm:$0xff] %v5412_v63  ;;  %v1033_v41 = vcvt.f32.s32 %v1032_v9  ;;  %v1108_v55 = vcvt.f32.s32 %v1107_v4  ;;  %vm1170_vm12 = vcmp.eq.s32.totalorder %v5067_v45, %v5410_v5  ;;  %vm1161_vm13 = vcmp.eq.s32.totalorder %v5067_v45, %v5412_v63 }
 0x484   : > { %v5428_v39 = vsel %vm1170_vm12, -inf, %v5039_v27  ;;  %v5434_v33 = vsel %vm1161_vm13, -inf, %v5033_v22  ;;  %v1140_v4 = vshll.u32 %v1139_v20, 16 }
 0x485   : > { %v5436_v48 = vadd.s32 %v1035_v37, %v1033_v41  ;;  %v5438_v40 = vadd.s32 %v1110_v42, %v1108_v55  ;;  %v1228_v46 = vsel %vm836_vm0, %v5428_v39, -inf  ;;  %v1201_v51 = vsel %vm836_vm0, %v5434_v33, -inf }
 0x486   : > { %1229 = vmax.xlane.f32.xlu1 %v1228_v46  ;;  %v1152_v57 = vpop.xlane.xlu1 %1151  ;;  %1202 = vmax.xlane.f32.xlu0 %v1201_v51  ;;  %v1017_v49 = vpop.xlane.xlu0 %1016 }
 0x487   : > { %6565 = vst [vmem:[#allocation65_spill] sm:$0xff] %v5436_v48  ;;  %6566 = vst [vmem:[#allocation66_spill] sm:$0xff] %v5438_v40  ;;  %v1153_v58 = vcvt.f32.s32 %v1152_v57  ;;  %v1018_v23 = vcvt.f32.s32 %v1017_v49  ;;  %vm6456_vm14 = vcmp.eq.s32.totalorder %v5067_v45, %v5436_v48  ;;  %vm6438_vm15 = vcmp.eq.s32.totalorder %v5067_v45, %v5438_v40 }
 0x488   : > { %v5453_v59 = vsel %vm6456_vm14, -inf, %v5047_v31  ;;  %v5459_v25 = vsel %vm6438_vm15, -inf, %v5041_v28 }
 0x489   : > { %v5461_v37 = vadd.s32 %v1155_v60, %v1153_v58  ;;  %v5463_v42 = vadd.s32 %v1020_v11, %v1018_v23  ;;  %v1210_v61 = vsel %vm836_vm0, %v5453_v59, -inf  ;;  %v1225_v8 = vsel %vm836_vm0, %v5459_v25, -inf }
 0x48a   : > { %1211 = vmax.xlane.f32.xlu1 %v1210_v61  ;;  %1226 = vmax.xlane.f32.xlu0 %v1225_v8  ;;  %v1137_v9 = vpop.xlane.xlu0 %1136 }
 0x48b   : > { %6567 = vst [vmem:[#allocation67_spill] sm:$0xff] %v5461_v37  ;;  %6568 = vst [vmem:[#allocation68_spill] sm:$0xff] %v5463_v42  ;;  %v1138_v41 = vcvt.f32.s32 %v1137_v9  ;;  %vm6436_vm1 = vcmp.eq.s32.totalorder %v5067_v45, %v5461_v37  ;;  %vm6437_vm2 = vcmp.eq.s32.totalorder %v5067_v45, %v5463_v42 }
 0x48c   : > { %v5477_v55 = vsel %vm6436_vm1, -inf, %v5055_v35  ;;  %v5483_v46 = vsel %vm6437_vm2, -inf, %v5049_v32 }
 0x48d   : > { %v5485_v51 = vadd.s32 %v1140_v4, %v1138_v41  ;;  %v1234_v60 = vsel %vm836_vm0, %v5477_v55, -inf  ;;  %v1207_v11 = vsel %vm836_vm0, %v5483_v46, -inf }
 0x48e   : > { %1235 = vmax.xlane.f32.xlu1 %v1234_v60  ;;  %1208 = vmax.xlane.f32.xlu0 %v1207_v11 }
 0x48f   : > { %6569 = vst [vmem:[#allocation69_spill] sm:$0xff] %v5485_v51  ;;  %vm6439_vm1 = vcmp.eq.s32.totalorder %v5067_v45, %v5485_v51 }
 0x490   : > { %v5497_v20 = vsel %vm6439_vm1, -inf, %v5057_v36 }
 0x491   : > { %v1231_v57 = vsel %vm836_vm0, %v5497_v20, -inf }
 0x492   : > { %1232 = vmax.xlane.f32.xlu0 %v1231_v57 }
 0x4ff   : > { %v1194_v49 = vpop.xlane.xlu1 %1193 }
 0x500   : > { %vm1238_vm2 = vcmp.ge.f32.partialorder %v5306_v7, %v1194_v49 }
 0x501   : > { %v1254_v58 = vsel %vm1238_vm2, %v5067_v45, 4 }
 0x502   : > { %v5504_v23 = vsel %vm836_vm0, %v1254_v58, 2147483647 }
 0x503   : > { %v1218_v61 = vpop.xlane.xlu1 %1217  ;;  %v1191_v8 = vpop.xlane.xlu0 %1190  ;;  %v1286_v9 = vshra.s32 %v5504_v23, 16 }
 0x504   : > { %vm1246_vm15 = vcmp.ge.f32.partialorder %v5324_v12, %v1218_v61  ;;  %vm1237_vm1 = vcmp.ge.f32.partialorder %v5330_v26, %v1191_v8 }
 0x505   : > { %v1262_v4 = vsel %vm1246_vm15, %v5067_v45, 4  ;;  %v1253_v41 = vsel %vm1237_vm1, %v5067_v45, 4  ;;  %v5511_v60 = vcvt.s32.f32 %v1286_v9 }
 0x506   : > { %v5514_v7 = vsel %vm836_vm0, %v1262_v4, 2147483647  ;;  %v5517_v11 = vsel %vm836_vm0, %v1253_v41, 2147483647 }
 0x507   : > { %1289 = vmin.xlane.f32.xlu1 %v5511_v60  ;;  %v1200_v57 = vpop.xlane.xlu1 %1199  ;;  %v1215_v49 = vpop.xlane.xlu0 %1214  ;;  %v1406_v12 = vshra.s32 %v5514_v7, 16  ;;  %v1271_v26 = vshra.s32 %v5517_v11, 16 }
 0x508   : > { %vm1240_vm15 = vcmp.ge.f32.partialorder %v5350_v30, %v1200_v57  ;;  %vm1245_vm1 = vcmp.ge.f32.partialorder %v5356_v13, %v1215_v49 }
 0x509   : > { %v1256_v58 = vsel %vm1240_vm15, %v5067_v45, 4  ;;  %v1261_v61 = vsel %vm1245_vm1, %v5067_v45, 4  ;;  %v5526_v8 = vcvt.s32.f32 %v1406_v12  ;;  %v5528_v9 = vcvt.s32.f32 %v1271_v26 }
 0x50a   : > { %v5531_v4 = vsel %vm836_vm0, %v1256_v58, 2147483647  ;;  %v5534_v41 = vsel %vm836_vm0, %v1261_v61, 2147483647 }
 0x50b   : > { %1409 = vmin.xlane.f32.xlu1 %v5526_v8  ;;  %v1224_v3 = vpop.xlane.xlu1 %1223  ;;  %1274 = vmin.xlane.f32.xlu0 %v5528_v9  ;;  %v1197_v30 = vpop.xlane.xlu0 %1196  ;;  %v1316_v13 = vshra.s32 %v5531_v4, 16  ;;  %v1391_v57 = vshra.s32 %v5534_v41, 16  ;;  %v1390_v63 = vand.u32 65535, %v5534_v41 }
 0x50c   : > { %vm1248_vm2 = vcmp.ge.f32.partialorder %v5376_v34, %v1224_v3  ;;  %vm1239_vm15 = vcmp.ge.f32.partialorder %v5382_v62, %v1197_v30 }
 0x50d   : > { %v1264_v49 = vsel %vm1248_vm2, %v5067_v45, 4  ;;  %v1255_v12 = vsel %vm1239_vm15, %v5067_v45, 4  ;;  %v5544_v26 = vcvt.s32.f32 %v1316_v13  ;;  %v5546_v58 = vcvt.s32.f32 %v1391_v57 }
 0x50e   : > { %v5549_v61 = vsel %vm836_vm0, %v1264_v49, 2147483647  ;;  %v5552_v2 = vsel %vm836_vm0, %v1255_v12, 2147483647 }
 0x50f   : > { %1319 = vmin.xlane.f32.xlu1 %v5544_v26  ;;  %v1206_v1 = vpop.xlane.xlu1 %1205  ;;  %1394 = vmin.xlane.f32.xlu0 %v5546_v58  ;;  %v1221_v3 = vpop.xlane.xlu0 %1220  ;;  %v1436_v34 = vshra.s32 %v5549_v61, 16  ;;  %v1301_v62 = vshra.s32 %v5552_v2, 16  ;;  %v1300_v41 = vand.u32 65535, %v5552_v2 }
 0x510   : > { %vm1242_vm1 = vcmp.ge.f32.partialorder %v5402_v18, %v1206_v1  ;;  %vm1247_vm2 = vcmp.ge.f32.partialorder %v5408_v6, %v1221_v3 }
 0x511   : > { %v1258_v30 = vsel %vm1242_vm1, %v5067_v45, 4  ;;  %v1263_v13 = vsel %vm1247_vm2, %v5067_v45, 4  ;;  %v5562_v57 = vcvt.s32.f32 %v1436_v34  ;;  %v5564_v49 = vcvt.s32.f32 %v1301_v62 }
 0x512   : > { %v5567_v12 = vsel %vm836_vm0, %v1258_v30, 2147483647  ;;  %v5570_v0 = vsel %vm836_vm0, %v1263_v13, 2147483647 }
 0x513   : > { %1439 = vmin.xlane.f32.xlu1 %v5562_v57  ;;  %v1230_v36 = vpop.xlane.xlu1 %1229  ;;  %1304 = vmin.xlane.f32.xlu0 %v5564_v49  ;;  %v1203_v1 = vpop.xlane.xlu0 %1202  ;;  %v1346_v18 = vshra.s32 %v5567_v12, 16  ;;  %v1421_v6 = vshra.s32 %v5570_v0, 16  ;;  %v1420_v2 = vand.u32 65535, %v5570_v0 }
 0x514   : > { %vm1250_vm15 = vcmp.ge.f32.partialorder %v5428_v39, %v1230_v36  ;;  %vm1241_vm1 = vcmp.ge.f32.partialorder %v5434_v33, %v1203_v1 }
 0x515   : > { %v1266_v3 = vsel %vm1250_vm15, %v5067_v45, 4  ;;  %v1257_v34 = vsel %vm1241_vm1, %v5067_v45, 4  ;;  %v5580_v62 = vcvt.s32.f32 %v1346_v18  ;;  %v5582_v30 = vcvt.s32.f32 %v1421_v6 }
 0x516   : > { %v5585_v13 = vsel %vm836_vm0, %v1266_v3, 2147483647  ;;  %v5588_v51 = vsel %vm836_vm0, %v1257_v34, 2147483647 }
 0x517   : > { %1349 = vmin.xlane.f32.xlu1 %v5580_v62  ;;  %v1212_v32 = vpop.xlane.xlu1 %1211  ;;  %1424 = vmin.xlane.f32.xlu0 %v5582_v30  ;;  %v1227_v36 = vpop.xlane.xlu0 %1226  ;;  %v1466_v39 = vshra.s32 %v5585_v13, 16  ;;  %v1331_v33 = vshra.s32 %v5588_v51, 16  ;;  %v1330_v0 = vand.u32 65535, %v5588_v51 }
 0x518   : > { %vm1244_vm2 = vcmp.ge.f32.partialorder %v5453_v59, %v1212_v32  ;;  %vm1249_vm15 = vcmp.ge.f32.partialorder %v5459_v25, %v1227_v36 }
 0x519   : > { %v1260_v1 = vsel %vm1244_vm2, %v5067_v45, 4  ;;  %v1265_v18 = vsel %vm1249_vm15, %v5067_v45, 4  ;;  %v5598_v6 = vcvt.s32.f32 %v1466_v39  ;;  %v5600_v3 = vcvt.s32.f32 %v1331_v33 }
 0x51a   : > { %v5603_v34 = vsel %vm836_vm0, %v1260_v1, 2147483647  ;;  %v5606_v42 = vsel %vm836_vm0, %v1265_v18, 2147483647 }
 0x51b   : > { %1469 = vmin.xlane.f32.xlu1 %v5598_v6  ;;  %v1236_v35 = vpop.xlane.xlu1 %1235  ;;  %1334 = vmin.xlane.f32.xlu0 %v5600_v3  ;;  %v1209_v32 = vpop.xlane.xlu0 %1208  ;;  %v1376_v59 = vshra.s32 %v5603_v34, 16  ;;  %v1451_v25 = vshra.s32 %v5606_v42, 16  ;;  %v1450_v51 = vand.u32 65535, %v5606_v42 }
 0x51c   : > { %vm1252_vm1 = vcmp.ge.f32.partialorder %v5477_v55, %v1236_v35  ;;  %vm1243_vm2 = vcmp.ge.f32.partialorder %v5483_v46, %v1209_v32 }
 0x51d   : > { %v1268_v36 = vsel %vm1252_vm1, %v5067_v45, 4  ;;  %v1259_v39 = vsel %vm1243_vm2, %v5067_v45, 4  ;;  %v5616_v33 = vcvt.s32.f32 %v1376_v59  ;;  %v5618_v1 = vcvt.s32.f32 %v1451_v25 }
 0x51e   : > { %v5621_v18 = vsel %vm836_vm0, %v1268_v36, 2147483647  ;;  %v5624_v37 = vsel %vm836_vm0, %v1259_v39, 2147483647 }
 0x51f   : > { %1379 = vmin.xlane.f32.xlu1 %v5616_v33  ;;  %1454 = vmin.xlane.f32.xlu0 %v5618_v1  ;;  %v1233_v35 = vpop.xlane.xlu0 %1232  ;;  %v1496_v55 = vshra.s32 %v5621_v18, 16  ;;  %v1361_v46 = vshra.s32 %v5624_v37, 16  ;;  %v1360_v42 = vand.u32 65535, %v5624_v37 }
 0x520   : > { %vm1251_vm15 = vcmp.ge.f32.partialorder %v5497_v20, %v1233_v35  ;;  %v1285_v20 = vand.u32 65535, %v5504_v23  ;;  %v1315_v23 = vand.u32 65535, %v5531_v4  ;;  %v1435_v4 = vand.u32 65535, %v5549_v61 }
 0x521   : > { %v1267_v32 = vsel %vm1251_vm15, %v5067_v45, 4  ;;  %v5632_v59 = vcvt.s32.f32 %v1496_v55  ;;  %v5634_v25 = vcvt.s32.f32 %v1361_v46  ;;  %v1405_v46 = vand.u32 65535, %v5514_v7 }
 0x522   : > { %v5637_v36 = vsel %vm836_vm0, %v1267_v32, 2147483647  ;;  %v1287_v55 = vcvt.s32.f32 %v1285_v20  ;;  %v1270_v32 = vand.u32 65535, %v5517_v11  ;;  %v1317_v20 = vcvt.s32.f32 %v1315_v23 }
 0x523   : > { %1499 = vmin.xlane.f32.xlu1 %v5632_v59  ;;  %1364 = vmin.xlane.f32.xlu0 %v5634_v25  ;;  %v1481_v39 = vshra.s32 %v5637_v36, 16  ;;  %v1407_v48 = vcvt.s32.f32 %v1405_v46  ;;  %v1437_v46 = vcvt.s32.f32 %v1435_v4  ;;  %v1345_v61 = vand.u32 65535, %v5567_v12 }
 0x524   : > { %v1272_v22 = vcvt.s32.f32 %v1270_v32  ;;  %v1465_v12 = vand.u32 65535, %v5585_v13  ;;  %v1375_v13 = vand.u32 65535, %v5603_v34  ;;  %v1495_v34 = vand.u32 65535, %v5621_v18 }
 0x525   : > { %v5642_v28 = vcvt.s32.f32 %v1481_v39  ;;  %v1480_v18 = vand.u32 65535, %v5637_v36 }
 0x526   : > { %v1467_v4 = vcvt.s32.f32 %v1465_v12 }
 0x527   : > { %1484 = vmin.xlane.f32.xlu0 %v5642_v28 }
 0x594   : > { %v5646_v35 = vpop.xlane.xlu1 %1289 }
 0x595   : > { %vm1291_vm1 = vcmp.eq.f32.partialorder %v5511_v60, %v5646_v35  ;;  %v1296_v36 = vcvt.f32.s32 %v5646_v35 }
 0x596   : > { %v1292_v40 = vsel %vm1291_vm1, %v1287_v55, inf  ;;  %v1392_v55 = vcvt.s32.f32 %v1390_v63  ;;  %v1302_v63 = vcvt.s32.f32 %v1300_v41  ;;  %v1332_v41 = vcvt.s32.f32 %v1330_v0 }
 0x597   : > { %1293 = vmin.xlane.f32.xlu1 %v1292_v40  ;;  %v1297_v0 = vshll.u32 %v1296_v36, 16 }
 0x598   : > { %v5652_v31 = vpop.xlane.xlu1 %1409  ;;  %v5654_v39 = vpop.xlane.xlu0 %1274 }
 0x599   : > { %vm1411_vm2 = vcmp.eq.f32.partialorder %v5526_v8, %v5652_v31  ;;  %vm1276_vm15 = vcmp.eq.f32.partialorder %v5528_v9, %v5654_v39  ;;  %v1416_v12 = vcvt.f32.s32 %v5652_v31 }
 0x59a   : > { %v1412_v7 = vsel %vm1411_vm2, %v1407_v48, inf  ;;  %v1277_v60 = vsel %vm1276_vm15, %v1272_v22, inf }
 0x59b   : > { %1413 = vmin.xlane.f32.xlu1 %v1412_v7  ;;  %1278 = vmin.xlane.f32.xlu0 %v1277_v60  ;;  %v1347_v7 = vcvt.s32.f32 %v1345_v61  ;;  %v1422_v60 = vcvt.s32.f32 %v1420_v2 }
 0x59c   : > { %v5662_v40 = vpop.xlane.xlu1 %1319  ;;  %v5664_v11 = vpop.xlane.xlu0 %1394 }
 0x59d   : > { %vm1321_vm1 = vcmp.eq.f32.partialorder %v5544_v26, %v5662_v40  ;;  %vm1396_vm14 = vcmp.eq.f32.partialorder %v5546_v58, %v5664_v11 }
 0x59e   : > { %v1322_v48 = vsel %vm1321_vm1, %v1317_v20, inf  ;;  %v1397_v22 = vsel %vm1396_vm14, %v1392_v55, inf }
 0x59f   : > { %1323 = vmin.xlane.f32.xlu1 %v1322_v48  ;;  %1398 = vmin.xlane.f32.xlu0 %v1397_v22 }
 0x5a0   : > { %v5672_v8 = vpop.xlane.xlu1 %1439  ;;  %v5674_v9 = vpop.xlane.xlu0 %1304 }
 0x5a1   : > { %vm1441_vm2 = vcmp.eq.f32.partialorder %v5562_v57, %v5672_v8  ;;  %vm1306_vm15 = vcmp.eq.f32.partialorder %v5564_v49, %v5674_v9  ;;  %v1446_v31 = vcvt.f32.s32 %v5672_v8 }
 0x5a2   : > { %v1442_v26 = vsel %vm1441_vm2, %v1437_v46, inf  ;;  %v1307_v58 = vsel %vm1306_vm15, %v1302_v63, inf  ;;  %v1377_v46 = vcvt.s32.f32 %v1375_v13  ;;  %v1452_v63 = vcvt.s32.f32 %v1450_v51 }
 0x5a3   : > { %1443 = vmin.xlane.f32.xlu1 %v1442_v26  ;;  %1308 = vmin.xlane.f32.xlu0 %v1307_v58  ;;  %v1497_v26 = vcvt.s32.f32 %v1495_v34  ;;  %v1362_v58 = vcvt.s32.f32 %v1360_v42  ;;  %v1401_v13 = vcvt.f32.s32 %v5664_v11  ;;  %v1311_v34 = vcvt.f32.s32 %v5674_v9 }
 0x5a4   : > { %v5682_v32 = vpop.xlane.xlu1 %1349  ;;  %v5684_v23 = vpop.xlane.xlu0 %1424 }
 0x5a5   : > { %vm1351_vm14 = vcmp.eq.f32.partialorder %v5580_v62, %v5682_v32  ;;  %vm1426_vm1 = vcmp.eq.f32.partialorder %v5582_v30, %v5684_v23  ;;  %v1402_v11 = vshll.u32 %v1401_v13, 16  ;;  %v1356_v8 = vcvt.f32.s32 %v5682_v32 }
 0x5a6   : > { %v1352_v57 = vsel %vm1351_vm14, %v1347_v7, inf  ;;  %v1427_v49 = vsel %vm1426_vm1, %v1422_v60, inf  ;;  %v1482_v7 = vcvt.s32.f32 %v1480_v18 }
 0x5a7   : > { %1353 = vmin.xlane.f32.xlu1 %v1352_v57  ;;  %1428 = vmin.xlane.f32.xlu0 %v1427_v49  ;;  %v1357_v14 = vshll.u32 %v1356_v8, 16 }
 0x5a8   : > { %v5692_v20 = vpop.xlane.xlu1 %1469  ;;  %v5694_v55 = vpop.xlane.xlu0 %1334 }
 0x5a9   : > { %vm1471_vm2 = vcmp.eq.f32.partialorder %v5598_v6, %v5692_v20  ;;  %vm1336_vm15 = vcmp.eq.f32.partialorder %v5600_v3, %v5694_v55 }
 0x5aa   : > { %v1472_v62 = vsel %vm1471_vm2, %v1467_v4, inf  ;;  %v1337_v30 = vsel %vm1336_vm15, %v1332_v41, inf  ;;  %v1417_v4 = vshll.u32 %v1416_v12, 16  ;;  %v1326_v41 = vcvt.f32.s32 %v5662_v40 }
 0x5ab   : > { %1473 = vmin.xlane.f32.xlu1 %v1472_v62  ;;  %1338 = vmin.xlane.f32.xlu0 %v1337_v30 }
 0x5ac   : > { %v5702_v48 = vpop.xlane.xlu1 %1379  ;;  %v5704_v22 = vpop.xlane.xlu0 %1454  ;;  %v1327_v40 = vshll.u32 %v1326_v41, 16 }
 0x5ad   : > { %vm1381_vm14 = vcmp.eq.f32.partialorder %v5616_v33, %v5702_v48  ;;  %vm1456_vm1 = vcmp.eq.f32.partialorder %v5618_v1, %v5704_v22  ;;  %v1386_v15 = vcvt.f32.s32 %v5702_v48  ;;  %v1461_v48 = vcvt.f32.s32 %v5704_v22 }
 0x5ae   : > { %v1382_v6 = vsel %vm1381_vm14, %v1377_v46, inf  ;;  %v1457_v3 = vsel %vm1456_vm1, %v1452_v63, inf }
 0x5af   : > { %1383 = vmin.xlane.f32.xlu1 %v1382_v6  ;;  %1458 = vmin.xlane.f32.xlu0 %v1457_v3  ;;  %v1387_v53 = vshll.u32 %v1386_v15, 16 }
 0x5b0   : > { %v5712_v61 = vpop.xlane.xlu1 %1499  ;;  %v5714_v2 = vpop.xlane.xlu0 %1364 }
 0x5b1   : > { %vm1501_vm2 = vcmp.eq.f32.partialorder %v5632_v59, %v5712_v61  ;;  %vm1366_vm15 = vcmp.eq.f32.partialorder %v5634_v25, %v5714_v2  ;;  %v1281_v25 = vcvt.f32.s32 %v5654_v39  ;;  %v1506_v22 = vcvt.f32.s32 %v5712_v61 }
 0x5b2   : > { %v1502_v37 = vsel %vm1501_vm2, %v1497_v26, inf  ;;  %v1367_v33 = vsel %vm1366_vm15, %v1362_v58, inf }
 0x5b3   : > { %1503 = vmin.xlane.f32.xlu1 %v1502_v37  ;;  %1368 = vmin.xlane.f32.xlu0 %v1367_v33  ;;  %v1312_v37 = vshll.u32 %v1311_v34, 16  ;;  %v1431_v33 = vcvt.f32.s32 %v5684_v23  ;;  %v1476_v23 = vcvt.f32.s32 %v5692_v20  ;;  %v1462_v34 = vshll.u32 %v1461_v48, 16 }
 0x5b4   : > { %v5721_v1 = vpop.xlane.xlu0 %1484 }
 0x5b5   : > { %vm1486_vm14 = vcmp.eq.f32.partialorder %v5642_v28, %v5721_v1  ;;  %v1282_v28 = vshll.u32 %v1281_v25, 16  ;;  %v1432_v25 = vshll.u32 %v1431_v33, 16  ;;  %v1477_v13 = vshll.u32 %v1476_v23, 16 }
 0x5b6   : > { %v1487_v60 = vsel %vm1486_vm14, %v1482_v7, inf }
 0x5b7   : > { %1488 = vmin.xlane.f32.xlu0 %v1487_v60 }
 0x624   : > { %v1294_v59 = vpop.xlane.xlu1 %1293 }
 0x625   : > { %v1295_v57 = vcvt.f32.s32 %v1294_v59 }
 0x627   : > { %v1298_v49 = vadd.s32 %v1297_v0, %v1295_v57  ;;  %v1341_v57 = vcvt.f32.s32 %v5694_v55 }
 0x628   : > { %v1414_v51 = vpop.xlane.xlu1 %1413  ;;  %v1279_v62 = vpop.xlane.xlu0 %1278 }
 0x629   : > { %v1415_v30 = vcvt.f32.s32 %v1414_v51  ;;  %v1280_v46 = vcvt.f32.s32 %v1279_v62  ;;  %vm1510_vm1 = vcmp.eq.s32.totalorder %v5067_v45, %v1298_v49 }
 0x62a   : > { %vm1526_vm2 = vmor %vm1158_vm3, %vm1510_vm1 }
 0x62b   : > { %v1418_v35 = vadd.s32 %v1417_v4, %v1415_v30  ;;  %v1283_v39 = vadd.s32 %v1282_v28, %v1280_v46  ;;  %v5736_v63 = vsel %vm1526_vm2, %v5003_v43, -inf  ;;  %v1447_v43 = vshll.u32 %v1446_v31, 16 }
 0x62c   : > { %v1324_v42 = vpop.xlane.xlu1 %1323  ;;  %v1399_v6 = vpop.xlane.xlu0 %1398  ;;  %v1560_v3 = vsel %vm836_vm0, %v5736_v63, -inf  ;;  %v1342_v28 = vshll.u32 %v1341_v57, 16 }
 0x62d   : > { %vm1518_vm15 = vcmp.eq.s32.totalorder %v5067_v45, %v1418_v35  ;;  %v1325_v19 = vcvt.f32.s32 %v1324_v42  ;;  %v1400_v26 = vcvt.f32.s32 %v1399_v6  ;;  %1561 = vmax.xlane.f32.xlu1 %v1560_v3  ;;  %vm1509_vm3 = vcmp.eq.s32.totalorder %v5067_v45, %v1283_v39 }
 0x62e   : > { %vm1534_vm14 = vmor %vm1166_vm4, %vm1518_vm15  ;;  %v1371_v42 = vcvt.f32.s32 %v5714_v2  ;;  %v1507_v2 = vshll.u32 %v1506_v22, 16 }
 0x62f   : > { %v1328_v9 = vadd.s32 %v1327_v40, %v1325_v19  ;;  %v1403_v58 = vadd.s32 %v1402_v11, %v1400_v26  ;;  %v5748_v18 = vsel %vm1534_vm14, %v5005_v44, -inf  ;;  %vm1525_vm1 = vmor %vm1157_vm5, %vm1509_vm3 }
 0x630   : > { %v1444_v7 = vpop.xlane.xlu1 %1443  ;;  %v1309_v60 = vpop.xlane.xlu0 %1308  ;;  %v1584_v32 = vsel %vm836_vm0, %v5748_v18, -inf  ;;  %v5757_v10 = vsel %vm1525_vm1, %v5007_v47, -inf }
 0x631   : > { %vm1512_vm4 = vcmp.eq.s32.totalorder %v5067_v45, %v1328_v9  ;;  %vm1517_vm2 = vcmp.eq.s32.totalorder %v5067_v45, %v1403_v58  ;;  %v1445_v44 = vcvt.f32.s32 %v1444_v7  ;;  %v1310_v36 = vcvt.f32.s32 %v1309_v60  ;;  %1585 = vmax.xlane.f32.xlu1 %v1584_v32  ;;  %v6571_v7 = vld [vmem:[#allocation58_spill] sm:$0xff] }
 0x632   : > { %v1557_v12 = vsel %vm836_vm0, %v5757_v10, -inf  ;;  %vm1528_vm5 = vmor %vm1160_vm6, %vm1512_vm4  ;;  %v1372_v9 = vshll.u32 %v1371_v42, 16  ;;  %v1491_v58 = vcvt.f32.s32 %v5721_v1  ;;  %v6572_v1 = vld [vmem:[#allocation65_spill] sm:$0xff] }
 0x633   : > { %v1448_v59 = vadd.s32 %v1447_v43, %v1445_v44  ;;  %v1313_v47 = vadd.s32 %v1312_v37, %v1310_v36  ;;  %1558 = vmax.xlane.f32.xlu0 %v1557_v12  ;;  %v5768_v0 = vsel %vm1528_vm5, %v5013_v52, -inf  ;;  %vm1533_vm15 = vmor %vm1165_vm7, %vm1517_vm2  ;;  %v6574_v12 = vld [vmem:[#allocation60_spill] sm:$0xff] }
 0x634   : > { %v1354_v49 = vpop.xlane.xlu1 %1353  ;;  %v1429_v4 = vpop.xlane.xlu0 %1428  ;;  %v1566_v29 = vsel %vm836_vm0, %v5768_v0, -inf  ;;  %v5777_v20 = vsel %vm1533_vm15, %v5017_v56, -inf }
 0x635   : > { %vm1520_vm6 = vcmp.eq.s32.totalorder %v5067_v45, %v1448_v59  ;;  %vm1511_vm3 = vcmp.eq.s32.totalorder %v5067_v45, %v1313_v47  ;;  %v1355_v52 = vcvt.f32.s32 %v1354_v49  ;;  %v1430_v41 = vcvt.f32.s32 %v1429_v4  ;;  %1567 = vmax.xlane.f32.xlu1 %v1566_v29  ;;  %v6575_v59 = vld [vmem:[#allocation66_spill] sm:$0xff]  ;;  %v6577_v49 = vld [vmem:[#allocation59_spill] sm:$0xff] }
 0x636   : > { %v1581_v55 = vsel %vm836_vm0, %v5777_v20, -inf  ;;  %vm1536_vm7 = vmor %vm1168_vm8, %vm1520_vm6  ;;  %v1492_v47 = vshll.u32 %v1491_v58, 16 }
 0x637   : > { %v1358_v51 = vadd.s32 %v1357_v14, %v1355_v52  ;;  %v1433_v56 = vadd.s32 %v1432_v25, %v1430_v41  ;;  %1582 = vmax.xlane.f32.xlu0 %v1581_v55  ;;  %v5788_v62 = vsel %vm1536_vm7, %v5015_v54, -inf  ;;  %vm1527_vm14 = vmor %vm1159_vm9, %vm1511_vm3  ;;  %vm6576_vm3 = vcmp.eq.s32.totalorder %v5067_v45, %v6575_v59  ;;  %v6578_v41 = vld [vmem:[#allocation67_spill] sm:$0xff]  ;;  %v6580_v55 = vld [vmem:[#allocation62_spill] sm:$0xff] }
 0x638   : > { %v1474_v30 = vpop.xlane.xlu1 %1473  ;;  %v1339_v46 = vpop.xlane.xlu0 %1338  ;;  %v1590_v50 = vsel %vm836_vm0, %v5788_v62, -inf  ;;  %v5797_v31 = vsel %vm1527_vm14, %v5025_v16, -inf }
 0x639   : > { %vm1514_vm8 = vcmp.eq.s32.totalorder %v5067_v45, %v1358_v51  ;;  %vm1519_vm1 = vcmp.eq.s32.totalorder %v5067_v45, %v1433_v56  ;;  %v1475_v54 = vcvt.f32.s32 %v1474_v30  ;;  %v1340_v35 = vcvt.f32.s32 %v1339_v46  ;;  %1591 = vmax.xlane.f32.xlu1 %v1590_v50  ;;  %v6581_v51 = vld [vmem:[#allocation68_spill] sm:$0xff]  ;;  %v6584_v46 = vld [vmem:[#allocation69_spill] sm:$0xff]  ;;  %v6586_v50 = vld [vmem:[#allocation63_spill] sm:$0xff] }
 0x63a   : > { %v1563_v39 = vsel %vm836_vm0, %v5797_v31, -inf  ;;  %vm1530_vm9 = vmor %vm1162_vm10, %vm1514_vm8 }
 0x63b   : > { %v1478_v40 = vadd.s32 %v1477_v13, %v1475_v54  ;;  %v1343_v16 = vadd.s32 %v1342_v28, %v1340_v35  ;;  %1564 = vmax.xlane.f32.xlu0 %v1563_v39  ;;  %v5808_v11 = vsel %vm1530_vm9, %v5031_v21, -inf  ;;  %vm1535_vm4 = vmor %vm1167_vm11, %vm1519_vm1  ;;  %vm6579_vm1 = vcmp.eq.s32.totalorder %v5067_v45, %v6578_v41  ;;  %v6583_v28 = vld [vmem:[#allocation61_spill] sm:$0xff] }
 0x63c   : > { %v1384_v6 = vpop.xlane.xlu1 %1383  ;;  %v1459_v3 = vpop.xlane.xlu0 %1458  ;;  %v1572_v24 = vsel %vm836_vm0, %v5808_v11, -inf  ;;  %v5817_v61 = vsel %vm1535_vm4, %v5027_v17, -inf  ;;  %vm6582_vm4 = vcmp.eq.s32.totalorder %v5067_v45, %v6581_v51 }
 0x63d   : > { %vm1522_vm10 = vcmp.eq.s32.totalorder %v5067_v45, %v1478_v40  ;;  %vm1513_vm2 = vcmp.eq.s32.totalorder %v5067_v45, %v1343_v16  ;;  %v1385_v21 = vcvt.f32.s32 %v1384_v6  ;;  %v1460_v19 = vcvt.f32.s32 %v1459_v3  ;;  %1573 = vmax.xlane.f32.xlu1 %v1572_v24 }
 0x63e   : > { %v1587_v38 = vsel %vm836_vm0, %v5817_v61, -inf  ;;  %vm1538_vm11 = vmor %vm1170_vm12, %vm1522_vm10 }
 0x63f   : > { %v1388_v26 = vadd.s32 %v1387_v53, %v1385_v21  ;;  %v1463_v8 = vadd.s32 %v1462_v34, %v1460_v19  ;;  %1588 = vmax.xlane.f32.xlu0 %v1587_v38  ;;  %v5827_v17 = vsel %vm1538_vm11, %v5039_v27, -inf  ;;  %vm1529_vm5 = vmor %vm1161_vm13, %vm1513_vm2  ;;  %vm6573_vm13 = vcmp.eq.s32.totalorder %v5067_v45, %v6572_v1 }
 0x640   : > { %v1504_v37 = vpop.xlane.xlu1 %1503  ;;  %v1369_v33 = vpop.xlane.xlu0 %1368  ;;  %v1596_v5 = vsel %vm836_vm0, %v5827_v17, -inf  ;;  %v5836_v60 = vsel %vm1529_vm5, %v6571_v7, -inf  ;;  %vm6585_vm11 = vcmp.eq.s32.totalorder %v5067_v45, %v6584_v46 }
 0x641   : > { %vm1516_vm12 = vcmp.eq.s32.totalorder %v5067_v45, %v1388_v26  ;;  %vm1521_vm15 = vcmp.eq.s32.totalorder %v5067_v45, %v1463_v8  ;;  %v1505_v27 = vcvt.f32.s32 %v1504_v37  ;;  %v1370_v32 = vcvt.f32.s32 %v1369_v33  ;;  %1597 = vmax.xlane.f32.xlu1 %v1596_v5 }
 0x642   : > { %v1569_v44 = vsel %vm836_vm0, %v5836_v60, -inf  ;;  %vm1532_vm6 = vmor %vm6573_vm13, %vm1516_vm12 }
 0x643   : > { %v1508_v36 = vadd.s32 %v1507_v2, %v1505_v27  ;;  %v1373_v14 = vadd.s32 %v1372_v9, %v1370_v32  ;;  %1570 = vmax.xlane.f32.xlu0 %v1569_v44  ;;  %v5846_v23 = vsel %vm1532_vm6, %v6574_v12, -inf  ;;  %vm1537_vm7 = vmor %vm6576_vm3, %vm1521_vm15 }
 0x644   : > { %v1489_v25 = vpop.xlane.xlu0 %1488  ;;  %v1578_v57 = vsel %vm836_vm0, %v5846_v23, -inf  ;;  %v5854_v4 = vsel %vm1537_vm7, %v6577_v49, -inf }
 0x645   : > { %vm1524_vm14 = vcmp.eq.s32.totalorder %v5067_v45, %v1508_v36  ;;  %vm1515_vm8 = vcmp.eq.s32.totalorder %v5067_v45, %v1373_v14  ;;  %v1490_v29 = vcvt.f32.s32 %v1489_v25  ;;  %1579 = vmax.xlane.f32.xlu1 %v1578_v57  ;;  %v1593_v52 = vsel %vm836_vm0, %v5854_v4, -inf }
 0x646   : > { %vm1540_vm9 = vmor %vm6579_vm1, %vm1524_vm14 }
 0x647   : > { %v1493_v15 = vadd.s32 %v1492_v47, %v1490_v29  ;;  %1594 = vmax.xlane.f32.xlu0 %v1593_v52  ;;  %v5864_v13 = vsel %vm1540_vm9, %v6580_v55, -inf  ;;  %vm1531_vm10 = vmor %vm6582_vm4, %vm1515_vm8 }
 0x648   : > { %v1602_v56 = vsel %vm836_vm0, %v5864_v13, -inf  ;;  %v5872_v48 = vsel %vm1531_vm10, %v6583_v28, -inf }
 0x649   : > { %vm1523_vm2 = vcmp.eq.s32.totalorder %v5067_v45, %v1493_v15  ;;  %1603 = vmax.xlane.f32.xlu1 %v1602_v56  ;;  %v1575_v30 = vsel %vm836_vm0, %v5872_v48, -inf }
 0x64a   : > { %vm1539_vm5 = vmor %vm6585_vm11, %vm1523_vm2 }
 0x64b   : > { %1576 = vmax.xlane.f32.xlu0 %v1575_v30  ;;  %v5881_v54 = vsel %vm1539_vm5, %v6586_v50, -inf }
 0x64c   : > { %v1599_v35 = vsel %vm836_vm0, %v5881_v54, -inf }
 0x64f   : > { %1600 = vmax.xlane.f32.xlu0 %v1599_v35 }
 0x6ba   : > { %v1562_v53 = vpop.xlane.xlu1 %1561 }
 0x6bb   : > { %v1606_v39 = vsub.f32 %v5736_v63, %v1562_v53 }
 0x6bd   : > { %v1623_v22 = vmul.f32 1.442695, %v1606_v39 }
 0x6be   : > { %v1586_v40 = vpop.xlane.xlu1 %1585 }
 0x6bf   : > { %3811 = vpow2.f32 %v1623_v22  ;;  %v1614_v16 = vsub.f32 %v5748_v18, %v1586_v40 }
 0x6c0   : > { %v1559_v34 = vpop.xlane.xlu0 %1558 }
 0x6c1   : > { %v1639_v42 = vmul.f32 1.442695, %v1614_v16  ;;  %v1605_v45 = vsub.f32 %v5757_v10, %v1559_v34 }
 0x6c2   : > { %v1568_v6 = vpop.xlane.xlu1 %1567 }
 0x6c3   : > { %3813 = vpow2.f32 %v1639_v42  ;;  %v1621_v3 = vmul.f32 1.442695, %v1605_v45  ;;  %v1608_v24 = vsub.f32 %v5768_v0, %v1568_v6 }
 0x6c4   : > { %v1583_v21 = vpop.xlane.xlu0 %1582 }
 0x6c5   : > { %3815 = vpow2.f32 %v1621_v3  ;;  %v1627_v19 = vmul.f32 1.442695, %v1608_v24  ;;  %v1613_v38 = vsub.f32 %v5777_v20, %v1583_v21 }
 0x6c6   : > { %v1592_v63 = vpop.xlane.xlu1 %1591 }
 0x6c7   : > { %3817 = vpow2.f32 %v1627_v19  ;;  %v1637_v2 = vmul.f32 1.442695, %v1613_v38  ;;  %v1616_v26 = vsub.f32 %v5788_v62, %v1592_v63 }
 0x6c8   : > { %v1565_v18 = vpop.xlane.xlu0 %1564 }
 0x6c9   : > { %v5891_v8 = vpop.eup %3811  ;;  %3819 = vpow2.f32 %v1637_v2  ;;  %v1643_v10 = vmul.f32 1.442695, %v1616_v26  ;;  %v1607_v43 = vsub.f32 %v5797_v31, %v1565_v18  ;;  %v4352_v26 = vmov 0.0  }
 0x6ca   : > { %v1574_v9 = vpop.xlane.xlu1 %1573  ;;  %v1656_v0 = vsel %vm836_vm0, %v5891_v8, 0.0  ;;  %1749 = vst [vmem:[#allocation2] sm:$0xff] %v4352_v26  ;;  %1750 = vst [vmem:[#allocation2 + $0x8] sm:$0xff] %v4352_v26 }
 0x6cb   : > { %3821 = vpow2.f32 %v1643_v10  ;;  %v1625_v58 = vmul.f32 1.442695, %v1607_v43  ;;  %v1610_v20 = vsub.f32 %v5808_v11, %v1574_v9  ;;  %1657 = vadd.xlane.f32.xlu1 %v1656_v0  ;;  %1751 = vst [vmem:[#allocation2 + $0x10] sm:$0xff] %v4352_v26  ;;  %1752 = vst [vmem:[#allocation2 + $0x18] sm:$0xff] %v4352_v26 }
 0x6cc   : > { %v1589_v37 = vpop.xlane.xlu0 %1588  ;;  %1753 = vst [vmem:[#allocation2 + $0x20] sm:$0xff] %v4352_v26  ;;  %1754 = vst [vmem:[#allocation2 + $0x28] sm:$0xff] %v4352_v26 }
 0x6cd   : > { %v5897_v33 = vpop.eup %3813  ;;  %3823 = vpow2.f32 %v1625_v58  ;;  %v1631_v62 = vmul.f32 1.442695, %v1610_v20  ;;  %v1615_v5 = vsub.f32 %v5817_v61, %v1589_v37  ;;  %1755 = vst [vmem:[#allocation2 + $0x30] sm:$0xff] %v4352_v26  ;;  %1756 = vst [vmem:[#allocation2 + $0x38] sm:$0xff] %v4352_v26 }
 0x6ce   : > { %v1598_v7 = vpop.xlane.xlu1 %1597  ;;  %v1680_v31 = vsel %vm836_vm0, %v5897_v33, 0.0  ;;  %1757 = vst [vmem:[#allocation2 + $0x40] sm:$0xff] %v4352_v26  ;;  %1758 = vst [vmem:[#allocation2 + $0x48] sm:$0xff] %v4352_v26 }
 0x6cf   : > { %v5902_v27 = vpop.eup %3815  ;;  %3825 = vpow2.f32 %v1631_v62  ;;  %v1641_v32 = vmul.f32 1.442695, %v1615_v5  ;;  %v1618_v44 = vsub.f32 %v5827_v17, %v1598_v7  ;;  %1681 = vadd.xlane.f32.xlu1 %v1680_v31  ;;  %1759 = vst [vmem:[#allocation2 + $0x50] sm:$0xff] %v4352_v26  ;;  %1760 = vst [vmem:[#allocation2 + $0x58] sm:$0xff] %v4352_v26 }
 0x6d0   : > { %v1571_v11 = vpop.xlane.xlu0 %1570  ;;  %v1653_v1 = vsel %vm836_vm0, %v5902_v27, 0.0  ;;  %1761 = vst [vmem:[#allocation2 + $0x60] sm:$0xff] %v4352_v26  ;;  %1762 = vst [vmem:[#allocation2 + $0x68] sm:$0xff] %v4352_v26 }
 0x6d1   : > { %v5907_v36 = vpop.eup %3817  ;;  %3827 = vpow2.f32 %v1641_v32  ;;  %v1647_v14 = vmul.f32 1.442695, %v1618_v44  ;;  %v1609_v61 = vsub.f32 %v5836_v60, %v1571_v11  ;;  %1654 = vadd.xlane.f32.xlu0 %v1653_v1  ;;  %1763 = vst [vmem:[#allocation2 + $0x70] sm:$0xff] %v4352_v26  ;;  %1764 = vst [vmem:[#allocation2 + $0x78] sm:$0xff] %v4352_v26 }
 0x6d2   : > { %v1580_v12 = vpop.xlane.xlu1 %1579  ;;  %v1662_v59 = vsel %vm836_vm0, %v5907_v36, 0.0 }
 0x6d3   : > { %v5912_v47 = vpop.eup %3819  ;;  %3829 = vpow2.f32 %v1647_v14  ;;  %v1629_v17 = vmul.f32 1.442695, %v1609_v61  ;;  %v1612_v25 = vsub.f32 %v5846_v23, %v1580_v12  ;;  %1663 = vadd.xlane.f32.xlu1 %v1662_v59 }
 0x6d4   : > { %v1595_v57 = vpop.xlane.xlu0 %1594  ;;  %v1677_v49 = vsel %vm836_vm0, %v5912_v47, 0.0 }
 0x6d5   : > { %v5917_v29 = vpop.eup %3821  ;;  %3831 = vpow2.f32 %v1629_v17  ;;  %v1635_v60 = vmul.f32 1.442695, %v1612_v25  ;;  %v1617_v52 = vsub.f32 %v5854_v4, %v1595_v57  ;;  %1678 = vadd.xlane.f32.xlu0 %v1677_v49 }
 0x6d6   : > { %v1604_v41 = vpop.xlane.xlu1 %1603  ;;  %v1686_v15 = vsel %vm836_vm0, %v5917_v29, 0.0 }
 0x6d7   : > { %v5922_v55 = vpop.eup %3823  ;;  %3833 = vpow2.f32 %v1635_v60  ;;  %v1645_v23 = vmul.f32 1.442695, %v1617_v52  ;;  %v1620_v51 = vsub.f32 %v5864_v13, %v1604_v41  ;;  %1687 = vadd.xlane.f32.xlu1 %v1686_v15 }
 0x6d8   : > { %v1577_v56 = vpop.xlane.xlu0 %1576  ;;  %v1659_v28 = vsel %vm836_vm0, %v5922_v55, 0.0 }
 0x6d9   : > { %v5927_v30 = vpop.eup %3825  ;;  %3835 = vpow2.f32 %v1645_v23  ;;  %v1651_v4 = vmul.f32 1.442695, %v1620_v51  ;;  %v1611_v46 = vsub.f32 %v5872_v48, %v1577_v56  ;;  %1660 = vadd.xlane.f32.xlu0 %v1659_v28 }
 0x6da   : > { %v1668_v50 = vsel %vm836_vm0, %v5927_v30, 0.0 }
 0x6db   : > { %v5932_v35 = vpop.eup %3827  ;;  %3837 = vpow2.f32 %v1651_v4  ;;  %v1633_v53 = vmul.f32 1.442695, %v1611_v46  ;;  %1669 = vadd.xlane.f32.xlu1 %v1668_v50 }
 0x6dc   : > { %v1601_v13 = vpop.xlane.xlu0 %1600  ;;  %v1683_v39 = vsel %vm836_vm0, %v5932_v35, 0.0 }
 0x6dd   : > { %v5936_v22 = vpop.eup %3829  ;;  %3839 = vpow2.f32 %v1633_v53  ;;  %v1619_v40 = vsub.f32 %v5881_v54, %v1601_v13  ;;  %1684 = vadd.xlane.f32.xlu0 %v1683_v39 }
 0x6de   : > { %v1692_v48 = vsel %vm836_vm0, %v5936_v22, 0.0 }
 0x6df   : > { %v5941_v16 = vpop.eup %3831  ;;  %v1649_v34 = vmul.f32 1.442695, %v1619_v40  ;;  %1693 = vadd.xlane.f32.xlu1 %v1692_v48 }
 0x6e0   : > { %v1665_v42 = vsel %vm836_vm0, %v5941_v16, 0.0 }
 0x6e1   : > { %v5945_v45 = vpop.eup %3833  ;;  %3841 = vpow2.f32 %v1649_v34  ;;  %1666 = vadd.xlane.f32.xlu0 %v1665_v42 }
 0x6e2   : > { %v1674_v6 = vsel %vm836_vm0, %v5945_v45, 0.0 }
 0x6e3   : > { %v5949_v3 = vpop.eup %3835  ;;  %1675 = vadd.xlane.f32.xlu1 %v1674_v6 }
 0x6e4   : > { %v1689_v54 = vsel %vm836_vm0, %v5949_v3, 0.0 }
 0x6e5   : > { %v5953_v24 = vpop.eup %3837  ;;  %1690 = vadd.xlane.f32.xlu0 %v1689_v54 }
 0x6e6   : > { %v1698_v21 = vsel %vm836_vm0, %v5953_v24, 0.0 }
 0x6e7   : > { %v5957_v19 = vpop.eup %3839  ;;  %1699 = vadd.xlane.f32.xlu1 %v1698_v21 }
 0x6e8   : > { %v1671_v38 = vsel %vm836_vm0, %v5957_v19, 0.0 }
 0x6e9   : > { %1672 = vadd.xlane.f32.xlu0 %v1671_v38 }
 0x6eb   : > { %v5961_v63 = vpop.eup %3841 }
 0x6ec   : > { %v1695_v2 = vsel %vm836_vm0, %v5961_v63, 0.0 }
 0x6ed   : > { %1696 = vadd.xlane.f32.xlu0 %v1695_v2 }
 0x758   : > { %v1658_v18 = vpop.xlane.xlu1 %1657 }
 0x759   : > { %3843 = vrcp.f32 %v1658_v18 }
 0x75c   : > { %v1682_v10 = vpop.xlane.xlu1 %1681 }
 0x75d   : > { %3845 = vrcp.f32 %v1682_v10 }
 0x75e   : > { %v1655_v43 = vpop.xlane.xlu0 %1654 }
 0x75f   : > { %3847 = vrcp.f32 %v1655_v43 }
 0x760   : > { %v1664_v9 = vpop.xlane.xlu1 %1663 }
 0x761   : > { %3849 = vrcp.f32 %v1664_v9 }
 0x762   : > { %v1679_v0 = vpop.xlane.xlu0 %1678 }
 0x763   : > { %v3844_v58 = vpop.eup %3843  ;;  %3851 = vrcp.f32 %v1679_v0 }
 0x764   : > { %v1704_v20 = vmul.f32 %v3844_v58, %v5891_v8  ;;  %v1688_v37 = vpop.xlane.xlu1 %1687 }
 0x765   : > { %3853 = vrcp.f32 %v1688_v37 }
 0x766   : > { %1734 = vst.msk [vmem:[#allocation3 + $0x8] sm:$0xff] %vm836_vm0, %v1704_v20  ;;  %v1661_v62 = vpop.xlane.xlu0 %1660 }
 0x767   : > { %v3846_v5 = vpop.eup %3845  ;;  %3855 = vrcp.f32 %v1661_v62 }
 0x768   : > { %v1720_v7 = vmul.f32 %v3846_v5, %v5897_v33  ;;  %v1670_v31 = vpop.xlane.xlu1 %1669 }
 0x769   : > { %v3848_v32 = vpop.eup %3847  ;;  %3857 = vrcp.f32 %v1670_v31 }
 0x76a   : > { %1742 = vst.msk [vmem:[#allocation3 + $0x48] sm:$0xff] %vm836_vm0, %v1720_v7  ;;  %v1702_v44 = vmul.f32 %v3848_v32, %v5902_v27  ;;  %v1685_v11 = vpop.xlane.xlu0 %1684 }
 0x76b   : > { %v3850_v1 = vpop.eup %3849  ;;  %3859 = vrcp.f32 %v1685_v11 }
 0x76c   : > { %1733 = vst.msk [vmem:[#allocation3] sm:$0xff] %vm836_vm0, %v1702_v44  ;;  %v1708_v8 = vmul.f32 %v3850_v1, %v5907_v36  ;;  %v1694_v14 = vpop.xlane.xlu1 %1693 }
 0x76d   : > { %v3852_v61 = vpop.eup %3851  ;;  %3861 = vrcp.f32 %v1694_v14 }
 0x76e   : > { %1736 = vst.msk [vmem:[#allocation3 + $0x18] sm:$0xff] %vm836_vm0, %v1708_v8  ;;  %v1718_v33 = vmul.f32 %v3852_v61, %v5912_v47  ;;  %v1667_v12 = vpop.xlane.xlu0 %1666 }
 0x76f   : > { %v3854_v59 = vpop.eup %3853  ;;  %3863 = vrcp.f32 %v1667_v12 }
 0x770   : > { %1741 = vst.msk [vmem:[#allocation3 + $0x40] sm:$0xff] %vm836_vm0, %v1718_v33  ;;  %v1724_v27 = vmul.f32 %v3854_v59, %v5917_v29  ;;  %v1676_v17 = vpop.xlane.xlu1 %1675 }
 0x771   : > { %v3856_v25 = vpop.eup %3855  ;;  %3865 = vrcp.f32 %v1676_v17 }
 0x772   : > { %1744 = vst.msk [vmem:[#allocation3 + $0x58] sm:$0xff] %vm836_vm0, %v1724_v27  ;;  %v1706_v36 = vmul.f32 %v3856_v25, %v5922_v55  ;;  %v1691_v57 = vpop.xlane.xlu0 %1690 }
 0x773   : > { %v3858_v49 = vpop.eup %3857  ;;  %3867 = vrcp.f32 %v1691_v57 }
 0x774   : > { %1735 = vst.msk [vmem:[#allocation3 + $0x10] sm:$0xff] %vm836_vm0, %v1706_v36  ;;  %v1712_v47 = vmul.f32 %v3858_v49, %v5927_v30  ;;  %v1700_v60 = vpop.xlane.xlu1 %1699 }
 0x775   : > { %v3860_v52 = vpop.eup %3859  ;;  %3869 = vrcp.f32 %v1700_v60 }
 0x776   : > { %1738 = vst.msk [vmem:[#allocation3 + $0x28] sm:$0xff] %vm836_vm0, %v1712_v47  ;;  %v1722_v29 = vmul.f32 %v3860_v52, %v5932_v35  ;;  %v1673_v41 = vpop.xlane.xlu0 %1672 }
 0x777   : > { %v3862_v15 = vpop.eup %3861  ;;  %3871 = vrcp.f32 %v1673_v41 }
 0x778   : > { %1743 = vst.msk [vmem:[#allocation3 + $0x50] sm:$0xff] %vm836_vm0, %v1722_v29  ;;  %v1728_v55 = vmul.f32 %v3862_v15, %v5936_v22 }
 0x779   : > { %v3864_v23 = vpop.eup %3863 }
 0x77a   : > { %1746 = vst.msk [vmem:[#allocation3 + $0x68] sm:$0xff] %vm836_vm0, %v1728_v55  ;;  %v1710_v51 = vmul.f32 %v3864_v23, %v5941_v16  ;;  %v1697_v56 = vpop.xlane.xlu0 %1696 }
 0x77b   : > { %v3866_v28 = vpop.eup %3865  ;;  %3873 = vrcp.f32 %v1697_v56 }
 0x77c   : > { %1737 = vst.msk [vmem:[#allocation3 + $0x20] sm:$0xff] %vm836_vm0, %v1710_v51  ;;  %v1716_v30 = vmul.f32 %v3866_v28, %v5945_v45 }
 0x77d   : > { %v3868_v4 = vpop.eup %3867 }
 0x77e   : > { %1740 = vst.msk [vmem:[#allocation3 + $0x38] sm:$0xff] %vm836_vm0, %v1716_v30  ;;  %v1726_v46 = vmul.f32 %v3868_v4, %v5949_v3 }
 0x77f   : > { %v3870_v50 = vpop.eup %3869 }
 0x780   : > { %1745 = vst.msk [vmem:[#allocation3 + $0x60] sm:$0xff] %vm836_vm0, %v1726_v46  ;;  %v1732_v35 = vmul.f32 %v3870_v50, %v5953_v24 }
 0x781   : > { %v3872_v53 = vpop.eup %3871 }
 0x782   : > { %1748 = vst.msk [vmem:[#allocation3 + $0x78] sm:$0xff] %vm836_vm0, %v1732_v35  ;;  %v1714_v13 = vmul.f32 %v3872_v53, %v5957_v19 }
 0x784   : > { %1739 = vst.msk [vmem:[#allocation3 + $0x30] sm:$0xff] %vm836_vm0, %v1714_v13 }
 0x785   : > { %v3874_v39 = vpop.eup %3873 }
 0x786   : > { %v1730_v22 = vmul.f32 %v3874_v39, %v5961_v63 }
 0x788   : > { %1747 = vst.msk [vmem:[#allocation3 + $0x70] sm:$0xff] %vm836_vm0, %v1730_v22 }
 0x789 PF: > { %v1766_v40 = vld [vmem:[%s4910_s18 + $0x8] sm:$0xff]  ;;  %v1768_v48 = vld [vmem:[%s4910_s18 + $0x18] sm:$0xff]  ;;  %v1765_v16 = vld [vmem:[%s4910_s18] sm:$0xff]  ;;  %v4353_v3 = vmov 0.0   ;;  %s6603_s12 = sld [smem:[#allocation34_spill]]  ;;  %vm2224_vm12 = vcmask 31744  }
 0x78a   : > { %v3475_v34 = vpack.c.bf16 %v1768_v48, %v1766_v40  ;;  %v1767_v42 = vld [vmem:[%s4910_s18 + $0x10] sm:$0xff]  ;;  %v1770_v45 = vld [vmem:[%s4910_s18 + $0x28] sm:$0xff]  ;;  %v1772_v6 = vld [vmem:[%s4910_s18 + $0x38] sm:$0xff]  ;;  %1873 = vmatprep.mubr.f32.mxu0 %v4353_v3 }
 0x78b   : > { %v3477_v54 = vpack.c.bf16 %v1767_v42, %v1765_v16  ;;  %v3479_v24 = vpack.c.bf16 %v1772_v6, %v1770_v45  ;;  %v1769_v21 = vld [vmem:[%s4910_s18 + $0x20] sm:$0xff]  ;;  %v1771_v19 = vld [vmem:[%s4910_s18 + $0x30] sm:$0xff]  ;;  %v1774_v38 = vld [vmem:[%s4910_s18 + $0x48] sm:$0xff] }
 0x78c   : > { %3476 = vmatprep.subr.bf16.mxu0 %v3475_v34  ;;  %v1776_v63 = vld [vmem:[%s4910_s18 + $0x58] sm:$0xff]  ;;  %v3481_v2 = vpack.c.bf16 %v1771_v19, %v1769_v21  ;;  %v1773_v18 = vld [vmem:[%s4910_s18 + $0x40] sm:$0xff]  ;;  %v1775_v10 = vld [vmem:[%s4910_s18 + $0x50] sm:$0xff] }
 0x78d   : > { %3478 = vmatpush1.bf16.msra.mxu0 %v3477_v54  ;;  %v3483_v26 = vpack.c.bf16 %v1776_v63, %v1774_v38  ;;  %v1778_v43 = vld [vmem:[%s4910_s18 + $0x68] sm:$0xff]  ;;  %v1780_v9 = vld [vmem:[%s4910_s18 + $0x78] sm:$0xff]  ;;  %v3485_v0 = vpack.c.bf16 %v1775_v10, %v1773_v18  ;;  %v1777_v20 = vld [vmem:[%s4910_s18 + $0x60] sm:$0xff] }
 0x78e   : > { %3480 = vmatprep.subr.bf16.mxu0 %v3479_v24  ;;  %v3487_v58 = vpack.c.bf16 %v1780_v9, %v1778_v43  ;;  %v1779_v37 = vld [vmem:[%s4910_s18 + $0x70] sm:$0xff]  ;;  %v1782_v62 = vld [vmem:[%s4910_s18 + $0x88] sm:$0xff]  ;;  %v1784_v5 = vld [vmem:[%s4910_s18 + $0x98] sm:$0xff] }
 0x78f   : > { %v2018_v7 = vld [vmem:[%s4919_s8 + $0x80] sm:$0xff]  ;;  %v1783_v32 = vld [vmem:[%s4910_s18 + $0x90] sm:$0xff]  ;;  %v3489_v8 = vpack.c.bf16 %v1779_v37, %v1777_v20  ;;  %v2021_v12 = vld [vmem:[%s4919_s8 + $0x98] sm:$0xff]  ;;  %v3491_v27 = vpack.c.bf16 %v1784_v5, %v1782_v62  ;;  %p3183_p4 = scmp.ne.s32.totalorder %s6603_s12, 3 }
 0x790   : > { %v1781_v31 = vld [vmem:[%s4910_s18 + $0x80] sm:$0xff]  ;;  %v2019_v44 = vld [vmem:[%s4919_s8 + $0x88] sm:$0xff]  ;;  %v2020_v33 = vld [vmem:[%s4919_s8 + $0x90] sm:$0xff] }
 0x791   : > { %3482 = vmatpush1.bf16.msra.mxu0 %v3481_v2  ;;  %v2002_v11 = vld [vmem:[%s4919_s8] sm:$0xff]  ;;  %v2003_v1 = vld [vmem:[%s4919_s8 + $0x8] sm:$0xff]  ;;  %v3507_v14 = vpack.c.bf16 %v2019_v44, %v2018_v7  ;;  %v2004_v59 = vld [vmem:[%s4919_s8 + $0x10] sm:$0xff]  ;;  %v3511_v17 = vpack.c.bf16 %v2021_v12, %v2020_v33  ;;  %v3493_v52 = vpack.c.bf16 %v1783_v32, %v1781_v31 }
 0x792   : > { %3484 = vmatprep.subr.bf16.mxu0 %v3483_v26  ;;  %v3509_v61 = vpack.c.bf16 %v2003_v1, %v2002_v11  ;;  %v2005_v25 = vld [vmem:[%s4919_s8 + $0x18] sm:$0xff]  ;;  %v2022_v36 = vld [vmem:[%s4919_s8 + $0xa0] sm:$0xff]  ;;  %v2023_v57 = vld [vmem:[%s4919_s8 + $0xa8] sm:$0xff] }
 0x793   : > { %v1786_v49 = vld [vmem:[%s4910_s18 + $0xa8] sm:$0xff]  ;;  %v1788_v47 = vld [vmem:[%s4910_s18 + $0xb8] sm:$0xff]  ;;  %3508 = vmatprep.subr.bf16.mxu1 %v3507_v14  ;;  %v3513_v60 = vpack.c.bf16 %v2005_v25, %v2004_v59  ;;  %v1785_v29 = vld [vmem:[%s4910_s18 + $0xa0] sm:$0xff]  ;;  %v3515_v41 = vpack.c.bf16 %v2023_v57, %v2022_v36 }
 0x794   : > { %3510 = vmatpush3.bf16.msra.mxu1 %v3509_v61  ;;  %v2006_v15 = vld [vmem:[%s4919_s8 + $0x20] sm:$0xff]  ;;  %v2007_v55 = vld [vmem:[%s4919_s8 + $0x28] sm:$0xff]  ;;  %v3495_v23 = vpack.c.bf16 %v1788_v47, %v1786_v49  ;;  %v2024_v56 = vld [vmem:[%s4919_s8 + $0xb0] sm:$0xff] }
 0x795   : > { %3486 = vmatpush1.bf16.msra.mxu0 %v3485_v0  ;;  %3512 = vmatprep.subr.bf16.mxu1 %v3511_v17  ;;  %v1787_v51 = vld [vmem:[%s4910_s18 + $0xb0] sm:$0xff]  ;;  %v2025_v28 = vld [vmem:[%s4919_s8 + $0xb8] sm:$0xff]  ;;  %v1790_v30 = vld [vmem:[%s4910_s18 + $0xc8] sm:$0xff]  ;;  %v3517_v46 = vpack.c.bf16 %v2007_v55, %v2006_v15  ;;  %v1799_v55 = vlaneseq }
 0x796   : > { %3488 = vmatprep.subr.bf16.mxu0 %v3487_v58  ;;  %v1792_v4 = vld [vmem:[%s4910_s18 + $0xd8] sm:$0xff]  ;;  %v3497_v50 = vpack.c.bf16 %v1787_v51, %v1785_v29  ;;  %v1789_v35 = vld [vmem:[%s4910_s18 + $0xc0] sm:$0xff]  ;;  %v3519_v53 = vpack.c.bf16 %v2025_v28, %v2024_v56  ;;  %v1791_v40 = vld [vmem:[%s4910_s18 + $0xd0] sm:$0xff]  ;;  %v2204_v56 = vstv %s6603_s12 }
 0x797   : > { %v2008_v13 = vld [vmem:[%s4919_s8 + $0x30] sm:$0xff]  ;;  %v2009_v39 = vld [vmem:[%s4919_s8 + $0x38] sm:$0xff]  ;;  %v3499_v22 = vpack.c.bf16 %v1792_v4, %v1790_v30  ;;  %v2026_v48 = vld [vmem:[%s4919_s8 + $0xc0] sm:$0xff]  ;;  %v3501_v6 = vpack.c.bf16 %v1791_v40, %v1789_v35 }
 0x798   : > { %3514 = vmatpush3.bf16.msra.mxu1 %v3513_v60  ;;  %v2027_v16 = vld [vmem:[%s4919_s8 + $0xc8] sm:$0xff]  ;;  %v1796_v42 = vld [vmem:[%s4910_s18 + $0xf8] sm:$0xff]  ;;  %v3521_v45 = vpack.c.bf16 %v2009_v39, %v2008_v13  ;;  %v1793_v54 = vld [vmem:[%s4910_s18 + $0xe0] sm:$0xff] }
 0x799   : > { %3490 = vmatpush1.bf16.msra.mxu0 %v3489_v8  ;;  %3516 = vmatprep.subr.bf16.mxu1 %v3515_v41  ;;  %v1794_v34 = vld [vmem:[%s4910_s18 + $0xe8] sm:$0xff]  ;;  %v3523_v24 = vpack.c.bf16 %v2027_v16, %v2026_v48  ;;  %v1795_v63 = vld [vmem:[%s4910_s18 + $0xf0] sm:$0xff]  ;;  %v2029_v26 = vld [vmem:[%s4919_s8 + $0xd8] sm:$0xff] }
 0x79a   : > { %3492 = vmatprep.subr.bf16.mxu0 %v3491_v27  ;;  %v2010_v21 = vld [vmem:[%s4919_s8 + $0x40] sm:$0xff]  ;;  %v2011_v19 = vld [vmem:[%s4919_s8 + $0x48] sm:$0xff]  ;;  %v3503_v38 = vpack.c.bf16 %v1796_v42, %v1794_v34  ;;  %v2028_v2 = vld [vmem:[%s4919_s8 + $0xd0] sm:$0xff]  ;;  %v3505_v10 = vpack.c.bf16 %v1795_v63, %v1793_v54 }
 0x79b   : > { %v3525_v18 = vpack.c.bf16 %v2011_v19, %v2010_v21  ;;  %v3527_v43 = vpack.c.bf16 %v2029_v26, %v2028_v2  ;;  %v2012_v9 = vld [vmem:[%s4919_s8 + $0x50] sm:$0xff]  ;;  %v2013_v0 = vld [vmem:[%s4919_s8 + $0x58] sm:$0xff]  ;;  %v2030_v58 = vld [vmem:[%s4919_s8 + $0xe0] sm:$0xff] }
 0x79c   : > { %3518 = vmatpush3.bf16.msra.mxu1 %v3517_v46  ;;  %v2031_v20 = vld [vmem:[%s4919_s8 + $0xe8] sm:$0xff]  ;;  %v3529_v37 = vpack.c.bf16 %v2013_v0, %v2012_v9  ;;  %v6589_v31 = vld [vmem:[#allocation44_spill] sm:$0xff]  ;;  %v6590_v32 = vld [vmem:[#allocation45_spill] sm:$0xff] }
 0x79d   : > { %3494 = vmatpush1.bf16.msra.mxu0 %v3493_v52  ;;  %3520 = vmatprep.subr.bf16.mxu1 %v3519_v53  ;;  %v3531_v62 = vpack.c.bf16 %v2031_v20, %v2030_v58  ;;  %v6587_v5 = vld [vmem:[#allocation42_spill] sm:$0xff]  ;;  %v6588_v7 = vld [vmem:[#allocation43_spill] sm:$0xff]  ;;  %v6593_v1 = vld [vmem:[#allocation48_spill] sm:$0xff] }
 0x79e   : > { %3496 = vmatprep.subr.bf16.mxu0 %v3495_v23  ;;  %v6591_v44 = vld [vmem:[#allocation46_spill] sm:$0xff]  ;;  %v6592_v11 = vld [vmem:[#allocation47_spill] sm:$0xff]  ;;  %v6594_v8 = vld [vmem:[#allocation49_spill] sm:$0xff]  ;;  %v2187_v23 = vand.u32 127, %v1799_v55 }
 0x79f   : > { %v6595_v14 = vld [vmem:[#allocation50_spill] sm:$0xff]  ;;  %v6596_v61 = vld [vmem:[#allocation51_spill] sm:$0xff]  ;;  %v6597_v33 = vld [vmem:[#allocation52_spill] sm:$0xff] }
 0x7a0   : > { %3522 = vmatpush3.bf16.msra.mxu1 %v3521_v45  ;;  %v6598_v12 = vld [vmem:[#allocation53_spill] sm:$0xff]  ;;  %v6599_v59 = vld [vmem:[#allocation54_spill] sm:$0xff]  ;;  %v6600_v27 = vld [vmem:[#allocation55_spill] sm:$0xff]  ;;  %vm2205_vm0 = vcmp.eq.s32.totalorder %v2187_v23, %v2204_v56 }
 0x7a1   : > { %3498 = vmatpush1.bf16.msra.mxu0 %v3497_v50  ;;  %3524 = vmatprep.subr.bf16.mxu1 %v3523_v24  ;;  %v6601_v17 = vld [vmem:[#allocation56_spill] sm:$0xff]  ;;  %v6602_v25 = vld [vmem:[#allocation57_spill] sm:$0xff]  ;;  %v2015_v57 = vld [vmem:[%s4919_s8 + $0x68] sm:$0xff]  ;;  %v3182_v46 = vsel %vm2205_vm0, 1.0, %v4353_v3 }
 0x7a2   : > { %3500 = vmatprep.subr.bf16.mxu0 %v3499_v22  ;;  %v2014_v36 = vld [vmem:[%s4919_s8 + $0x60] sm:$0xff]  ;;  %v2032_v47 = vld [vmem:[%s4919_s8 + $0xf0] sm:$0xff]  ;;  %v2033_v60 = vld [vmem:[%s4919_s8 + $0xf8] sm:$0xff] }
 0x7a3   : > { %v3533_v49 = vpack.c.bf16 %v2015_v57, %v2014_v36  ;;  %v3535_v52 = vpack.c.bf16 %v2033_v60, %v2032_v47  ;;  %v2016_v29 = vld [vmem:[%s4919_s8 + $0x70] sm:$0xff]  ;;  %v2017_v41 = vld [vmem:[%s4919_s8 + $0x78] sm:$0xff]  ;;  %v2189_v28 = vld [vmem:[#allocation3 + $0x8] sm:$0xff] }
 0x7a4   : > { %3526 = vmatpush3.bf16.msra.mxu1 %v3525_v18  ;;  %v3537_v15 = vpack.c.bf16 %v2017_v41, %v2016_v29  ;;  %v2188_v51 = vld [vmem:[#allocation3] sm:$0xff]  ;;  %v2190_v30 = vld [vmem:[#allocation3 + $0x10] sm:$0xff]  ;;  %v2191_v4 = vld [vmem:[#allocation3 + $0x18] sm:$0xff]  ;;  %v2209_v35 = vmul.f32 %v3182_v46, %v2189_v28 }
 0x7a5   : > { %3502 = vmatpush1.bf16.msra.mxu0 %v3501_v6  ;;  %3528 = vmatprep.subr.bf16.mxu1 %v3527_v43  ;;  %v2208_v50 = vmul.f32 %v3182_v46, %v2188_v51  ;;  %v2210_v53 = vmul.f32 %v3182_v46, %v2190_v30  ;;  %v2211_v13 = vmul.f32 %v3182_v46, %v2191_v4  ;;  %v2192_v39 = vld [vmem:[#allocation3 + $0x20] sm:$0xff]  ;;  %v2193_v22 = vld [vmem:[#allocation3 + $0x28] sm:$0xff]  ;;  %v2195_v6 = vld [vmem:[#allocation3 + $0x38] sm:$0xff] }
 0x7a6   : > { %3504 = vmatprep.subr.bf16.mxu0 %v3503_v38  ;;  %v2228_v16 = vsel %vm2224_vm12, %v2209_v35, 0.0  ;;  %v2212_v42 = vmul.f32 %v3182_v46, %v2192_v39  ;;  %v2213_v45 = vmul.f32 %v3182_v46, %v2193_v22  ;;  %v2215_v19 = vmul.f32 %v3182_v46, %v2195_v6  ;;  %v2196_v38 = vld [vmem:[#allocation3 + $0x40] sm:$0xff]  ;;  %v2197_v63 = vld [vmem:[#allocation3 + $0x48] sm:$0xff]  ;;  %v2198_v43 = vld [vmem:[#allocation3 + $0x50] sm:$0xff] }
 0x7a7   : > { %v2225_v40 = vsel %vm2224_vm12, %v2208_v50, 0.0  ;;  %v2231_v48 = vsel %vm2224_vm12, %v2210_v53, 0.0  ;;  %v2234_v34 = vsel %vm2224_vm12, %v2211_v13, 0.0  ;;  %v2216_v18 = vmul.f32 %v3182_v46, %v2196_v38  ;;  %v2199_v9 = vld [vmem:[#allocation3 + $0x58] sm:$0xff] }
 0x7a8   : > { %3530 = vmatpush3.bf16.msra.mxu1 %v3529_v37  ;;  %2226 = vadd.xlane.f32.xlu0 %v2225_v40  ;;  %v2237_v54 = vsel %vm2224_vm12, %v2212_v42, 0.0  ;;  %v2240_v24 = vsel %vm2224_vm12, %v2213_v45, 0.0  ;;  %v2246_v26 = vsel %vm2224_vm12, %v2215_v19, 0.0  ;;  %v2218_v20 = vmul.f32 %v3182_v46, %v2198_v43 }
 0x7a9   : > { %3506 = vmatpush1.bf16.msra.mxu0 %v3505_v10  ;;  %3532 = vmatprep.subr.bf16.mxu1 %v3531_v62  ;;  %v2217_v10 = vmul.f32 %v3182_v46, %v2197_v63  ;;  %v2249_v0 = vsel %vm2224_vm12, %v2216_v18, 0.0  ;;  %v2219_v37 = vmul.f32 %v3182_v46, %v2199_v9  ;;  %v2200_v62 = vld [vmem:[#allocation3 + $0x60] sm:$0xff] }
 0x7aa   : > { %2232 = vadd.xlane.f32.xlu1 %v2231_v48 }
 0x7ab   : > { %v2252_v58 = vsel %vm2224_vm12, %v2217_v10, 0.0 }
 0x7ac   : > { %1874 = vmatmul.mubr.f32.vlgmr.msra.gmra.mrb[0].mxu0 %v6587_v5  ;;  %3534 = vmatpush3.bf16.msra.mxu1 %v3533_v49  ;;  %v2201_v5 = vld [vmem:[#allocation3 + $0x68] sm:$0xff] }
 0x7ad   : > { %1879 = vmatprep.mubr.f32.mxu0 %v4353_v3  ;;  %3536 = vmatprep.subr.bf16.mxu1 %v3535_v52 }
 0x7ae   : > { %2229 = vadd.xlane.f32.xlu0 %v2228_v16  ;;  %2235 = vadd.xlane.f32.xlu1 %v2234_v34 }
 0x7b0   : > { %1880 = vmatmul.mubr.f32.gmra.mrb[2].mxu0 %v6588_v7  ;;  %3538 = vmatpush3.bf16.msra.mxu1 %v3537_v15  ;;  %v2255_v7 = vsel %vm2224_vm12, %v2218_v20, 0.0 }
 0x7b1   : > { %1885 = vmatprep.mubr.f32.mxu0 %v4353_v3 }
 0x7b2   : > { %2238 = vadd.xlane.f32.xlu0 %v2237_v54  ;;  %2241 = vadd.xlane.f32.xlu1 %v2240_v24 }
 0x7b4   : > { %1886 = vmatmul.mubr.f32.gmra.mrb[4].mxu0 %v6589_v31  ;;  %v2258_v31 = vsel %vm2224_vm12, %v2219_v37, 0.0 }
 0x7b5   : > { %1891 = vmatprep.mubr.f32.mxu0 %v4353_v3 }
 0x7b6   : > { %2247 = vadd.xlane.f32.xlu1 %v2246_v26 }
 0x7b8   : > { %1892 = vmatmul.mubr.f32.gmra.mrb[6].mxu0 %v6590_v32  ;;  %v2220_v32 = vmul.f32 %v3182_v46, %v2200_v62 }
 0x7b9   : > { %1897 = vmatprep.mubr.f32.mxu0 %v4353_v3 }
 0x7ba   : > { %2253 = vadd.xlane.f32.xlu1 %v2252_v58 }
 0x7bc   : > { %1898 = vmatmul.mubr.f32.gmra.mrb[8].mxu0 %v6591_v44  ;;  %v2221_v44 = vmul.f32 %v3182_v46, %v2201_v5 }
 0x7bd   : > { %1903 = vmatprep.mubr.f32.mxu0 %v4353_v3 }
 0x7be   : > { %2259 = vadd.xlane.f32.xlu1 %v2258_v31 }
 0x7c0   : > { %1904 = vmatmul.mubr.f32.gmra.mrb[10].mxu0 %v6592_v11  ;;  %v2202_v11 = vld [vmem:[#allocation3 + $0x70] sm:$0xff] }
 0x7c1   : > { %1909 = vmatprep.mubr.f32.mxu0 %v4353_v3 }
 0x7c4   : > { %1910 = vmatmul.mubr.f32.gmra.mrb[12].mxu0 %v6593_v1  ;;  %v2203_v1 = vld [vmem:[#allocation3 + $0x78] sm:$0xff] }
 0x7c5   : > { %1915 = vmatprep.mubr.f32.mxu0 %v4353_v3 }
 0x7c8   : > { %1916 = vmatmul.mubr.f32.gmra.mrb[14].mxu0 %v6594_v8  ;;  %v2261_v8 = vsel %vm2224_vm12, %v2220_v32, 0.0 }
 0x7c9   : > { %1921 = vmatprep.mubr.f32.mxu0 %v4353_v3 }
 0x7cc   : > { %1922 = vmatmul.mubr.f32.gmra.mrb[16].mxu0 %v6595_v14  ;;  %v2264_v14 = vsel %vm2224_vm12, %v2221_v44, 0.0 }
 0x7cd   : > { %1927 = vmatprep.mubr.f32.mxu0 %v4353_v3  ;;  %2265 = vadd.xlane.f32.xlu1 %v2264_v14 }
 0x7d0   : > { %1928 = vmatmul.mubr.f32.gmra.mrb[18].mxu0 %v6596_v61  ;;  %v2222_v61 = vmul.f32 %v3182_v46, %v2202_v11 }
 0x7d1   : > { %1933 = vmatprep.mubr.f32.mxu0 %v4353_v3 }
 0x7d4   : > { %1934 = vmatmul.mubr.f32.gmra.mrb[20].mxu0 %v6597_v33  ;;  %v2223_v33 = vmul.f32 %v3182_v46, %v2203_v1 }
 0x7d5   : > { %1939 = vmatprep.mubr.f32.mxu0 %v4353_v3 }
 0x7d8   : > { %1940 = vmatmul.mubr.f32.gmra.mrb[22].mxu0 %v6598_v12  ;;  %v2267_v12 = vsel %vm2224_vm12, %v2222_v61, 0.0 }
 0x7d9   : > { %1945 = vmatprep.mubr.f32.mxu0 %v4353_v3 }
 0x7dc   : > { %1946 = vmatmul.mubr.f32.gmra.mrb[24].mxu0 %v6599_v59  ;;  %v2270_v59 = vsel %vm2224_vm12, %v2223_v33, 0.0 }
 0x7dd   : > { %1951 = vmatprep.mubr.f32.mxu0 %v4353_v3  ;;  %2271 = vadd.xlane.f32.xlu1 %v2270_v59 }
 0x7e0   : > { %1952 = vmatmul.mubr.f32.gmra.mrb[26].mxu0 %v6600_v27  ;;  %v6113_v27 = vshrl.u32 %v1799_v55, 7 }
 0x7e1   : > { %1957 = vmatprep.mubr.f32.mxu0 %v4353_v3 }
 0x7e2   : > { %v1805_v36 = vsub.s32 1, %v6113_v27 }
 0x7e4   : > { %1958 = vmatmul.mubr.f32.gmra.mrb[28].mxu0 %v6601_v17  ;;  %v1801_v17 = vsub.s32 0, %v6113_v27 }
 0x7e5   : > { %1963 = vmatprep.mubr.f32.mxu0 %v4353_v3  ;;  %v2194_v3 = vld [vmem:[#allocation3 + $0x30] sm:$0xff] }
 0x7e6   : > { %v2214_v21 = vmul.f32 %v3182_v46, %v2194_v3 }
 0x7e8   : > { %1964 = vmatmul.mubr.f32.gmra.mrb[30].mxu0 %v6602_v25  ;;  %v2243_v2 = vsel %vm2224_vm12, %v2214_v21, 0.0  ;;  %v1797_v25 = vld [vmem:[%s4917_s4] sm:$0x3] }
 0x7e9   : > { %2244 = vadd.xlane.f32.xlu0 %v2243_v2  ;;  %v6120_v57 = vrot.slane %v1797_v25, %v1801_v17  ;;  %v6124_v49 = vrot.slane %v1797_v25, %v1805_v36 }
 0x7ed   : > { %2250 = vadd.xlane.f32.xlu0 %v2249_v0 }
 0x7f1   : > { %2256 = vadd.xlane.f32.xlu0 %v2255_v7 }
 0x7f5   : > { %2262 = vadd.xlane.f32.xlu0 %v2261_v8 }
 0x7f9   : > { %2268 = vadd.xlane.f32.xlu0 %v2267_v12 }
 0x87f   : > { %v1875_v47 = vpop.f32.mrb[0].mxu0 }
 0x880   : > { %v1876_v60 = vadd.f32 %v1875_v47, %v6120_v57  ;;  %v1877_v52 = vpop.f32.mrb[1].mxu0 }
 0x881   : > { %v1878_v29 = vadd.f32 %v1877_v52, %v6124_v49 }
 0x882   : > { %v1970_v55 = vmax.f32 %v1876_v60, 0.0 }
 0x883   : > { %v1881_v41 = vpop.f32.mrb[2].mxu0  ;;  %v1971_v15 = vmax.f32 %v1878_v29, 0.0 }
 0x884   : > { %v1882_v23 = vadd.f32 %v1881_v41, %v6120_v57  ;;  %v1883_v51 = vpop.f32.mrb[3].mxu0 }
 0x885   : > { %v1884_v56 = vadd.f32 %v1883_v51, %v6124_v49  ;;  %2105 = vmatprep.mubr.f32.mxu1 %v1971_v15 }
 0x886   : > { %2106 = vmatmul.mubr.f32.vlgmr.msra.gmra.mrb[0].mxu1 %v1970_v55  ;;  %v1972_v4 = vmax.f32 %v1882_v23, 0.0 }
 0x887   : > { %v1973_v28 = vmax.f32 %v1884_v56, 0.0  ;;  %v1887_v30 = vpop.f32.mrb[4].mxu0 }
 0x888   : > { %v1888_v46 = vadd.f32 %v1887_v30, %v6120_v57  ;;  %v1889_v50 = vpop.f32.mrb[5].mxu0 }
 0x889   : > { %v1890_v35 = vadd.f32 %v1889_v50, %v6124_v49  ;;  %2110 = vmatprep.mubr.f32.mxu1 %v1973_v28 }
 0x88a   : > { %2111 = vmatmul.mubr.f32.gmra.mrb[2].mxu1 %v1972_v4  ;;  %v1974_v39 = vmax.f32 %v1888_v46, 0.0 }
 0x88b   : > { %v1975_v53 = vmax.f32 %v1890_v35, 0.0  ;;  %v1893_v13 = vpop.f32.mrb[6].mxu0 }
 0x88c   : > { %v1894_v22 = vadd.f32 %v1893_v13, %v6120_v57  ;;  %v1895_v40 = vpop.f32.mrb[7].mxu0 }
 0x88d   : > { %v1896_v48 = vadd.f32 %v1895_v40, %v6124_v49  ;;  %2115 = vmatprep.mubr.f32.mxu1 %v1975_v53 }
 0x88e   : > { %2116 = vmatmul.mubr.f32.gmra.mrb[4].mxu1 %v1974_v39  ;;  %v1976_v42 = vmax.f32 %v1894_v22, 0.0 }
 0x88f   : > { %v1977_v16 = vmax.f32 %v1896_v48, 0.0  ;;  %v1899_v34 = vpop.f32.mrb[8].mxu0 }
 0x890   : > { %v1900_v45 = vadd.f32 %v1899_v34, %v6120_v57  ;;  %v1901_v3 = vpop.f32.mrb[9].mxu0 }
 0x891   : > { %v1902_v6 = vadd.f32 %v1901_v3, %v6124_v49  ;;  %2120 = vmatprep.mubr.f32.mxu1 %v1977_v16 }
 0x892   : > { %2121 = vmatmul.mubr.f32.gmra.mrb[6].mxu1 %v1976_v42  ;;  %v1978_v21 = vmax.f32 %v1900_v45, 0.0 }
 0x893   : > { %v1979_v54 = vmax.f32 %v1902_v6, 0.0  ;;  %v1905_v24 = vpop.f32.mrb[10].mxu0 }
 0x894   : > { %v1906_v19 = vadd.f32 %v1905_v24, %v6120_v57  ;;  %v1907_v38 = vpop.f32.mrb[11].mxu0 }
 0x895   : > { %v1908_v63 = vadd.f32 %v1907_v38, %v6124_v49  ;;  %2125 = vmatprep.mubr.f32.mxu1 %v1979_v54 }
 0x896   : > { %2126 = vmatmul.mubr.f32.gmra.mrb[8].mxu1 %v1978_v21  ;;  %v1980_v18 = vmax.f32 %v1906_v19, 0.0 }
 0x897   : > { %v1981_v2 = vmax.f32 %v1908_v63, 0.0  ;;  %v1911_v26 = vpop.f32.mrb[12].mxu0 }
 0x898   : > { %v1912_v10 = vadd.f32 %v1911_v26, %v6120_v57  ;;  %v1913_v43 = vpop.f32.mrb[13].mxu0 }
 0x899   : > { %v1914_v9 = vadd.f32 %v1913_v43, %v6124_v49  ;;  %2130 = vmatprep.mubr.f32.mxu1 %v1981_v2 }
 0x89a   : > { %2131 = vmatmul.mubr.f32.gmra.mrb[10].mxu1 %v1980_v18  ;;  %v1982_v20 = vmax.f32 %v1912_v10, 0.0 }
 0x89b   : > { %v1983_v0 = vmax.f32 %v1914_v9, 0.0  ;;  %v1917_v58 = vpop.f32.mrb[14].mxu0  ;;  %v6160_v9 = vld [vmem:[%s570_s15] ss:$0 sm:$0xff] }
 0x89c   : > { %v1918_v37 = vadd.f32 %v1917_v58, %v6120_v57  ;;  %v1919_v62 = vpop.f32.mrb[15].mxu0 }
 0x89d   : > { %v1920_v5 = vadd.f32 %v1919_v62, %v6124_v49  ;;  %2135 = vmatprep.mubr.f32.mxu1 %v1983_v0  ;;  %v2227_v0 = vpop.xlane.xlu0 %2226 }
 0x89e   : > { %2136 = vmatmul.mubr.f32.gmra.mrb[12].mxu1 %v1982_v20  ;;  %v1984_v32 = vmax.f32 %v1918_v37, 0.0 }
 0x89f   : > { %v1985_v7 = vmax.f32 %v1920_v5, 0.0  ;;  %v1923_v31 = vpop.f32.mrb[16].mxu0 }
 0x8a0   : > { %v1924_v44 = vadd.f32 %v1923_v31, %v6120_v57  ;;  %v1925_v11 = vpop.f32.mrb[17].mxu0 }
 0x8a1   : > { %v1926_v1 = vadd.f32 %v1925_v11, %v6124_v49  ;;  %2140 = vmatprep.mubr.f32.mxu1 %v1985_v7  ;;  %v2230_v7 = vpop.xlane.xlu0 %2229  ;;  %v2274_v11 = vld [vmem:[#allocation2 + $0x8] sm:$0xff] }
 0x8a2   : > { %2141 = vmatmul.mubr.f32.gmra.mrb[14].mxu1 %v1984_v32  ;;  %v1986_v61 = vmax.f32 %v1924_v44, 0.0 }
 0x8a3   : > { %v1987_v8 = vmax.f32 %v1926_v1, 0.0  ;;  %v1929_v14 = vpop.f32.mrb[18].mxu0 }
 0x8a4   : > { %v1930_v33 = vadd.f32 %v1929_v14, %v6120_v57  ;;  %v1931_v12 = vpop.f32.mrb[19].mxu0 }
 0x8a5   : > { %v1932_v59 = vadd.f32 %v1931_v12, %v6124_v49  ;;  %2145 = vmatprep.mubr.f32.mxu1 %v1987_v8  ;;  %v2233_v8 = vpop.xlane.xlu1 %2232 }
 0x8a6   : > { %2146 = vmatmul.mubr.f32.gmra.mrb[16].mxu1 %v1986_v61  ;;  %v1988_v60 = vmax.f32 %v1930_v33, 0.0 }
 0x8a7   : > { %v1989_v25 = vmax.f32 %v1932_v59, 0.0  ;;  %v1935_v47 = vpop.f32.mrb[20].mxu0 }
 0x8a8   : > { %v1936_v52 = vadd.f32 %v1935_v47, %v6120_v57  ;;  %v1937_v29 = vpop.f32.mrb[21].mxu0 }
 0x8a9   : > { %v1938_v41 = vadd.f32 %v1937_v29, %v6124_v49  ;;  %2150 = vmatprep.mubr.f32.mxu1 %v1989_v25  ;;  %v2275_v25 = vld [vmem:[#allocation2 + $0x10] sm:$0xff]  ;;  %v2236_v29 = vpop.xlane.xlu1 %2235 }
 0x8aa   : > { %2151 = vmatmul.mubr.f32.gmra.mrb[18].mxu1 %v1988_v60  ;;  %v1990_v23 = vmax.f32 %v1936_v52, 0.0 }
 0x8ab   : > { %v1991_v15 = vmax.f32 %v1938_v41, 0.0  ;;  %v1941_v55 = vpop.f32.mrb[22].mxu0 }
 0x8ac   : > { %v1942_v51 = vadd.f32 %v1941_v55, %v6120_v57  ;;  %v1943_v56 = vpop.f32.mrb[23].mxu0 }
 0x8ad   : > { %v1944_v28 = vadd.f32 %v1943_v56, %v6124_v49  ;;  %2155 = vmatprep.mubr.f32.mxu1 %v1991_v15 }
 0x8ae   : > { %2156 = vmatmul.mubr.f32.gmra.mrb[20].mxu1 %v1990_v23  ;;  %v1992_v46 = vmax.f32 %v1942_v51, 0.0  ;;  %v2276_v23 = vld [vmem:[#allocation2 + $0x18] sm:$0xff] }
 0x8af   : > { %v1993_v30 = vmax.f32 %v1944_v28, 0.0  ;;  %v1947_v4 = vpop.f32.mrb[24].mxu0 }
 0x8b0   : > { %v1948_v50 = vadd.f32 %v1947_v4, %v6120_v57  ;;  %v1949_v35 = vpop.f32.mrb[25].mxu0 }
 0x8b1   : > { %v1950_v53 = vadd.f32 %v1949_v35, %v6124_v49  ;;  %2160 = vmatprep.mubr.f32.mxu1 %v1993_v30  ;;  %v2239_v30 = vpop.xlane.xlu0 %2238  ;;  %v2277_v35 = vld [vmem:[#allocation2 + $0x20] sm:$0xff] }
 0x8b2   : > { %2161 = vmatmul.mubr.f32.gmra.mrb[22].mxu1 %v1992_v46  ;;  %v1994_v22 = vmax.f32 %v1948_v50, 0.0 }
 0x8b3   : > { %v1995_v13 = vmax.f32 %v1950_v53, 0.0  ;;  %v1953_v39 = vpop.f32.mrb[26].mxu0 }
 0x8b4   : > { %v1954_v40 = vadd.f32 %v1953_v39, %v6120_v57  ;;  %v1955_v48 = vpop.f32.mrb[27].mxu0 }
 0x8b5   : > { %v1956_v16 = vadd.f32 %v1955_v48, %v6124_v49  ;;  %2165 = vmatprep.mubr.f32.mxu1 %v1995_v13 }
 0x8b6   : > { %2166 = vmatmul.mubr.f32.gmra.mrb[24].mxu1 %v1994_v22  ;;  %v1996_v45 = vmax.f32 %v1954_v40, 0.0  ;;  %v2242_v22 = vpop.xlane.xlu1 %2241 }
 0x8b7   : > { %v1997_v34 = vmax.f32 %v1956_v16, 0.0  ;;  %v1959_v42 = vpop.f32.mrb[28].mxu0 }
 0x8b8   : > { %v1960_v3 = vadd.f32 %v1959_v42, %v6120_v57  ;;  %v1961_v6 = vpop.f32.mrb[29].mxu0 }
 0x8b9   : > { %v1962_v54 = vadd.f32 %v1961_v6, %v6124_v49  ;;  %2170 = vmatprep.mubr.f32.mxu1 %v1997_v34  ;;  %v2278_v34 = vld [vmem:[#allocation2 + $0x28] sm:$0xff]  ;;  %v2245_v6 = vpop.xlane.xlu0 %2244 }
 0x8ba   : > { %2171 = vmatmul.mubr.f32.gmra.mrb[26].mxu1 %v1996_v45  ;;  %v1998_v19 = vmax.f32 %v1960_v3, 0.0 }
 0x8bb   : > { %v1999_v24 = vmax.f32 %v1962_v54, 0.0  ;;  %v1965_v21 = vpop.f32.mrb[30].mxu0 }
 0x8bc   : > { %v1966_v38 = vadd.f32 %v1965_v21, %v6120_v57  ;;  %v1967_v63 = vpop.f32.mrb[31].mxu0  ;;  %v2273_v57 = vld [vmem:[#allocation2] sm:$0xff] }
 0x8bd   : > { %v1968_v2 = vadd.f32 %v1967_v63, %v6124_v49  ;;  %2175 = vmatprep.mubr.f32.mxu1 %v1999_v24 }
 0x8be   : > { %2176 = vmatmul.mubr.f32.gmra.mrb[28].mxu1 %v1998_v19  ;;  %v2000_v18 = vmax.f32 %v1966_v38, 0.0  ;;  %v2279_v19 = vld [vmem:[#allocation2 + $0x30] sm:$0xff] }
 0x8bf   : > { %v2001_v26 = vmax.f32 %v1968_v2, 0.0 }
 0x8c1   : > { %2180 = vmatprep.mubr.f32.mxu1 %v2001_v26  ;;  %v2248_v26 = vpop.xlane.xlu1 %2247 }
 0x8c2   : > { %2181 = vmatmul.mubr.f32.gmra.mrb[30].mxu1 %v2000_v18 }
 0x959   : > { %v3259_v10 = vpop.f32.mrb[0].mxu1 }
 0x95a   : > { %v3260_v43 = vpop.f32.mrb[1].mxu1 }
 0x95b   : > { %v3261_v58 = vadd.f32 %v3260_v43, %v3259_v10 }
 0x95d   : > { %v3262_v20 = vpop.f32.mrb[2].mxu1  ;;  %v2108_v37 = vadd.f32 %v3261_v58, %v6160_v9 }
 0x95e   : > { %v3263_v62 = vpop.f32.mrb[3].mxu1 }
 0x95f   : > { %v2289_v5 = vmul.f32 %v2227_v0, %v2108_v37  ;;  %v3264_v49 = vadd.f32 %v3263_v62, %v3262_v20  ;;  %v2280_v0 = vld [vmem:[#allocation2 + $0x38] sm:$0xff] }
 0x961   : > { %v2305_v31 = vadd.f32 %v2289_v5, %v2273_v57  ;;  %v3265_v32 = vpop.f32.mrb[4].mxu1  ;;  %v2113_v44 = vadd.f32 %v3264_v49, %v6160_v9  ;;  %v2251_v57 = vpop.xlane.xlu0 %2250 }
 0x962   : > { %v3266_v1 = vpop.f32.mrb[5].mxu1 }
 0x963   : > { %2321 = vst [vmem:[#allocation2] sm:$0xff] %v2305_v31  ;;  %v2290_v14 = vmul.f32 %v2230_v7, %v2113_v44  ;;  %v3267_v61 = vadd.f32 %v3266_v1, %v3265_v32  ;;  %v2281_v7 = vld [vmem:[#allocation2 + $0x40] sm:$0xff] }
 0x965   : > { %v2306_v33 = vadd.f32 %v2290_v14, %v2274_v11  ;;  %v3268_v12 = vpop.f32.mrb[6].mxu1  ;;  %v2118_v59 = vadd.f32 %v3267_v61, %v6160_v9  ;;  %v2254_v11 = vpop.xlane.xlu1 %2253  ;;  %v2282_v61 = vld [vmem:[#allocation2 + $0x48] sm:$0xff] }
 0x966   : > { %v3269_v47 = vpop.f32.mrb[7].mxu1 }
 0x967   : > { %2322 = vst [vmem:[#allocation2 + $0x8] sm:$0xff] %v2306_v33  ;;  %v2291_v60 = vmul.f32 %v2233_v8, %v2118_v59  ;;  %v3270_v52 = vadd.f32 %v3269_v47, %v3268_v12 }
 0x969   : > { %v2307_v41 = vadd.f32 %v2291_v60, %v2275_v25  ;;  %v3271_v15 = vpop.f32.mrb[8].mxu1  ;;  %v2123_v55 = vadd.f32 %v3270_v52, %v6160_v9  ;;  %v2257_v25 = vpop.xlane.xlu0 %2256 }
 0x96a   : > { %v3272_v51 = vpop.f32.mrb[9].mxu1 }
 0x96b   : > { %2323 = vst [vmem:[#allocation2 + $0x10] sm:$0xff] %v2307_v41  ;;  %v2292_v56 = vmul.f32 %v2236_v29, %v2123_v55  ;;  %v3273_v28 = vadd.f32 %v3272_v51, %v3271_v15  ;;  %v2283_v29 = vld [vmem:[#allocation2 + $0x50] sm:$0xff] }
 0x96d   : > { %v2308_v4 = vadd.f32 %v2292_v56, %v2276_v23  ;;  %v3274_v46 = vpop.f32.mrb[10].mxu1  ;;  %v2128_v50 = vadd.f32 %v3273_v28, %v6160_v9  ;;  %v2260_v23 = vpop.xlane.xlu1 %2259 }
 0x96e   : > { %v3275_v53 = vpop.f32.mrb[11].mxu1 }
 0x96f   : > { %2324 = vst [vmem:[#allocation2 + $0x18] sm:$0xff] %v2308_v4  ;;  %v2293_v13 = vmul.f32 %v2239_v30, %v2128_v50  ;;  %v3276_v39 = vadd.f32 %v3275_v53, %v3274_v46  ;;  %v2284_v30 = vld [vmem:[#allocation2 + $0x58] sm:$0xff] }
 0x971   : > { %v2309_v40 = vadd.f32 %v2293_v13, %v2277_v35  ;;  %v3277_v48 = vpop.f32.mrb[12].mxu1  ;;  %v2133_v16 = vadd.f32 %v3276_v39, %v6160_v9  ;;  %v2263_v35 = vpop.xlane.xlu0 %2262 }
 0x972   : > { %v3278_v42 = vpop.f32.mrb[13].mxu1 }
 0x973   : > { %2325 = vst [vmem:[#allocation2 + $0x20] sm:$0xff] %v2309_v40  ;;  %v2294_v45 = vmul.f32 %v2242_v22, %v2133_v16  ;;  %v3279_v3 = vadd.f32 %v3278_v42, %v3277_v48  ;;  %v2285_v22 = vld [vmem:[#allocation2 + $0x60] sm:$0xff] }
 0x975   : > { %v2310_v54 = vadd.f32 %v2294_v45, %v2278_v34  ;;  %v3280_v24 = vpop.f32.mrb[14].mxu1  ;;  %v2138_v21 = vadd.f32 %v3279_v3, %v6160_v9  ;;  %v2266_v34 = vpop.xlane.xlu1 %2265 }
 0x976   : > { %v3281_v38 = vpop.f32.mrb[15].mxu1 }
 0x977   : > { %2326 = vst [vmem:[#allocation2 + $0x28] sm:$0xff] %v2310_v54  ;;  %v2295_v63 = vmul.f32 %v2245_v6, %v2138_v21  ;;  %v3282_v2 = vadd.f32 %v3281_v38, %v3280_v24  ;;  %v2286_v6 = vld [vmem:[#allocation2 + $0x68] sm:$0xff] }
 0x979   : > { %v2311_v18 = vadd.f32 %v2295_v63, %v2279_v19  ;;  %v3283_v10 = vpop.f32.mrb[16].mxu1  ;;  %v2143_v43 = vadd.f32 %v3282_v2, %v6160_v9  ;;  %v2269_v19 = vpop.xlane.xlu0 %2268 }
 0x97a   : > { %v3284_v58 = vpop.f32.mrb[17].mxu1 }
 0x97b   : > { %2327 = vst [vmem:[#allocation2 + $0x30] sm:$0xff] %v2311_v18  ;;  %v2296_v20 = vmul.f32 %v2248_v26, %v2143_v43  ;;  %v3285_v37 = vadd.f32 %v3284_v58, %v3283_v10  ;;  %v2287_v26 = vld [vmem:[#allocation2 + $0x70] sm:$0xff] }
 0x97d   : > { %v2312_v62 = vadd.f32 %v2296_v20, %v2280_v0  ;;  %v3286_v5 = vpop.f32.mrb[18].mxu1  ;;  %v2148_v49 = vadd.f32 %v3285_v37, %v6160_v9  ;;  %v2272_v0 = vpop.xlane.xlu1 %2271  ;;  %v2288_v37 = vld [vmem:[#allocation2 + $0x78] sm:$0xff] }
 0x97e   : > { %v3287_v31 = vpop.f32.mrb[19].mxu1 }
 0x97f   : > { %2328 = vst [vmem:[#allocation2 + $0x38] sm:$0xff] %v2312_v62  ;;  %v2297_v32 = vmul.f32 %v2251_v57, %v2148_v49  ;;  %v3288_v44 = vadd.f32 %v3287_v31, %v3286_v5  ;;  %v2342_v5 = vld [vmem:[#allocation16 + $0x8] sm:$0xff] (!%p3183_p4)  ;;  %v2344_v49 = vld [vmem:[#allocation16 + $0x18] sm:$0xff] (!%p3183_p4) }
 0x980   : > { %v3539_v31 = vpack.c.bf16 (!%p3183_p4), %v2344_v49, %v2342_v5  ;;  %v2584_v5 = vld [vmem:[#allocation19 + $0x30] sm:$0xff] (!%p3183_p4)  ;;  %v2585_v49 = vld [vmem:[#allocation19 + $0x38] sm:$0xff] (!%p3183_p4) }
 0x981   : > { %v2313_v1 = vadd.f32 %v2297_v32, %v2281_v7  ;;  %v3289_v8 = vpop.f32.mrb[20].mxu1  ;;  %v2153_v14 = vadd.f32 %v3288_v44, %v6160_v9  ;;  %v2341_v7 = vld [vmem:[#allocation16] sm:$0xff] (!%p3183_p4)  ;;  %v2343_v32 = vld [vmem:[#allocation16 + $0x10] sm:$0xff] (!%p3183_p4)  ;;  %v2346_v44 = vld [vmem:[#allocation16 + $0x28] sm:$0xff] (!%p3183_p4) }
 0x982   : > { %v3290_v33 = vpop.f32.mrb[21].mxu1  ;;  %3540 = vmatprep.subr.bf16.mxu0 (!%p3183_p4), %v3539_v31  ;;  %v2367_v31 = vld [vmem:[#allocation16 + $0xd0] sm:$0xff] (!%p3183_p4) }
 0x983   : > { %2329 = vst [vmem:[#allocation2 + $0x40] sm:$0xff] %v2313_v1  ;;  %v2298_v12 = vmul.f32 %v2254_v11, %v2153_v14  ;;  %v3291_v59 = vadd.f32 %v3290_v33, %v3289_v8  ;;  %v2348_v11 = vld [vmem:[#allocation16 + $0x38] sm:$0xff] (!%p3183_p4)  ;;  %v4354_v1 = vmov (!%p3183_p4), 0.0   ;;  %v3541_v8 = vpack.c.bf16 (!%p3183_p4), %v2343_v32, %v2341_v7  ;;  %v2345_v14 = vld [vmem:[#allocation16 + $0x20] sm:$0xff] (!%p3183_p4)  ;;  %v2350_v33 = vld [vmem:[#allocation16 + $0x48] sm:$0xff] (!%p3183_p4) }
 0x984   : > { %2449 = vmatprep.mubr.f32.mxu0 (!%p3183_p4), %v4354_v1  ;;  %v2602_v32 = vld [vmem:[#allocation19 + $0xc0] sm:$0xff] (!%p3183_p4) }
 0x985   : > { %v2314_v47 = vadd.f32 %v2298_v12, %v2282_v61  ;;  %v3292_v60 = vpop.f32.mrb[22].mxu1  ;;  %v2158_v52 = vadd.f32 %v3291_v59, %v6160_v9  ;;  %v2347_v61 = vld [vmem:[#allocation16 + $0x30] sm:$0xff] (!%p3183_p4)  ;;  %v2352_v12 = vld [vmem:[#allocation16 + $0x58] sm:$0xff] (!%p3183_p4)  ;;  %3542 = vmatpush1.bf16.msra.mxu0 (!%p3183_p4), %v3541_v8 }
 0x986   : > { %v3293_v41 = vpop.f32.mrb[23].mxu1  ;;  %v3545_v59 = vpack.c.bf16 (!%p3183_p4), %v2347_v61, %v2345_v14  ;;  %v2372_v8 = vld [vmem:[#allocation16 + $0xf8] sm:$0xff] (!%p3183_p4)  ;;  %v2369_v61 = vld [vmem:[#allocation16 + $0xe0] sm:$0xff] (!%p3183_p4) }
 0x987   : > { %2330 = vst [vmem:[#allocation2 + $0x48] sm:$0xff] %v2314_v47  ;;  %v2299_v15 = vmul.f32 %v2257_v25, %v2158_v52  ;;  %v3294_v55 = vadd.f32 %v3293_v41, %v3292_v60  ;;  %v3547_v25 = vpack.c.bf16 (!%p3183_p4), %v2352_v12, %v2350_v33  ;;  %v2349_v47 = vld [vmem:[#allocation16 + $0x40] sm:$0xff] (!%p3183_p4)  ;;  %v2351_v60 = vld [vmem:[#allocation16 + $0x50] sm:$0xff] (!%p3183_p4)  ;;  %v2354_v52 = vld [vmem:[#allocation16 + $0x68] sm:$0xff] (!%p3183_p4) }
 0x988   : > { %v3549_v41 = vpack.c.bf16 (!%p3183_p4), %v2351_v60, %v2349_v47  ;;  %v2586_v12 = vld [vmem:[#allocation19 + $0x40] sm:$0xff] (!%p3183_p4)  ;;  %v2371_v47 = vld [vmem:[#allocation16 + $0xf0] sm:$0xff] (!%p3183_p4) }
 0x989   : > { %v2315_v51 = vadd.f32 %v2299_v15, %v2283_v29  ;;  %v3295_v56 = vpop.f32.mrb[24].mxu1  ;;  %v2163_v28 = vadd.f32 %v3294_v55, %v6160_v9  ;;  %v2356_v29 = vld [vmem:[#allocation16 + $0x78] sm:$0xff] (!%p3183_p4)  ;;  %v2353_v55 = vld [vmem:[#allocation16 + $0x60] sm:$0xff] (!%p3183_p4) }
 0x98a   : > { %v3296_v4 = vpop.f32.mrb[25].mxu1  ;;  %v3551_v15 = vpack.c.bf16 (!%p3183_p4), %v2356_v29, %v2354_v52  ;;  %v2604_v60 = vld [vmem:[#allocation19 + $0xd0] sm:$0xff] (!%p3183_p4)  ;;  %v2605_v52 = vld [vmem:[#allocation19 + $0xd8] sm:$0xff] (!%p3183_p4) }
 0x98b   : > { %2331 = vst [vmem:[#allocation2 + $0x50] sm:$0xff] %v2315_v51  ;;  %v2300_v46 = vmul.f32 %v2260_v23, %v2163_v28  ;;  %v3297_v50 = vadd.f32 %v3296_v4, %v3295_v56  ;;  %v2355_v23 = vld [vmem:[#allocation16 + $0x70] sm:$0xff] (!%p3183_p4)  ;;  %v2358_v51 = vld [vmem:[#allocation16 + $0x88] sm:$0xff] (!%p3183_p4)  ;;  %v2360_v56 = vld [vmem:[#allocation16 + $0x98] sm:$0xff] (!%p3183_p4) }
 0x98c   : > { %v2594_v28 = vld [vmem:[#allocation19 + $0x80] sm:$0xff] (!%p3183_p4)  ;;  %v2359_v4 = vld [vmem:[#allocation16 + $0x90] sm:$0xff] (!%p3183_p4) }
 0x98d   : > { %v2316_v53 = vadd.f32 %v2300_v46, %v2284_v30  ;;  %v3298_v13 = vpop.f32.mrb[26].mxu1  ;;  %v2168_v39 = vadd.f32 %v3297_v50, %v6160_v9  ;;  %v2357_v30 = vld [vmem:[#allocation16 + $0x80] sm:$0xff] (!%p3183_p4)  ;;  %v2595_v46 = vld [vmem:[#allocation19 + $0x88] sm:$0xff] (!%p3183_p4) }
 0x98e   : > { %v3299_v40 = vpop.f32.mrb[27].mxu1  ;;  %v2578_v50 = vld [vmem:[#allocation19] sm:$0xff] (!%p3183_p4) }
 0x98f   : > { %2332 = vst [vmem:[#allocation2 + $0x58] sm:$0xff] %v2316_v53  ;;  %v2301_v48 = vmul.f32 %v2263_v35, %v2168_v39  ;;  %v3300_v16 = vadd.f32 %v3299_v40, %v3298_v13  ;;  %v2579_v35 = vld [vmem:[#allocation19 + $0x8] sm:$0xff] (!%p3183_p4)  ;;  %v3553_v53 = vpack.c.bf16 (!%p3183_p4), %v2355_v23, %v2353_v55  ;;  %v3571_v13 = vpack.c.bf16 (!%p3183_p4), %v2595_v46, %v2594_v28  ;;  %v2597_v40 = vld [vmem:[#allocation19 + $0x98] sm:$0xff] (!%p3183_p4)  ;;  %v2588_v55 = vld [vmem:[#allocation19 + $0x50] sm:$0xff] (!%p3183_p4) }
 0x990   : > { %v3573_v39 = vpack.c.bf16 (!%p3183_p4), %v2579_v35, %v2578_v50  ;;  %v2589_v23 = vld [vmem:[#allocation19 + $0x58] sm:$0xff] (!%p3183_p4)  ;;  %v6605_v46 = vld [vmem:[#allocation43_spill] sm:$0xff] (!%p3183_p4) }
 0x991   : > { %v2317_v42 = vadd.f32 %v2301_v48, %v2285_v22  ;;  %v3301_v45 = vpop.f32.mrb[28].mxu1  ;;  %v2173_v3 = vadd.f32 %v3300_v16, %v6160_v9  ;;  %v2596_v22 = vld [vmem:[#allocation19 + $0x90] sm:$0xff] (!%p3183_p4)  ;;  %v3555_v16 = vpack.c.bf16 (!%p3183_p4), %v2360_v56, %v2358_v51  ;;  %3572 = vmatprep.subr.bf16.mxu1 (!%p3183_p4), %v3571_v13  ;;  %v2606_v51 = vld [vmem:[#allocation19 + $0xe0] sm:$0xff] (!%p3183_p4)  ;;  %v2607_v56 = vld [vmem:[#allocation19 + $0xe8] sm:$0xff] (!%p3183_p4)  ;;  %v3593_v28 = vpack.c.bf16 (!%p3183_p4), %v2589_v23, %v2588_v55 }
 0x992   : > { %v3302_v54 = vpop.f32.mrb[29].mxu1  ;;  %v2580_v48 = vld [vmem:[#allocation19 + $0x10] sm:$0xff] (!%p3183_p4)  ;;  %3574 = vmatpush3.bf16.msra.mxu1 (!%p3183_p4), %v3573_v39  ;;  %v6607_v35 = vld [vmem:[#allocation45_spill] sm:$0xff] (!%p3183_p4) }
 0x993   : > { %2333 = vst [vmem:[#allocation2 + $0x60] sm:$0xff] %v2317_v42  ;;  %v2302_v24 = vmul.f32 %v2266_v34, %v2173_v3  ;;  %v3303_v21 = vadd.f32 %v3302_v54, %v3301_v45  ;;  %v3575_v34 = vpack.c.bf16 (!%p3183_p4), %v2597_v40, %v2596_v22  ;;  %v2581_v42 = vld [vmem:[#allocation19 + $0x18] sm:$0xff] (!%p3183_p4)  ;;  %v2598_v45 = vld [vmem:[#allocation19 + $0xa0] sm:$0xff] (!%p3183_p4)  ;;  %v2599_v3 = vld [vmem:[#allocation19 + $0xa8] sm:$0xff] (!%p3183_p4) }
 0x994   : > { %v2364_v54 = vld [vmem:[#allocation16 + $0xb8] sm:$0xff] (!%p3183_p4)  ;;  %v6609_v13 = vld [vmem:[#allocation47_spill] sm:$0xff] (!%p3183_p4)  ;;  %v6612_v40 = vld [vmem:[#allocation50_spill] sm:$0xff] (!%p3183_p4) }
 0x995   : > { %v2318_v38 = vadd.f32 %v2302_v24, %v2286_v6  ;;  %v3304_v63 = vpop.f32.mrb[30].mxu1  ;;  %v2178_v2 = vadd.f32 %v3303_v21, %v6160_v9  ;;  %v2362_v6 = vld [vmem:[#allocation16 + $0xa8] sm:$0xff] (!%p3183_p4)  ;;  %v3577_v24 = vpack.c.bf16 (!%p3183_p4), %v2581_v42, %v2580_v48  ;;  %v3557_v21 = vpack.c.bf16 (!%p3183_p4), %v2359_v4, %v2357_v30  ;;  %3576 = vmatprep.subr.bf16.mxu1 (!%p3183_p4), %v3575_v34  ;;  %v6606_v50 = vld [vmem:[#allocation44_spill] sm:$0xff] (!%p3183_p4)  ;;  %v6611_v22 = vld [vmem:[#allocation49_spill] sm:$0xff] (!%p3183_p4) }
 0x996   : > { %v3305_v18 = vpop.f32.mrb[31].mxu1  ;;  %v3595_v30 = vpack.c.bf16 (!%p3183_p4), %v2607_v56, %v2606_v51  ;;  %v6604_v4 = vld [vmem:[#allocation42_spill] sm:$0xff] (!%p3183_p4)  ;;  %v6610_v39 = vld [vmem:[#allocation48_spill] sm:$0xff] (!%p3183_p4)  ;;  %v6613_v48 = vld [vmem:[#allocation51_spill] sm:$0xff] (!%p3183_p4) }
 0x997   : > { %2334 = vst [vmem:[#allocation2 + $0x68] sm:$0xff] %v2318_v38  ;;  %v2303_v10 = vmul.f32 %v2269_v19, %v2178_v2  ;;  %v3306_v43 = vadd.f32 %v3305_v18, %v3304_v63  ;;  %v2361_v19 = vld [vmem:[#allocation16 + $0xa0] sm:$0xff] (!%p3183_p4)  ;;  %v3579_v38 = vpack.c.bf16 (!%p3183_p4), %v2599_v3, %v2598_v45  ;;  %v2583_v2 = vld [vmem:[#allocation19 + $0x28] sm:$0xff] (!%p3183_p4)  ;;  %3578 = vmatpush3.bf16.msra.mxu1 (!%p3183_p4), %v3577_v24  ;;  %v6618_v3 = vld [vmem:[#allocation56_spill] sm:$0xff] (!%p3183_p4) }
 0x998   : > { %v2582_v63 = vld [vmem:[#allocation19 + $0x20] sm:$0xff] (!%p3183_p4)  ;;  %v2363_v18 = vld [vmem:[#allocation16 + $0xb0] sm:$0xff] (!%p3183_p4)  ;;  %v2373_v51 = vld [vmem:[#allocation18] sm:$0x3] (!%p3183_p4) }
 0x999   : > { %v2319_v58 = vadd.f32 %v2303_v10, %v2287_v26  ;;  %v2183_v20 = vadd.f32 %v3306_v43, %v6160_v9  ;;  %2340 = sbr.rel (%p3183_p4) target bundleno = 2987 (0xbab), region = 116  ;;  %v3543_v9 = vpack.c.bf16 (!%p3183_p4), %v2348_v11, %v2346_v44  ;;  %v3559_v26 = vpack.c.bf16 (!%p3183_p4), %v2364_v54, %v2362_v6  ;;  %v2600_v10 = vld [vmem:[#allocation19 + $0xb0] sm:$0xff] (!%p3183_p4)  ;;  %v2601_v43 = vld [vmem:[#allocation19 + $0xb8] sm:$0xff] (!%p3183_p4)  ;;  %3580 = vmatprep.subr.bf16.mxu1 (!%p3183_p4), %v3579_v38  ;;  %v2603_v44 = vld [vmem:[#allocation19 + $0xc8] sm:$0xff] (!%p3183_p4) }
 0x99a   : > { %v2370_v11 = vld [vmem:[#allocation16 + $0xe8] sm:$0xff] (!%p3183_p4)  ;;  %v3587_v33 = vpack.c.bf16 (!%p3183_p4), %v2603_v44, %v2602_v32  ;;  %v6615_v34 = vld [vmem:[#allocation53_spill] sm:$0xff] (!%p3183_p4)  ;;  %v2769_v32 = vld [vmem:[#allocation3 + $0x38] sm:$0xff] (!%p3183_p4)  ;;  %v6229_v56 = vrot.slane (!%p3183_p4), %v2373_v51, %v1801_v17 }
 0x99b   : > { %2335 = vst [vmem:[#allocation2 + $0x70] sm:$0xff] %v2319_v58  ;;  %v2304_v57 = vmul.f32 %v2272_v0, %v2183_v20  ;;  %3544 = vmatprep.subr.bf16.mxu0 (!%p3183_p4), %v3543_v9  ;;  %v2366_v0 = vld [vmem:[#allocation16 + $0xc8] sm:$0xff] (!%p3183_p4)  ;;  %v2368_v58 = vld [vmem:[#allocation16 + $0xd8] sm:$0xff] (!%p3183_p4)  ;;  %v3581_v20 = vpack.c.bf16 (!%p3183_p4), %v2583_v2, %v2582_v63  ;;  %v3585_v9 = vpack.c.bf16 (!%p3183_p4), %v2585_v49, %v2584_v5  ;;  %v2767_v5 = vld [vmem:[#allocation3 + $0x28] sm:$0xff] (!%p3183_p4) }
 0x99c   : > { %3546 = vmatpush1.bf16.msra.mxu0 (!%p3183_p4), %v3545_v59  ;;  %v3563_v7 = vpack.c.bf16 (!%p3183_p4), %v2368_v58, %v2366_v0  ;;  %v2587_v59 = vld [vmem:[#allocation19 + $0x48] sm:$0xff] (!%p3183_p4)  ;;  %v6619_v6 = vld [vmem:[#allocation57_spill] sm:$0xff] (!%p3183_p4)  ;;  %v2592_v2 = vld [vmem:[#allocation19 + $0x70] sm:$0xff] (!%p3183_p4) }
 0x99d   : > { %v2320_v62 = vadd.f32 %v2304_v57, %v2288_v37  ;;  %3548 = vmatprep.subr.bf16.mxu0 (!%p3183_p4), %v3547_v25  ;;  %v3561_v37 = vpack.c.bf16 (!%p3183_p4), %v2363_v18, %v2361_v19  ;;  %v2365_v57 = vld [vmem:[#allocation16 + $0xc0] sm:$0xff] (!%p3183_p4)  ;;  %3582 = vmatpush3.bf16.msra.mxu1 (!%p3183_p4), %v3581_v20  ;;  %v3567_v25 = vpack.c.bf16 (!%p3183_p4), %v2372_v8, %v2370_v11  ;;  %v6617_v45 = vld [vmem:[#allocation55_spill] sm:$0xff] (!%p3183_p4)  ;;  %v2799_v11 = vsel (!%p3183_p4), %vm2224_vm12, %v2769_v32, -inf  ;;  %v2770_v8 = vld [vmem:[#allocation3 + $0x40] sm:$0xff] (!%p3183_p4) }
 0x99e   : > { %v3565_v14 = vpack.c.bf16 (!%p3183_p4), %v2367_v31, %v2365_v57  ;;  %v3589_v29 = vpack.c.bf16 (!%p3183_p4), %v2587_v59, %v2586_v12  ;;  %v6616_v42 = vld [vmem:[#allocation54_spill] sm:$0xff] (!%p3183_p4)  ;;  %v2608_v19 = vld [vmem:[#allocation19 + $0xf0] sm:$0xff] (!%p3183_p4)  ;;  %v2609_v38 = vld [vmem:[#allocation19 + $0xf8] sm:$0xff] (!%p3183_p4) }
 0x99f   : > { %2336 = vst [vmem:[#allocation2 + $0x78] sm:$0xff] %v2320_v62  ;;  %v3583_v62 = vpack.c.bf16 (!%p3183_p4), %v2601_v43, %v2600_v10  ;;  %v2590_v54 = vld [vmem:[#allocation19 + $0x60] sm:$0xff] (!%p3183_p4)  ;;  %v2591_v24 = vld [vmem:[#allocation19 + $0x68] sm:$0xff] (!%p3183_p4)  ;;  %v3599_v63 = vpack.c.bf16 (!%p3183_p4), %v2609_v38, %v2608_v19  ;;  %v2762_v10 = vld [vmem:[#allocation3] sm:$0xff] (!%p3183_p4) }
 0x9a0   : > { %3550 = vmatpush1.bf16.msra.mxu0 %v3549_v41  ;;  %v3569_v41 = vpack.c.bf16 %v2371_v47, %v2369_v61  ;;  %v2763_v43 = vld [vmem:[#allocation3 + $0x8] sm:$0xff]  ;;  %v2764_v0 = vld [vmem:[#allocation3 + $0x10] sm:$0xff]  ;;  %v2778_v58 = vsel %vm2224_vm12, %v2762_v10, -inf  ;;  %v2765_v20 = vld [vmem:[#allocation3 + $0x18] sm:$0xff] }
 0x9a1   : > { %3552 = vmatprep.subr.bf16.mxu0 %v3551_v15  ;;  %3584 = vmatprep.subr.bf16.mxu1 %v3583_v62  ;;  %v3591_v15 = vpack.c.bf16 %v2605_v52, %v2604_v60  ;;  %v2787_v57 = vsel %vm2224_vm12, %v2765_v20, -inf  ;;  %v2766_v62 = vld [vmem:[#allocation3 + $0x20] sm:$0xff]  ;;  %v2768_v31 = vld [vmem:[#allocation3 + $0x30] sm:$0xff]  ;;  %v2773_v12 = vld [vmem:[#allocation3 + $0x58] sm:$0xff] }
 0x9a2   : > { %3586 = vmatpush3.bf16.msra.mxu1 %v3585_v9  ;;  %2779 = vmax.xlane.f32.xlu0 %v2778_v58  ;;  %v2790_v49 = vsel %vm2224_vm12, %v2766_v62, -inf  ;;  %v2796_v44 = vsel %vm2224_vm12, %v2768_v31, -inf  ;;  %v2771_v9 = vld [vmem:[#allocation3 + $0x48] sm:$0xff]  ;;  %v2774_v47 = vld [vmem:[#allocation3 + $0x60] sm:$0xff] }
 0x9a3   : > { %3588 = vmatprep.subr.bf16.mxu1 %v3587_v33  ;;  %v2805_v61 = vsel %vm2224_vm12, %v2771_v9, -inf  ;;  %v2772_v33 = vld [vmem:[#allocation3 + $0x50] sm:$0xff]  ;;  %v2775_v60 = vld [vmem:[#allocation3 + $0x68] sm:$0xff]  ;;  %v2814_v52 = vsel %vm2224_vm12, %v2774_v47, -inf }
 0x9a4   : > { %3554 = vmatpush1.bf16.msra.mxu0 %v3553_v53  ;;  %v6608_v53 = vld [vmem:[#allocation46_spill] sm:$0xff]  ;;  %v2808_v59 = vsel %vm2224_vm12, %v2772_v33, -inf }
 0x9a5   : > { %3556 = vmatprep.subr.bf16.mxu0 %v3555_v16  ;;  %v6614_v16 = vld [vmem:[#allocation52_spill] sm:$0xff] }
 0x9a6   : > { %3590 = vmatpush3.bf16.msra.mxu1 %v3589_v29  ;;  %v2817_v29 = vsel %vm2224_vm12, %v2775_v60, -inf }
 0x9a7   : > { %3592 = vmatprep.subr.bf16.mxu1 %v3591_v15  ;;  %v2777_v15 = vld [vmem:[#allocation3 + $0x78] sm:$0xff] }
 0x9a8   : > { %3558 = vmatpush1.bf16.msra.mxu0 %v3557_v21  ;;  %v3597_v21 = vpack.c.bf16 %v2591_v24, %v2590_v54  ;;  %v2823_v23 = vsel %vm2224_vm12, %v2777_v15, -inf }
 0x9a9   : > { %3560 = vmatprep.subr.bf16.mxu0 %v3559_v26  ;;  %v2593_v26 = vld [vmem:[#allocation19 + $0x78] sm:$0xff] }
 0x9aa   : > { %3594 = vmatpush3.bf16.msra.mxu1 %v3593_v28  ;;  %v3601_v18 = vpack.c.bf16 %v2593_v26, %v2592_v2  ;;  %v6233_v28 = vrot.slane %v2373_v51, %v1805_v36 }
 0x9ab   : > { %3596 = vmatprep.subr.bf16.mxu1 %v3595_v30 }
 0x9ac   : > { %3562 = vmatpush1.bf16.msra.mxu0 %v3561_v37  ;;  %v2781_v37 = vsel %vm2224_vm12, %v2763_v43, -inf }
 0x9ad   : > { %3564 = vmatprep.subr.bf16.mxu0 %v3563_v7  ;;  %2782 = vmax.xlane.f32.xlu0 %v2781_v37  ;;  %v2793_v7 = vsel %vm2224_vm12, %v2767_v5, -inf }
 0x9ae   : > { %3598 = vmatpush3.bf16.msra.mxu1 %v3597_v21 }
 0x9af   : > { %3600 = vmatprep.subr.bf16.mxu1 %v3599_v63 }
 0x9b0   : > { %3566 = vmatpush1.bf16.msra.mxu0 %v3565_v14  ;;  %v2802_v14 = vsel %vm2224_vm12, %v2770_v8, -inf }
 0x9b1   : > { %3568 = vmatprep.subr.bf16.mxu0 %v3567_v25  ;;  %2791 = vmax.xlane.f32.xlu0 %v2790_v49  ;;  %v2811_v25 = vsel %vm2224_vm12, %v2773_v12, -inf }
 0x9b2   : > { %3602 = vmatpush3.bf16.msra.mxu1 %v3601_v18 }
 0x9b4   : > { %3570 = vmatpush1.bf16.msra.mxu0 %v3569_v41  ;;  %v2776_v41 = vld [vmem:[#allocation3 + $0x70] sm:$0xff] }
 0x9b5   : > { %2797 = vmax.xlane.f32.xlu0 %v2796_v44  ;;  %v2820_v55 = vsel %vm2224_vm12, %v2776_v41, -inf }
 0x9b7   : > { %2450 = vmatmul.mubr.f32.vlgmr.msra.gmra.mrb[0].mxu0 %v6604_v4 }
 0x9b8   : > { %2455 = vmatprep.mubr.f32.mxu0 %v4354_v1 }
 0x9b9   : > { %2803 = vmax.xlane.f32.xlu0 %v2802_v14 }
 0x9bb   : > { %2456 = vmatmul.mubr.f32.gmra.mrb[2].mxu0 %v6605_v46 }
 0x9bc   : > { %2461 = vmatprep.mubr.f32.mxu0 %v4354_v1 }
 0x9bd   : > { %2809 = vmax.xlane.f32.xlu0 %v2808_v59 }
 0x9bf   : > { %2462 = vmatmul.mubr.f32.gmra.mrb[4].mxu0 %v6606_v50 }
 0x9c0   : > { %2467 = vmatprep.mubr.f32.mxu0 %v4354_v1 }
 0x9c1   : > { %2815 = vmax.xlane.f32.xlu0 %v2814_v52 }
 0x9c3   : > { %2468 = vmatmul.mubr.f32.gmra.mrb[6].mxu0 %v6607_v35 }
 0x9c4   : > { %2473 = vmatprep.mubr.f32.mxu0 %v4354_v1 }
 0x9c5   : > { %2821 = vmax.xlane.f32.xlu0 %v2820_v55 }
 0x9c7   : > { %2474 = vmatmul.mubr.f32.gmra.mrb[8].mxu0 %v6608_v53 }
 0x9c8   : > { %2479 = vmatprep.mubr.f32.mxu0 %v4354_v1 }
 0x9cb   : > { %2480 = vmatmul.mubr.f32.gmra.mrb[10].mxu0 %v6609_v13 }
 0x9cc   : > { %2485 = vmatprep.mubr.f32.mxu0 %v4354_v1 }
 0x9cf   : > { %2486 = vmatmul.mubr.f32.gmra.mrb[12].mxu0 %v6610_v39 }
 0x9d0   : > { %2491 = vmatprep.mubr.f32.mxu0 %v4354_v1 }
 0x9d3   : > { %2492 = vmatmul.mubr.f32.gmra.mrb[14].mxu0 %v6611_v22 }
 0x9d4   : > { %2497 = vmatprep.mubr.f32.mxu0 %v4354_v1 }
 0x9d7   : > { %2498 = vmatmul.mubr.f32.gmra.mrb[16].mxu0 %v6612_v40 }
 0x9d8   : > { %2503 = vmatprep.mubr.f32.mxu0 %v4354_v1 }
 0x9db   : > { %2504 = vmatmul.mubr.f32.gmra.mrb[18].mxu0 %v6613_v48 }
 0x9dc   : > { %2509 = vmatprep.mubr.f32.mxu0 %v4354_v1 }
 0x9df   : > { %2510 = vmatmul.mubr.f32.gmra.mrb[20].mxu0 %v6614_v16 }
 0x9e0   : > { %2515 = vmatprep.mubr.f32.mxu0 %v4354_v1 }
 0x9e3   : > { %2516 = vmatmul.mubr.f32.gmra.mrb[22].mxu0 %v6615_v34 }
 0x9e4   : > { %2521 = vmatprep.mubr.f32.mxu0 %v4354_v1 }
 0x9e7   : > { %2522 = vmatmul.mubr.f32.gmra.mrb[24].mxu0 %v6616_v42 }
 0x9e8   : > { %2527 = vmatprep.mubr.f32.mxu0 %v4354_v1 }
 0x9eb   : > { %2528 = vmatmul.mubr.f32.gmra.mrb[26].mxu0 %v6617_v45 }
 0x9ec   : > { %2533 = vmatprep.mubr.f32.mxu0 %v4354_v1 }
 0x9ef   : > { %2534 = vmatmul.mubr.f32.gmra.mrb[28].mxu0 %v6618_v3 }
 0x9f0   : > { %2539 = vmatprep.mubr.f32.mxu0 %v4354_v1  ;;  %v2784_v1 = vsel %vm2224_vm12, %v2764_v0, -inf }
 0x9f1   : > { %2785 = vmax.xlane.f32.xlu1 %v2784_v1 }
 0x9f3   : > { %2540 = vmatmul.mubr.f32.gmra.mrb[30].mxu0 %v6619_v6 }
 0x9f5   : > { %2788 = vmax.xlane.f32.xlu1 %v2787_v57 }
 0x9f9   : > { %2794 = vmax.xlane.f32.xlu1 %v2793_v7 }
 0x9fd   : > { %2800 = vmax.xlane.f32.xlu1 %v2799_v11 }
 0xa01   : > { %2806 = vmax.xlane.f32.xlu1 %v2805_v61 }
 0xa05   : > { %2812 = vmax.xlane.f32.xlu1 %v2811_v25 }
 0xa09   : > { %2818 = vmax.xlane.f32.xlu1 %v2817_v29 }
 0xa0d   : > { %2824 = vmax.xlane.f32.xlu1 %v2823_v23 }
 0xa8a   : > { %v2451_v30 = vpop.f32.mrb[0].mxu0 }
 0xa8b   : > { %v2452_v4 = vadd.f32 %v2451_v30, %v6229_v56  ;;  %v2453_v46 = vpop.f32.mrb[1].mxu0 }
 0xa8c   : > { %v2454_v50 = vadd.f32 %v2453_v46, %v6233_v28 }
 0xa8d   : > { %v2546_v13 = vmax.f32 %v2452_v4, 0.0 }
 0xa8e   : > { %v2457_v35 = vpop.f32.mrb[2].mxu0  ;;  %v2547_v53 = vmax.f32 %v2454_v50, 0.0 }
 0xa8f   : > { %v2458_v39 = vadd.f32 %v2457_v35, %v6229_v56  ;;  %v2459_v22 = vpop.f32.mrb[3].mxu0 }
 0xa90   : > { %v2460_v40 = vadd.f32 %v2459_v22, %v6233_v28  ;;  %2681 = vmatprep.mubr.f32.mxu1 %v2547_v53 }
 0xa91   : > { %2682 = vmatmul.mubr.f32.vlgmr.msra.gmra.mrb[0].mxu1 %v2546_v13  ;;  %v2548_v36 = vmax.f32 %v2458_v39, 0.0 }
 0xa92   : > { %v2549_v17 = vmax.f32 %v2460_v40, 0.0  ;;  %v2463_v27 = vpop.f32.mrb[4].mxu0 }
 0xa93   : > { %v2464_v48 = vadd.f32 %v2463_v27, %v6229_v56  ;;  %v2465_v16 = vpop.f32.mrb[5].mxu0 }
 0xa94   : > { %v2466_v34 = vadd.f32 %v2465_v16, %v6233_v28  ;;  %2686 = vmatprep.mubr.f32.mxu1 %v2549_v17 }
 0xa95   : > { %2687 = vmatmul.mubr.f32.gmra.mrb[2].mxu1 %v2548_v36  ;;  %v2550_v3 = vmax.f32 %v2464_v48, 0.0 }
 0xa96   : > { %v2551_v42 = vmax.f32 %v2466_v34, 0.0  ;;  %v2469_v45 = vpop.f32.mrb[6].mxu0 }
 0xa97   : > { %v2470_v6 = vadd.f32 %v2469_v45, %v6229_v56  ;;  %v2471_v54 = vpop.f32.mrb[7].mxu0 }
 0xa98   : > { %v2472_v24 = vadd.f32 %v2471_v54, %v6233_v28  ;;  %2691 = vmatprep.mubr.f32.mxu1 %v2551_v42 }
 0xa99   : > { %2692 = vmatmul.mubr.f32.gmra.mrb[4].mxu1 %v2550_v3  ;;  %v2552_v38 = vmax.f32 %v2470_v6, 0.0 }
 0xa9a   : > { %v2553_v21 = vmax.f32 %v2472_v24, 0.0  ;;  %v2475_v19 = vpop.f32.mrb[8].mxu0 }
 0xa9b   : > { %v2476_v63 = vadd.f32 %v2475_v19, %v6229_v56  ;;  %v2477_v2 = vpop.f32.mrb[9].mxu0 }
 0xa9c   : > { %v2478_v26 = vadd.f32 %v2477_v2, %v6233_v28  ;;  %2696 = vmatprep.mubr.f32.mxu1 %v2553_v21 }
 0xa9d   : > { %2697 = vmatmul.mubr.f32.gmra.mrb[6].mxu1 %v2552_v38  ;;  %v2554_v43 = vmax.f32 %v2476_v63, 0.0 }
 0xa9e   : > { %v2555_v18 = vmax.f32 %v2478_v26, 0.0  ;;  %v2481_v10 = vpop.f32.mrb[10].mxu0 }
 0xa9f   : > { %v2482_v0 = vadd.f32 %v2481_v10, %v6229_v56  ;;  %v2483_v58 = vpop.f32.mrb[11].mxu0 }
 0xaa0   : > { %v2484_v1 = vadd.f32 %v2483_v58, %v6233_v28  ;;  %2701 = vmatprep.mubr.f32.mxu1 %v2555_v18 }
 0xaa1   : > { %2702 = vmatmul.mubr.f32.gmra.mrb[8].mxu1 %v2554_v43  ;;  %v2556_v57 = vmax.f32 %v2482_v0, 0.0 }
 0xaa2   : > { %v2557_v20 = vmax.f32 %v2484_v1, 0.0  ;;  %v2487_v37 = vpop.f32.mrb[12].mxu0 }
 0xaa3   : > { %v2488_v62 = vadd.f32 %v2487_v37, %v6229_v56  ;;  %v2489_v5 = vpop.f32.mrb[13].mxu0 }
 0xaa4   : > { %v2490_v49 = vadd.f32 %v2489_v5, %v6233_v28  ;;  %2706 = vmatprep.mubr.f32.mxu1 %v2557_v20  ;;  %v2780_v20 = vpop.xlane.xlu0 %2779 }
 0xaa5   : > { %2707 = vmatmul.mubr.f32.gmra.mrb[10].mxu1 %v2556_v57  ;;  %v2558_v32 = vmax.f32 %v2488_v62, 0.0  ;;  %v6267_v57 = vld [vmem:[#allocation21] ss:$0 sm:$0xff] }
 0xaa6   : > { %v2559_v7 = vmax.f32 %v2490_v49, 0.0  ;;  %v2493_v31 = vpop.f32.mrb[14].mxu0  ;;  %v2826_v49 = vsub.f32 1.0, %v2780_v20 }
 0xaa7   : > { %v2494_v44 = vadd.f32 %v2493_v31, %v6229_v56  ;;  %v2495_v11 = vpop.f32.mrb[15].mxu0 }
 0xaa8   : > { %v2496_v8 = vadd.f32 %v2495_v11, %v6233_v28  ;;  %2711 = vmatprep.mubr.f32.mxu1 %v2559_v7  ;;  %v2783_v7 = vpop.xlane.xlu0 %2782 }
 0xaa9   : > { %2712 = vmatmul.mubr.f32.gmra.mrb[12].mxu1 %v2558_v32  ;;  %v2560_v61 = vmax.f32 %v2494_v44, 0.0  ;;  %v2842_v32 = vld [vmem:[#allocation2] sm:$0xff]  ;;  %v2786_v44 = vpop.xlane.xlu1 %2785 }
 0xaaa   : > { %v2561_v9 = vmax.f32 %v2496_v8, 0.0  ;;  %v2499_v14 = vpop.f32.mrb[16].mxu0 }
 0xaab   : > { %v2500_v33 = vadd.f32 %v2499_v14, %v6229_v56  ;;  %v2501_v12 = vpop.f32.mrb[17].mxu0 }
 0xaac   : > { %v2502_v59 = vadd.f32 %v2501_v12, %v6233_v28  ;;  %2716 = vmatprep.mubr.f32.mxu1 %v2561_v9  ;;  %v2827_v9 = vsub.f32 1.0, %v2783_v7  ;;  %v2843_v12 = vld [vmem:[#allocation2 + $0x8] sm:$0xff] }
 0xaad   : > { %2717 = vmatmul.mubr.f32.gmra.mrb[14].mxu1 %v2560_v61  ;;  %v2562_v60 = vmax.f32 %v2500_v33, 0.0 }
 0xaae   : > { %v2563_v25 = vmax.f32 %v2502_v59, 0.0  ;;  %v2505_v47 = vpop.f32.mrb[18].mxu0 }
 0xaaf   : > { %v2506_v52 = vadd.f32 %v2505_v47, %v6229_v56  ;;  %v2507_v29 = vpop.f32.mrb[19].mxu0 }
 0xab0   : > { %v2508_v41 = vadd.f32 %v2507_v29, %v6233_v28  ;;  %2721 = vmatprep.mubr.f32.mxu1 %v2563_v25 }
 0xab1   : > { %2722 = vmatmul.mubr.f32.gmra.mrb[16].mxu1 %v2562_v60  ;;  %v2564_v23 = vmax.f32 %v2506_v52, 0.0  ;;  %v2828_v60 = vsub.f32 1.0, %v2786_v44  ;;  %v2789_v52 = vpop.xlane.xlu1 %2788 }
 0xab2   : > { %v2565_v15 = vmax.f32 %v2508_v41, 0.0  ;;  %v2511_v55 = vpop.f32.mrb[20].mxu0 }
 0xab3   : > { %v2512_v51 = vadd.f32 %v2511_v55, %v6229_v56  ;;  %v2513_v30 = vpop.f32.mrb[21].mxu0  ;;  %v2844_v55 = vld [vmem:[#allocation2 + $0x10] sm:$0xff] }
 0xab4   : > { %v2514_v4 = vadd.f32 %v2513_v30, %v6233_v28  ;;  %2726 = vmatprep.mubr.f32.mxu1 %v2565_v15 }
 0xab5   : > { %2727 = vmatmul.mubr.f32.gmra.mrb[18].mxu1 %v2564_v23  ;;  %v2566_v35 = vmax.f32 %v2512_v51, 0.0 }
 0xab6   : > { %v2567_v46 = vmax.f32 %v2514_v4, 0.0  ;;  %v2517_v50 = vpop.f32.mrb[22].mxu0  ;;  %v2829_v4 = vsub.f32 1.0, %v2789_v52 }
 0xab7   : > { %v2518_v53 = vadd.f32 %v2517_v50, %v6229_v56  ;;  %v2519_v13 = vpop.f32.mrb[23].mxu0 }
 0xab8   : > { %v2520_v39 = vadd.f32 %v2519_v13, %v6233_v28  ;;  %2731 = vmatprep.mubr.f32.mxu1 %v2567_v46  ;;  %v2792_v46 = vpop.xlane.xlu0 %2791  ;;  %v2845_v13 = vld [vmem:[#allocation2 + $0x18] sm:$0xff] }
 0xab9   : > { %2732 = vmatmul.mubr.f32.gmra.mrb[20].mxu1 %v2566_v35  ;;  %v2568_v17 = vmax.f32 %v2518_v53, 0.0 }
 0xaba   : > { %v2569_v22 = vmax.f32 %v2520_v39, 0.0  ;;  %v2523_v40 = vpop.f32.mrb[24].mxu0 }
 0xabb   : > { %v2524_v27 = vadd.f32 %v2523_v40, %v6229_v56  ;;  %v2525_v36 = vpop.f32.mrb[25].mxu0 }
 0xabc   : > { %v2526_v48 = vadd.f32 %v2525_v36, %v6233_v28  ;;  %2736 = vmatprep.mubr.f32.mxu1 %v2569_v22 }
 0xabd   : > { %2737 = vmatmul.mubr.f32.gmra.mrb[22].mxu1 %v2568_v17  ;;  %v2570_v42 = vmax.f32 %v2524_v27, 0.0  ;;  %v2830_v17 = vsub.f32 1.0, %v2792_v46  ;;  %v2795_v27 = vpop.xlane.xlu1 %2794 }
 0xabe   : > { %v2571_v16 = vmax.f32 %v2526_v48, 0.0  ;;  %v2529_v34 = vpop.f32.mrb[26].mxu0 }
 0xabf   : > { %v2530_v45 = vadd.f32 %v2529_v34, %v6229_v56  ;;  %v2531_v3 = vpop.f32.mrb[27].mxu0  ;;  %v2846_v34 = vld [vmem:[#allocation2 + $0x20] sm:$0xff] }
 0xac0   : > { %v2532_v6 = vadd.f32 %v2531_v3, %v6233_v28  ;;  %2741 = vmatprep.mubr.f32.mxu1 %v2571_v16 }
 0xac1   : > { %2742 = vmatmul.mubr.f32.gmra.mrb[24].mxu1 %v2570_v42  ;;  %v2572_v21 = vmax.f32 %v2530_v45, 0.0 }
 0xac2   : > { %v2573_v54 = vmax.f32 %v2532_v6, 0.0  ;;  %v2535_v24 = vpop.f32.mrb[28].mxu0  ;;  %v2831_v6 = vsub.f32 1.0, %v2795_v27 }
 0xac3   : > { %v2536_v19 = vadd.f32 %v2535_v24, %v6229_v56  ;;  %v2537_v38 = vpop.f32.mrb[29].mxu0 }
 0xac4   : > { %v2538_v63 = vadd.f32 %v2537_v38, %v6233_v28  ;;  %2746 = vmatprep.mubr.f32.mxu1 %v2573_v54  ;;  %v2798_v54 = vpop.xlane.xlu0 %2797  ;;  %v2847_v38 = vld [vmem:[#allocation2 + $0x28] sm:$0xff] }
 0xac5   : > { %2747 = vmatmul.mubr.f32.gmra.mrb[26].mxu1 %v2572_v21  ;;  %v2574_v18 = vmax.f32 %v2536_v19, 0.0 }
 0xac6   : > { %v2575_v2 = vmax.f32 %v2538_v63, 0.0  ;;  %v2541_v26 = vpop.f32.mrb[30].mxu0 }
 0xac7   : > { %v2542_v10 = vadd.f32 %v2541_v26, %v6229_v56  ;;  %v2543_v43 = vpop.f32.mrb[31].mxu0 }
 0xac8   : > { %v2544_v0 = vadd.f32 %v2543_v43, %v6233_v28  ;;  %2751 = vmatprep.mubr.f32.mxu1 %v2575_v2 }
 0xac9   : > { %2752 = vmatmul.mubr.f32.gmra.mrb[28].mxu1 %v2574_v18  ;;  %v2576_v1 = vmax.f32 %v2542_v10, 0.0  ;;  %v2832_v18 = vsub.f32 1.0, %v2798_v54  ;;  %v2801_v10 = vpop.xlane.xlu1 %2800 }
 0xaca   : > { %v2577_v58 = vmax.f32 %v2544_v0, 0.0 }
 0xacc   : > { %2756 = vmatprep.mubr.f32.mxu1 %v2577_v58 }
 0xacd   : > { %2757 = vmatmul.mubr.f32.gmra.mrb[30].mxu1 %v2576_v1  ;;  %v2848_v1 = vld [vmem:[#allocation2 + $0x30] sm:$0xff] }
 0xb64   : > { %v3339_v37 = vpop.f32.mrb[0].mxu1 }
 0xb65   : > { %v3340_v62 = vpop.f32.mrb[1].mxu1 }
 0xb66   : > { %v3341_v5 = vadd.f32 %v3340_v62, %v3339_v37 }
 0xb68   : > { %v2684_v56 = vadd.f32 %v3341_v5, %v6267_v57  ;;  %v3342_v31 = vpop.f32.mrb[2].mxu1  ;;  %v2833_v5 = vsub.f32 1.0, %v2801_v10 }
 0xb69   : > { %v3343_v28 = vpop.f32.mrb[3].mxu1 }
 0xb6a   : > { %v2858_v11 = vmul.f32 %v2826_v49, %v2684_v56  ;;  %v3344_v8 = vadd.f32 %v3343_v28, %v3342_v31  ;;  %v2804_v49 = vpop.xlane.xlu0 %2803 }
 0xb6c   : > { %v2874_v14 = vadd.f32 %v2858_v11, %v2842_v32  ;;  %v2689_v61 = vadd.f32 %v3344_v8, %v6267_v57  ;;  %v3345_v33 = vpop.f32.mrb[4].mxu1  ;;  %v2849_v32 = vld [vmem:[#allocation2 + $0x38] sm:$0xff]  ;;  %v2834_v8 = vsub.f32 1.0, %v2804_v49 }
 0xb6d   : > { %v3346_v59 = vpop.f32.mrb[5].mxu1 }
 0xb6e   : > { %2890 = vst [vmem:[%s4984_s1] sm:$0xff] %v2874_v14  ;;  %v2859_v25 = vmul.f32 %v2827_v9, %v2689_v61  ;;  %v3347_v47 = vadd.f32 %v3346_v59, %v3345_v33  ;;  %v2807_v9 = vpop.xlane.xlu1 %2806  ;;  %v2810_v52 = vpop.xlane.xlu0 %2809 }
 0xb70   : > { %v2875_v29 = vadd.f32 %v2859_v25, %v2843_v12  ;;  %v2694_v41 = vadd.f32 %v3347_v47, %v6267_v57  ;;  %v3348_v15 = vpop.f32.mrb[6].mxu1  ;;  %v2850_v12 = vld [vmem:[#allocation2 + $0x40] sm:$0xff] }
 0xb71   : > { %v3349_v23 = vpop.f32.mrb[7].mxu1 }
 0xb72   : > { %2891 = vst [vmem:[%s4984_s1 + $0x8] sm:$0xff] %v2875_v29  ;;  %v2860_v51 = vmul.f32 %v2828_v60, %v2694_v41  ;;  %v3350_v30 = vadd.f32 %v3349_v23, %v3348_v15  ;;  %v2835_v60 = vsub.f32 1.0, %v2807_v9  ;;  %v2813_v46 = vpop.xlane.xlu1 %2812  ;;  %v2816_v27 = vpop.xlane.xlu0 %2815 }
 0xb74   : > { %v2876_v50 = vadd.f32 %v2860_v51, %v2844_v55  ;;  %v2699_v35 = vadd.f32 %v3350_v30, %v6267_v57  ;;  %v3351_v53 = vpop.f32.mrb[8].mxu1  ;;  %v2851_v55 = vld [vmem:[#allocation2 + $0x48] sm:$0xff] }
 0xb75   : > { %v3352_v39 = vpop.f32.mrb[9].mxu1 }
 0xb76   : > { %2892 = vst [vmem:[%s4984_s1 + $0x10] sm:$0xff] %v2876_v50  ;;  %v2861_v22 = vmul.f32 %v2829_v4, %v2699_v35  ;;  %v3353_v40 = vadd.f32 %v3352_v39, %v3351_v53  ;;  %v2836_v4 = vsub.f32 1.0, %v2810_v52  ;;  %v2819_v54 = vpop.xlane.xlu1 %2818  ;;  %v2822_v10 = vpop.xlane.xlu0 %2821 }
 0xb78   : > { %v2877_v36 = vadd.f32 %v2861_v22, %v2845_v13  ;;  %v2704_v48 = vadd.f32 %v3353_v40, %v6267_v57  ;;  %v3354_v16 = vpop.f32.mrb[10].mxu1  ;;  %v2852_v13 = vld [vmem:[#allocation2 + $0x50] sm:$0xff] }
 0xb79   : > { %v3355_v42 = vpop.f32.mrb[11].mxu1 }
 0xb7a   : > { %2893 = vst [vmem:[%s4984_s1 + $0x18] sm:$0xff] %v2877_v36  ;;  %v2862_v45 = vmul.f32 %v2830_v17, %v2704_v48  ;;  %v3356_v3 = vadd.f32 %v3355_v42, %v3354_v16  ;;  %v2837_v17 = vsub.f32 1.0, %v2813_v46  ;;  %v2825_v49 = vpop.xlane.xlu1 %2824 }
 0xb7c   : > { %v2878_v24 = vadd.f32 %v2862_v45, %v2846_v34  ;;  %v2709_v21 = vadd.f32 %v3356_v3, %v6267_v57  ;;  %v3357_v19 = vpop.f32.mrb[12].mxu1  ;;  %v2853_v34 = vld [vmem:[#allocation2 + $0x58] sm:$0xff] }
 0xb7d   : > { %v3358_v63 = vpop.f32.mrb[13].mxu1 }
 0xb7e   : > { %2894 = vst [vmem:[%s4984_s1 + $0x20] sm:$0xff] %v2878_v24  ;;  %v2863_v2 = vmul.f32 %v2831_v6, %v2709_v21  ;;  %v3359_v26 = vadd.f32 %v3358_v63, %v3357_v19  ;;  %v2838_v6 = vsub.f32 1.0, %v2816_v27 }
 0xb80   : > { %v2879_v43 = vadd.f32 %v2863_v2, %v2847_v38  ;;  %v2714_v0 = vadd.f32 %v3359_v26, %v6267_v57  ;;  %v3360_v58 = vpop.f32.mrb[14].mxu1  ;;  %v2854_v38 = vld [vmem:[#allocation2 + $0x60] sm:$0xff] }
 0xb81   : > { %v3361_v20 = vpop.f32.mrb[15].mxu1 }
 0xb82   : > { %2895 = vst [vmem:[%s4984_s1 + $0x28] sm:$0xff] %v2879_v43  ;;  %v2864_v37 = vmul.f32 %v2832_v18, %v2714_v0  ;;  %v3362_v62 = vadd.f32 %v3361_v20, %v3360_v58  ;;  %v2839_v18 = vsub.f32 1.0, %v2819_v54 }
 0xb84   : > { %v2880_v7 = vadd.f32 %v2864_v37, %v2848_v1  ;;  %v2719_v56 = vadd.f32 %v3362_v62, %v6267_v57  ;;  %v3363_v31 = vpop.f32.mrb[16].mxu1  ;;  %v2855_v1 = vld [vmem:[#allocation2 + $0x68] sm:$0xff] }
 0xb85   : > { %v3364_v28 = vpop.f32.mrb[17].mxu1 }
 0xb86   : > { %2896 = vst [vmem:[%s4984_s1 + $0x30] sm:$0xff] %v2880_v7  ;;  %v2865_v44 = vmul.f32 %v2833_v5, %v2719_v56  ;;  %v3365_v11 = vadd.f32 %v3364_v28, %v3363_v31  ;;  %v2840_v5 = vsub.f32 1.0, %v2822_v10 }
 0xb88   : > { %v2881_v14 = vadd.f32 %v2865_v44, %v2849_v32  ;;  %v2724_v61 = vadd.f32 %v3365_v11, %v6267_v57  ;;  %v3366_v33 = vpop.f32.mrb[18].mxu1  ;;  %v2856_v32 = vld [vmem:[#allocation2 + $0x70] sm:$0xff] }
 0xb89   : > { %v3367_v59 = vpop.f32.mrb[19].mxu1 }
 0xb8a   : > { %2897 = vst [vmem:[%s4984_s1 + $0x38] sm:$0xff] %v2881_v14  ;;  %v2866_v25 = vmul.f32 %v2834_v8, %v2724_v61  ;;  %v3368_v47 = vadd.f32 %v3367_v59, %v3366_v33  ;;  %v2841_v8 = vsub.f32 1.0, %v2825_v49  ;;  %v2857_v61 = vld [vmem:[#allocation2 + $0x78] sm:$0xff] }
 0xb8c   : > { %v2882_v29 = vadd.f32 %v2866_v25, %v2850_v12  ;;  %v2729_v41 = vadd.f32 %v3368_v47, %v6267_v57  ;;  %v3369_v15 = vpop.f32.mrb[20].mxu1 }
 0xb8d   : > { %v3370_v23 = vpop.f32.mrb[21].mxu1 }
 0xb8e   : > { %2898 = vst [vmem:[%s4984_s1 + $0x40] sm:$0xff] %v2882_v29  ;;  %v2867_v51 = vmul.f32 %v2835_v60, %v2729_v41  ;;  %v3371_v30 = vadd.f32 %v3370_v23, %v3369_v15 }
 0xb90   : > { %v2883_v50 = vadd.f32 %v2867_v51, %v2851_v55  ;;  %v2734_v35 = vadd.f32 %v3371_v30, %v6267_v57  ;;  %v3372_v53 = vpop.f32.mrb[22].mxu1 }
 0xb91   : > { %v3373_v39 = vpop.f32.mrb[23].mxu1 }
 0xb92   : > { %2899 = vst [vmem:[%s4984_s1 + $0x48] sm:$0xff] %v2883_v50  ;;  %v2868_v22 = vmul.f32 %v2836_v4, %v2734_v35  ;;  %v3374_v40 = vadd.f32 %v3373_v39, %v3372_v53 }
 0xb94   : > { %v2884_v36 = vadd.f32 %v2868_v22, %v2852_v13  ;;  %v2739_v48 = vadd.f32 %v3374_v40, %v6267_v57  ;;  %v3375_v16 = vpop.f32.mrb[24].mxu1 }
 0xb95   : > { %v3376_v42 = vpop.f32.mrb[25].mxu1 }
 0xb96   : > { %2900 = vst [vmem:[%s4984_s1 + $0x50] sm:$0xff] %v2884_v36  ;;  %v2869_v45 = vmul.f32 %v2837_v17, %v2739_v48  ;;  %v3377_v3 = vadd.f32 %v3376_v42, %v3375_v16 }
 0xb98   : > { %v2885_v24 = vadd.f32 %v2869_v45, %v2853_v34  ;;  %v2744_v21 = vadd.f32 %v3377_v3, %v6267_v57  ;;  %v3378_v19 = vpop.f32.mrb[26].mxu1 }
 0xb99   : > { %v3379_v63 = vpop.f32.mrb[27].mxu1 }
 0xb9a   : > { %2901 = vst [vmem:[%s4984_s1 + $0x58] sm:$0xff] %v2885_v24  ;;  %v2870_v2 = vmul.f32 %v2838_v6, %v2744_v21  ;;  %v3380_v26 = vadd.f32 %v3379_v63, %v3378_v19 }
 0xb9c   : > { %v2886_v43 = vadd.f32 %v2870_v2, %v2854_v38  ;;  %v2749_v0 = vadd.f32 %v3380_v26, %v6267_v57  ;;  %v3381_v58 = vpop.f32.mrb[28].mxu1 }
 0xb9d   : > { %v3382_v20 = vpop.f32.mrb[29].mxu1 }
 0xb9e   : > { %2902 = vst [vmem:[%s4984_s1 + $0x60] sm:$0xff] %v2886_v43  ;;  %v2871_v37 = vmul.f32 %v2839_v18, %v2749_v0  ;;  %v3383_v62 = vadd.f32 %v3382_v20, %v3381_v58 }
 0xba0   : > { %v2887_v7 = vadd.f32 %v2871_v37, %v2855_v1  ;;  %v2754_v56 = vadd.f32 %v3383_v62, %v6267_v57  ;;  %v3384_v31 = vpop.f32.mrb[30].mxu1 }
 0xba1   : > { %v3385_v28 = vpop.f32.mrb[31].mxu1 }
 0xba2   : > { %2903 = vst [vmem:[%s4984_s1 + $0x68] sm:$0xff] %v2887_v7  ;;  %v2872_v44 = vmul.f32 %v2840_v5, %v2754_v56  ;;  %v3386_v11 = vadd.f32 %v3385_v28, %v3384_v31 }
 0xba4   : > { %v2888_v9 = vadd.f32 %v2872_v44, %v2856_v32  ;;  %v2759_v14 = vadd.f32 %v3386_v11, %v6267_v57 }
 0xba6   : > { %2904 = vst [vmem:[%s4984_s1 + $0x70] sm:$0xff] %v2888_v9  ;;  %v2873_v33 = vmul.f32 %v2841_v8, %v2759_v14 }
 0xba8   : > { %v2889_v12 = vadd.f32 %v2873_v33, %v2857_v61 }
 0xbaa   : > { %2905 = vst [vmem:[%s4984_s1 + $0x78] sm:$0xff] %v2889_v12 }
 0xbab PF: > { %s6620_s10 = sld [smem:[#allocation35_spill]]  ;;  %s6621_s7 = sld [smem:[#allocation81_spill]] }
 0xbac   : > { %s2920_s16 = sshll.u32 %s4984_s1, 4  ;;  %s2907_s3 = scalar_lea.sflag [#allocation6], %s4889_s29  ;;  %s6308_s16 = int_to_ptr.vmem [resolvable:$true] %s2920_s16 }
 0xbad   : > { %s4193_s2 = scalar_lea.vmem %s6308_s16, 2048  ;;  %p6622_p0 = scmp.ne.s32.totalorder %s6516_s14, 0 }
 0xbae   : > { %p4194_p1 = scmp.ne.s32.totalorder %s6308_s16, %s4193_s2  ;;  %s4355_s6 = smov [#allocation22]  }
 0xbaf   : > { %s4197_s20 = sshll.u32 %s4355_s6, 4  ;;  %s4198_s20 = int_to_ptr.vmem [resolvable:$false] %s4197_s20 }
 0xbb0   : > { %p4195_p10 = pnand %p4194_p1, %p6622_p0  ;;  %s4199_s25 = scalar_lea.vmem %s4198_s20, 4096 }
 0xbb1   : > { %s3194_s28 = sshll.u32 %s6620_s10, 11  ;;  %p4200_p3 = scmp.lt.s32.totalorder %s6308_s16, %s4198_s20 }
 0xbb2   : > { %s6305_s11 = scalar_lea.hbm %s6621_s7, %s3194_s28  ;;  %p4196_p7 = pneg %p4195_p10 }
 0xbb3   : > { %p4201_p13 = scmp.lt.s32.totalorder %s4199_s25, %s4193_s2 }
 0xbb5   : > { %p4202_p12 = por %p4201_p13, %p4200_p3 }
 0xbb7   : > { %p4203_p2 = pnand %p4202_p12, %p4196_p7 }
 0xbb9   : > { %4206 = shalt.err (!%p4203_p2)
}
 0xbba   : > { %s4207_s18 = scalar_lea.hbm %s6305_s11, 2048  ;;  %s4211_s5 = scalar_lea.hbm %s6621_s7, 4096 }
 0xbbb   : > { %p4208_p6 = scmp.ne.s32.totalorder %s6305_s11, %s4207_s18  ;;  %p4212_p8 = scmp.lt.u32.totalorder %s6305_s11, %s6621_s7 }
 0xbbc   : > { %p4213_p5 = scmp.lt.u32.totalorder %s4211_s5, %s4207_s18  ;;  %p4215_p1 = scmp.lt.u32.totalorder %s4207_s18, %s6305_s11 }
 0xbbd   : > { %p4209_p9 = pnand %p4208_p6, %p6622_p0 }
 0xbbe   : > { %p4214_p4 = por %p4213_p5, %p4212_p8 }
 0xbbf   : > { %p4210_p11 = pneg %p4209_p9 }
 0xbc0   : > { %p4216_p10 = por %p4215_p1, %p4214_p4 }
 0xbc2   : > { %p4217_p7 = pnand %p4216_p10, %p4210_p11 }
 0xbc4   : > { %4220 = shalt.err (!%p4217_p7)
}
 0xbc5   : > { %s4356_s1 = smov 128   ;;  %s4357_s24 = smov 8  }
 0xbc6   : > { %3653 = dma.vmem_to_hbm [thread:$0]  (%p6622_p0), %s6308_s16, 2048, %s6305_s11, %s2907_s3, %s4356_s1, %s4356_s1, %s4357_s24  }
 0xbc7 PF: > { %s6623_s12 = sld [smem:[#allocation32_spill]]  ;;  %p3707_p3 = scmp.ge.s32.totalorder %s4335_s27, 2 }
 0xbc8   : > { %p6624_p13 = scmp.ne.s32.totalorder %s6517_s19, 0 }
 0xbca   : > { %p3691_p12 = pnand %p3707_p3, %p6624_p13 }
 0xbcd   : > { %s2935_s10 = sand.u32 1, %s6623_s12  }
 0xbce   : > { %s2936_s28 = scalar_lea.sflag [#allocation6], %s2935_s10 }
 0xbcf   : > { %4290 = dma.done.wait (!%p3691_p12), %s2936_s28, 2048  }
 0xbd0   : > { %4292 = vsyncadd (!%p3691_p12), %s2936_s28, 4294965248  ;;  %s36_s27 = sadd.s32 1, %s4335_s27   ;;  %s6625_s17 = sld [smem:[#allocation30_spill]] }
 0xbd1   : > { %p33_p2 = scmp.ge.s32.totalorder %s36_s27, 10   ;;  %s6626_s18 = sld [smem:[#allocation31_spill]] }
 0xbd2   : > { %s6627_s19 = sld [smem:[#allocation41_spill]]  ;;  %s6628_s20 = sld [smem:[#allocation33_spill]] }
 0xbd3   : > { %s6629_s23 = sld [smem:[#allocation36_spill]]  ;;  %s6630_s25 = sld [smem:[#allocation39_spill]] }
 0xbd4   : > { %s6631_s21 = smov %s4315_s22  ;;  %s6632_s22 = smov %s4790_s9 }
 0xbd5   : > { %s6633_s24 = smov %s4331_s26  ;;  %s6634_s26 = smov %s6640_s13 }
 0xbd6   :  { %35 = sbr.rel (!%p33_p2) target bundleno = 29 (0x1d), region = 189 }
 0xbdd   :  { %2941 = vsyncpa [#allocation5], 1 }
 0xbde   :  { %2943 = vsyncpa [#allocation5 + $0x1], 1 }
 0xbdf   :  { %2944 = vsyncpa [#allocation8], 1 }
 0xbe0   :  { %2945 = vsyncpa [#allocation11], 1 }
 0xbe1   :  { %2947 = vsyncpa [#allocation11 + $0x1], 1 }
 0xbe2   :  { %2948 = vsyncpa [#allocation14], 1 }
 0xbe3   :  { %2950 = vsyncpa [#allocation14 + $0x1], 1 }
 0xbe4   :  { %2951 = vsyncpa [#allocation17], 1 }
 0xbe5   :  { %2952 = vsyncpa [#allocation20], 1 }
 0xbe6   :  { %2953 = vsyncpa [#allocation6], 1 }
 0xbe7   :  { %2955 = vsyncpa [#allocation6 + $0x1], 1 }

</bundles_post_ra>
